<compile_context>
chip_gen: v7x
topology: tpu7x:2x2x1
jax: 0.10.0
libtpu: 0.0.40
codegen_flags: <defaults>
</compile_context>

<pallas_src>
import functools

import jax
import jax.numpy as jnp
from jax import lax
from jax.experimental import pallas as pl
from jax.experimental.pallas import tpu as pltpu


def _round_up(x, m):
    return (x + m - 1) // m * m


def _tile_padded_bytes(shape, dtype):
    """Bytes a VMEM block of `shape` really occupies after (sublane,128) padding."""
    itemsize = jnp.dtype(dtype).itemsize
    sublane = {4: 8, 2: 16, 1: 32}.get(itemsize, 8)
    dims = list(shape)
    if len(dims) == 0:
        dims = [1, 1]
    elif len(dims) == 1:
        dims = [1] + dims
    lead = 1
    for d in dims[:-2]:
        lead *= int(d)
    return (lead * _round_up(int(dims[-2]), sublane)
            * _round_up(int(dims[-1]), 128) * itemsize)


def _vmem_capacity_bytes():
    try:
        info = pltpu.get_tpu_info()
        cap = getattr(info, "vmem_capacity_bytes", None)
        if cap:
            return int(cap)
    except Exception:
        pass
    return 64 << 20   # conservative fallback (v7x per-TC VMEM)


def _choose_batch_tiling(B, target_tb):
    """Pick (tile, n_tiles, padded_B).

    tile is a multiple of 128 (lane-dense), n_tiles >= 2 whenever B > 128 so the
    'parallel' batch axis shards across both TCs (v7x), and padding beyond the
    128-alignment of B is avoided when an exact divisor exists (otherwise it is
    bounded by one tile).
    """
    m = -(-B // 128)                       # lane blocks after padding B to 128
    td = max(1, min(target_tb // 128, m))
    if m >= 2:
        td = min(td, -(-m // 2))           # guarantee >= 2 grid steps
    d = 1
    for cand in range(td, 0, -1):          # largest exact divisor <= target
        if m % cand == 0:
            d = cand
            break
    if d * 2 < td:                         # divisor way below target: accept a
        d = td                             # ragged (zero-padded) last tile
    nb = -(-m // d)
    tb = 128 * d
    return tb, nb, nb * tb


def _block(x, w1, b1, w2, b2, w3, b3, compute_dtype):
    """One ResBlock on a (C, TB) activation tile; f32 residual / velocity."""
    h = jnp.dot(w1, x.astype(compute_dtype), preferred_element_type=jnp.float32)
    h = jnp.sin(h + b1)
    h = jnp.dot(w2, h.astype(compute_dtype), preferred_element_type=jnp.float32)
    h = jnp.sin(h + b2)
    v = jnp.dot(w3, h.astype(compute_dtype), preferred_element_type=jnp.float32) + b3
    return x + v, v


def _make_resident_kernel(steps, shared_weights, collect_velocity, compute_dtype,
                          unroll):
    """All weights resident in VMEM; single grid axis over batch tiles."""

    def kernel(x_ref, w1_ref, b1_ref, w2_ref, b2_ref, w3_ref, b3_ref,
               out_ref, *vel_refs):
        vel_ref = vel_refs[0] if collect_velocity else None
        x0 = x_ref[...].astype(jnp.float32)                        # (C, TB)

        if shared_weights:
            # Hoist the shared weight/bias loads out of the step loop.
            w1, b1 = w1_ref[0], b1_ref[0]
            w2, b2 = w2_ref[0], b2_ref[0]
            w3, b3 = w3_ref[0], b3_ref[0]

            def step(j, x):
                x, v = _block(x, w1, b1, w2, b2, w3, b3, compute_dtype)
                if collect_velocity:
                    vel_ref[j] = v.astype(vel_ref.dtype)
                return x
        else:
            def step(j, x):
                x, v = _block(x, w1_ref[j], b1_ref[j], w2_ref[j], b2_ref[j],
                              w3_ref[j], b3_ref[j], compute_dtype)
                if collect_velocity:
                    vel_ref[j] = v.astype(vel_ref.dtype)
                return x

        if unroll:
            x = x0
            for j in range(steps):
                x = step(j, x)
        else:
            x = lax.fori_loop(0, steps, step, x0)
        out_ref[...] = x.astype(out_ref.dtype)

    return kernel


def _make_stream_kernel(collect_velocity, compute_dtype):
    """Per-layer weight streaming; grid=(batch tiles, steps).  The f32 residual
    is carried in the revisited output block (written back once per batch tile)."""

    def kernel(x_ref, w1_ref, b1_ref, w2_ref, b2_ref, w3_ref, b3_ref,
               out_ref, *vel_refs):
        vel_ref = vel_refs[0] if collect_velocity else None
        j = pl.program_id(1)

        @pl.when(j == 0)
        def _():
            out_ref[...] = x_ref[...].astype(jnp.float32)

        x = out_ref[...]
        x, v = _block(x, w1_ref[0], b1_ref[0], w2_ref[0], b2_ref[0],
                      w3_ref[0], b3_ref[0], compute_dtype)
        out_ref[...] = x
        if collect_velocity:
            vel_ref[0] = v.astype(vel_ref.dtype)

    return kernel


@functools.partial(
    jax.jit,
    static_argnames=("n_layers", "shared_weights", "steps", "get_velocity",
                     "batch_tile", "velocity_dtype", "force_layer_stream"),
)
def resnet_forward(x, params, *, n_layers, shared_weights, steps="all",
                   get_velocity=False, batch_tile=2048,
                   velocity_dtype=jnp.float32, force_layer_stream=False):
    """ResNet.forward: x (B, C) -> (B, C)  [and per-layer velocities if asked]."""
    if steps == "all":
        steps = n_layers
    assert 0 < steps <= n_layers

    B, C = x.shape
    compute_dtype = params["w1"].dtype
    vel_dtype = jnp.dtype(velocity_dtype)

    if shared_weights:
        w1, b1, w2, b2, w3, b3 = (params[k] for k in
                                  ("w1", "b1", "w2", "b2", "w3", "b3"))
    else:   # only stream the weights for the layers that actually run
        w1, b1, w2, b2, w3, b3 = (params[k][:steps] for k in
                                  ("w1", "b1", "w2", "b2", "w3", "b3"))
    weights = (w1, b1, w2, b2, w3, b3)
    H = w2.shape[-1]

    tb, nb, b_pad = _choose_batch_tiling(B, batch_tile)

    # Transpose so batch sits on the lane axis; pad batch only to the 128/tile grid.
    xt = jnp.transpose(x.astype(jnp.float32))                     # (C, B)
    xt = jnp.pad(xt, ((0, 0), (0, b_pad - B)))                    # (C, b_pad)

    # --- VMEM budget from tile-PADDED sizes: w1's 3-wide lane dim pads to 128,
    # biases pad 1->128 lanes, bf16 blocks pad sublanes to 16, plus the (H, tb)
    # f32 intermediates and double-buffering of every block. ---
    act_blk = _tile_padded_bytes((C, tb), jnp.float32)            # x / out tile
    inter = 2 * _round_up(H, 8) * tb * 4                          # h temps (f32)
    headroom = 8 << 20

    full_weight_blk = sum(_tile_padded_bytes(a.shape, a.dtype) for a in weights)
    layer_weight_blk = sum(_tile_padded_bytes((1,) + a.shape[1:], a.dtype)
                           for a in weights)
    vel_full_blk = _tile_padded_bytes((steps, C, tb), vel_dtype) if get_velocity else 0
    vel_layer_blk = _tile_padded_bytes((1, C, tb), vel_dtype) if get_velocity else 0

    resident_need = (2 * full_weight_blk + 4 * act_blk + 2 * vel_full_blk
                     + inter + headroom)
    stream_need = (2 * layer_weight_blk + 4 * act_blk + 2 * vel_layer_blk
                   + inter + headroom)

    # No hard 64 MiB cap: v5e/v6e expose ~128 MiB, v7x ~64 MiB per TC.
    vmem_cap = max(_vmem_capacity_bytes() - (4 << 20), 32 << 20)
    use_stream = force_layer_stream or (resident_need > vmem_cap)
    vmem_limit = int(min(max(stream_need if use_stream else resident_need,
                             32 << 20), vmem_cap))

    if not use_stream:
        # ---- resident-weights path: grid over batch tiles only ----
        def replicated(a):      # whole array, DMA'd once, resident across tiles
            return pl.BlockSpec(a.shape, lambda i, _nd=a.ndim: (0,) * _nd)

        in_specs = [pl.BlockSpec((C, tb), lambda i: (0, i))]
        in_specs += [replicated(a) for a in weights]
        grid = (nb,)
        dims = ("parallel",)
        if get_velocity:
            out_shape = (jax.ShapeDtypeStruct((C, b_pad), jnp.float32),
                         jax.ShapeDtypeStruct((steps, C, b_pad), vel_dtype))
            out_specs = (pl.BlockSpec((C, tb), lambda i: (0, i)),
                         pl.BlockSpec((steps, C, tb), lambda i: (0, 0, i)))
        else:
            out_shape = jax.ShapeDtypeStruct((C, b_pad), jnp.float32)
            out_specs = pl.BlockSpec((C, tb), lambda i: (0, i))
        kernel = _make_resident_kernel(steps, shared_weights, get_velocity,
                                       compute_dtype, unroll=(steps <= 8))
    else:
        # ---- layer-streaming path: grid=(batch tiles, steps) ----
        def per_layer(a):
            imap = ((lambda i, j: (0, 0, 0)) if shared_weights
                    else (lambda i, j: (j, 0, 0)))
            return pl.BlockSpec((1,) + a.shape[1:], imap)

        in_specs = [pl.BlockSpec((C, tb), lambda i, j: (0, i))]
        in_specs += [per_layer(a) for a in weights]
        grid = (nb, steps)
        dims = ("parallel", "arbitrary")
        if get_velocity:
            out_shape = (jax.ShapeDtypeStruct((C, b_pad), jnp.float32),
                         jax.ShapeDtypeStruct((steps, C, b_pad), vel_dtype))
            out_specs = (pl.BlockSpec((C, tb), lambda i, j: (0, i)),
                         pl.BlockSpec((1, C, tb), lambda i, j: (j, 0, i)))
        else:
            out_shape = jax.ShapeDtypeStruct((C, b_pad), jnp.float32)
            out_specs = pl.BlockSpec((C, tb), lambda i, j: (0, i))
        kernel = _make_stream_kernel(get_velocity, compute_dtype)

    result = pl.pallas_call(
        kernel,
        out_shape=out_shape,
        grid=grid,
        in_specs=in_specs,
        out_specs=out_specs,
        input_output_aliases={0: 0},   # x tile is dead after the residual add
        compiler_params=pltpu.CompilerParams(
            dimension_semantics=dims,
            vmem_limit_bytes=vmem_limit,
        ),
    )(xt, *weights)

    if get_velocity:
        out_pad, vel_pad = result
        out = out_pad[:, :B].T
        # One transpose of the stacked velocities, then a cheap unbind.
        vel_t = jnp.transpose(vel_pad[:, :, :B], (0, 2, 1))       # (steps, B, C)
        return out, [vel_t[j] for j in range(steps)]
    return result[:, :B].T


def init_resnet_params(key, n_layers, hidden_channels, shared_weights,
                       in_out_channels=3, weight_dtype=jnp.bfloat16):
    """Matches the PyTorch init (normal_, std1=1.0 / std2=0.001).

    Weights keep the PyTorch (out, in) layout, stacked over layers (one layer if
    shared_weights).  Weights stored in `weight_dtype` (bf16 default) to halve
    HBM/VMEM traffic; biases stay f32.
    """
    std1, std2 = 1.0, 0.001
    H, C = hidden_channels, in_out_channels
    L = 1 if shared_weights else n_layers
    keys = jax.random.split(key, 6 * L)

    def draw(i, shape, std):
        return std * jax.random.normal(keys[i], shape, jnp.float32)

    w1 = jnp.stack([draw(6 * l + 0, (H, C), std1) for l in range(L)])
    b1 = jnp.stack([draw(6 * l + 1, (H, 1), std1) for l in range(L)])
    w2 = jnp.stack([draw(6 * l + 2, (H, H), std1) for l in range(L)])
    b2 = jnp.stack([draw(6 * l + 3, (H, 1), std1) for l in range(L)])
    w3 = jnp.stack([draw(6 * l + 4, (C, H), std2) for l in range(L)])
    b3 = jnp.stack([draw(6 * l + 5, (C, 1), std2) for l in range(L)])
    return {"w1": w1.astype(weight_dtype), "b1": b1,
            "w2": w2.astype(weight_dtype), "b2": b2,
            "w3": w3.astype(weight_dtype), "b3": b3}


def resnet_reference(x, params, *, n_layers, shared_weights, steps="all",
                     get_velocity=False):
    """Pure-JAX reference with the same bf16-inputs / f32-accumulation numerics."""
    if steps == "all":
        steps = n_layers
    cd = params["w1"].dtype
    xf = x.astype(jnp.float32)
    vels = []
    for j in range(steps):
        l = 0 if shared_weights else j
        h = jnp.dot(xf.astype(cd), params["w1"][l].T,
                    preferred_element_type=jnp.float32) + params["b1"][l][:, 0]
        h = jnp.sin(h)
        h = jnp.dot(h.astype(cd), params["w2"][l].T,
                    preferred_element_type=jnp.float32) + params["b2"][l][:, 0]
        h = jnp.sin(h)
        v = jnp.dot(h.astype(cd), params["w3"][l].T,
                    preferred_element_type=jnp.float32) + params["b3"][l][:, 0]
        xf = xf + v
        vels.append(v)
    if get_velocity:
        return xf, vels
    return xf


if __name__ == "__main__":
    key = jax.random.PRNGKey(0)
    k_param, k_x, k_x2 = jax.random.split(key, 3)

    B, C, H, L = 8, 3, 32, 4   # batch, in_out_channels (ResNet fixes 3), hidden, layers
    x = jax.random.normal(k_x, (B, C), jnp.float32)

    # Config A: independent per-layer weights, per-layer velocities (resident path).
    params = init_resnet_params(k_param, n_layers=L, hidden_channels=H,
                                shared_weights=False)
    out, vels = resnet_forward(x, params, n_layers=L, shared_weights=False,
                               get_velocity=True)
    out, vels = jax.block_until_ready((out, vels))
    ref_out, ref_vels = resnet_reference(x, params, n_layers=L,
                                         shared_weights=False, get_velocity=True)
    assert out.shape == (B, C) and len(vels) == L
    assert jnp.allclose(out, ref_out, atol=5e-3, rtol=5e-3)
    for v, rv in zip(vels, ref_vels):
        assert v.shape == (B, C)
        assert jnp.allclose(v, rv, atol=5e-3, rtol=5e-3)

    # Config B: shared weights, partial unroll (steps=2), final output only.
    params_s = init_resnet_params(k_param, n_layers=L, hidden_channels=H,
                                  shared_weights=True)
    out_s = resnet_forward(x, params_s, n_layers=L, shared_weights=True, steps=2)
    out_s = jax.block_until_ready(out_s)
    ref_s = resnet_reference(x, params_s, n_layers=L, shared_weights=True, steps=2)
    assert out_s.shape == (B, C)
    assert jnp.allclose(out_s, ref_s, atol=5e-3, rtol=5e-3)

    # Config C: layer-streaming path (forced) + multiple batch tiles + ragged pad.
    B2 = 200
    x2 = jax.random.normal(k_x2, (B2, C), jnp.float32)
    out2, vels2 = resnet_forward(x2, params, n_layers=L, shared_weights=False,
                                 get_velocity=True, force_layer_stream=True)
    out2, vels2 = jax.block_until_ready((out2, vels2))
    ref2, ref_vels2 = resnet_reference(x2, params, n_layers=L,
                                       shared_weights=False, get_velocity=True)
    assert out2.shape == (B2, C) and len(vels2) == L
    assert jnp.allclose(out2, ref2, atol=5e-3, rtol=5e-3)
    for v, rv in zip(vels2, ref_vels2):
        assert jnp.allclose(v, rv, atol=5e-3, rtol=5e-3)

    # Config D: deep shared-weight stack -> exercises the in-kernel fori_loop path.
    L2, H2 = 12, 16
    params_d = init_resnet_params(k_param, n_layers=L2, hidden_channels=H2,
                                  shared_weights=True)
    out_d, vels_d = resnet_forward(x, params_d, n_layers=L2, shared_weights=True,
                                   get_velocity=True)
    out_d, vels_d = jax.block_until_ready((out_d, vels_d))
    ref_d, ref_vels_d = resnet_reference(x, params_d, n_layers=L2,
                                         shared_weights=True, get_velocity=True)
    assert out_d.shape == (B, C) and len(vels_d) == L2
    assert jnp.allclose(out_d, ref_d, atol=5e-3, rtol=5e-3)
    for v, rv in zip(vels_d, ref_vels_d):
        assert jnp.allclose(v, rv, atol=5e-3, rtol=5e-3)

    print("KERNEL_OK")
</pallas_src>

<mosaic_0001>
module attributes {stable_mosaic.version = 11 : i64} {
  func.func @kernel(%arg0: i32, %arg1: memref<3x128xf32, #tpu.memory_space<vmem>>, %arg2: memref<4x32x3xbf16, #tpu.memory_space<vmem>>, %arg3: memref<4x32x1xf32, #tpu.memory_space<vmem>>, %arg4: memref<4x32x32xbf16, #tpu.memory_space<vmem>>, %arg5: memref<4x32x1xf32, #tpu.memory_space<vmem>>, %arg6: memref<4x3x32xbf16, #tpu.memory_space<vmem>>, %arg7: memref<4x3x1xf32, #tpu.memory_space<vmem>>, %arg8: memref<3x128xf32, #tpu.memory_space<vmem>>, %arg9: memref<4x3x128xf32, #tpu.memory_space<vmem>>) attributes {dimension_semantics = [#tpu.dimension_semantics<parallel>], iteration_bounds = array<i64: 1>, scalar_prefetch = 0 : i64, scratch_operands = 0 : i64, tpu.core_type = #tpu.core_type<tc>, window_params = [{transform_indices = @transform_0, window_bounds = array<i64: 3, 128>}, {pipeline_mode = #tpu.pipeline_mode<synchronous>, transform_indices = @transform_1, window_bounds = array<i64: 4, 32, 3>}, {pipeline_mode = #tpu.pipeline_mode<synchronous>, transform_indices = @transform_2, window_bounds = array<i64: 4, 32, 1>}, {pipeline_mode = #tpu.pipeline_mode<synchronous>, transform_indices = @transform_3, window_bounds = array<i64: 4, 32, 32>}, {pipeline_mode = #tpu.pipeline_mode<synchronous>, transform_indices = @transform_4, window_bounds = array<i64: 4, 32, 1>}, {pipeline_mode = #tpu.pipeline_mode<synchronous>, transform_indices = @transform_5, window_bounds = array<i64: 4, 3, 32>}, {pipeline_mode = #tpu.pipeline_mode<synchronous>, transform_indices = @transform_6, window_bounds = array<i64: 4, 3, 1>}, {transform_indices = @transform_7, window_bounds = array<i64: 3, 128>}, {transform_indices = @transform_8, window_bounds = array<i64: 4, 3, 128>}]} {
    %c0 = arith.constant 0 : index
    %c0_0 = arith.constant 0 : index
    %0 = vector.load %arg1[%c0, %c0_0] : memref<3x128xf32, #tpu.memory_space<vmem>>, vector<3x128xf32>
    %c0_1 = arith.constant 0 : index
    %c0_2 = arith.constant 0 : index
    %c0_3 = arith.constant 0 : index
    %1 = vector.load %arg2[%c0_1, %c0_2, %c0_3] : memref<4x32x3xbf16, #tpu.memory_space<vmem>>, vector<1x32x3xbf16>
    %2 = vector.shape_cast %1 : vector<1x32x3xbf16> to vector<32x3xbf16>
    %c0_4 = arith.constant 0 : index
    %c0_5 = arith.constant 0 : index
    %c0_6 = arith.constant 0 : index
    %3 = vector.load %arg3[%c0_4, %c0_5, %c0_6] : memref<4x32x1xf32, #tpu.memory_space<vmem>>, vector<1x32x1xf32>
    %4 = vector.shape_cast %3 : vector<1x32x1xf32> to vector<32x1xf32>
    %c0_7 = arith.constant 0 : index
    %c0_8 = arith.constant 0 : index
    %c0_9 = arith.constant 0 : index
    %5 = vector.load %arg4[%c0_7, %c0_8, %c0_9] : memref<4x32x32xbf16, #tpu.memory_space<vmem>>, vector<1x32x32xbf16>
    %6 = vector.shape_cast %5 : vector<1x32x32xbf16> to vector<32x32xbf16>
    %c0_10 = arith.constant 0 : index
    %c0_11 = arith.constant 0 : index
    %c0_12 = arith.constant 0 : index
    %7 = vector.load %arg5[%c0_10, %c0_11, %c0_12] : memref<4x32x1xf32, #tpu.memory_space<vmem>>, vector<1x32x1xf32>
    %8 = vector.shape_cast %7 : vector<1x32x1xf32> to vector<32x1xf32>
    %c0_13 = arith.constant 0 : index
    %c0_14 = arith.constant 0 : index
    %c0_15 = arith.constant 0 : index
    %9 = vector.load %arg6[%c0_13, %c0_14, %c0_15] : memref<4x3x32xbf16, #tpu.memory_space<vmem>>, vector<1x3x32xbf16>
    %10 = vector.shape_cast %9 : vector<1x3x32xbf16> to vector<3x32xbf16>
    %c0_16 = arith.constant 0 : index
    %c0_17 = arith.constant 0 : index
    %c0_18 = arith.constant 0 : index
    %11 = vector.load %arg7[%c0_16, %c0_17, %c0_18] : memref<4x3x1xf32, #tpu.memory_space<vmem>>, vector<1x3x1xf32>
    %12 = vector.shape_cast %11 : vector<1x3x1xf32> to vector<3x1xf32>
    %13 = arith.truncf %0 : vector<3x128xf32> to vector<3x128xbf16>
    %cst = arith.constant dense<0.000000e+00> : vector<32x128xf32>
    %14 = tpu.matmul %2, %13, %cst {dimension_numbers = #tpu.dot_dimension_numbers<[1], [0], [0], [1], [0, 0, 1, 1], [], []>} : vector<32x3xbf16>, vector<3x128xbf16>, vector<32x128xf32> -> vector<32x128xf32>
    %15 = vector.broadcast %4 : vector<32x1xf32> to vector<32x128xf32>
    %16 = arith.addf %14, %15 : vector<32x128xf32>
    %17 = math.sin %16 : vector<32x128xf32>
    %18 = arith.truncf %17 : vector<32x128xf32> to vector<32x128xbf16>
    %cst_19 = arith.constant dense<0.000000e+00> : vector<32x128xf32>
    %19 = tpu.matmul %6, %18, %cst_19 {dimension_numbers = #tpu.dot_dimension_numbers<[1], [0], [0], [1], [0, 0, 1, 1], [], []>} : vector<32x32xbf16>, vector<32x128xbf16>, vector<32x128xf32> -> vector<32x128xf32>
    %20 = vector.broadcast %8 : vector<32x1xf32> to vector<32x128xf32>
    %21 = arith.addf %19, %20 : vector<32x128xf32>
    %22 = math.sin %21 : vector<32x128xf32>
    %23 = arith.truncf %22 : vector<32x128xf32> to vector<32x128xbf16>
    %cst_20 = arith.constant dense<0.000000e+00> : vector<3x128xf32>
    %24 = tpu.matmul %10, %23, %cst_20 {dimension_numbers = #tpu.dot_dimension_numbers<[1], [0], [0], [1], [0, 0, 1, 1], [], []>} : vector<3x32xbf16>, vector<32x128xbf16>, vector<3x128xf32> -> vector<3x128xf32>
    %25 = vector.broadcast %12 : vector<3x1xf32> to vector<3x128xf32>
    %26 = arith.addf %24, %25 : vector<3x128xf32>
    %27 = arith.addf %0, %26 : vector<3x128xf32>
    %c0_21 = arith.constant 0 : index
    %c0_22 = arith.constant 0 : index
    %c0_23 = arith.constant 0 : index
    %28 = vector.load %arg9[%c0_21, %c0_22, %c0_23] : memref<4x3x128xf32, #tpu.memory_space<vmem>>, vector<1x3x128xf32>
    %29 = vector.shape_cast %28 : vector<1x3x128xf32> to vector<3x128xf32>
    %30 = vector.shape_cast %26 : vector<3x128xf32> to vector<1x3x128xf32>
    tpu.vector_store %arg9[%c0_21, %c0_22, %c0_23], %30 {strides = array<i32>} : memref<4x3x128xf32, #tpu.memory_space<vmem>>, vector<1x3x128xf32>,
    %c1 = arith.constant 1 : index
    %c0_24 = arith.constant 0 : index
    %c0_25 = arith.constant 0 : index
    %31 = vector.load %arg2[%c1, %c0_24, %c0_25] : memref<4x32x3xbf16, #tpu.memory_space<vmem>>, vector<1x32x3xbf16>
    %32 = vector.shape_cast %31 : vector<1x32x3xbf16> to vector<32x3xbf16>
    %c1_26 = arith.constant 1 : index
    %c0_27 = arith.constant 0 : index
    %c0_28 = arith.constant 0 : index
    %33 = vector.load %arg3[%c1_26, %c0_27, %c0_28] : memref<4x32x1xf32, #tpu.memory_space<vmem>>, vector<1x32x1xf32>
    %34 = vector.shape_cast %33 : vector<1x32x1xf32> to vector<32x1xf32>
    %c1_29 = arith.constant 1 : index
    %c0_30 = arith.constant 0 : index
    %c0_31 = arith.constant 0 : index
    %35 = vector.load %arg4[%c1_29, %c0_30, %c0_31] : memref<4x32x32xbf16, #tpu.memory_space<vmem>>, vector<1x32x32xbf16>
    %36 = vector.shape_cast %35 : vector<1x32x32xbf16> to vector<32x32xbf16>
    %c1_32 = arith.constant 1 : index
    %c0_33 = arith.constant 0 : index
    %c0_34 = arith.constant 0 : index
    %37 = vector.load %arg5[%c1_32, %c0_33, %c0_34] : memref<4x32x1xf32, #tpu.memory_space<vmem>>, vector<1x32x1xf32>
    %38 = vector.shape_cast %37 : vector<1x32x1xf32> to vector<32x1xf32>
    %c1_35 = arith.constant 1 : index
    %c0_36 = arith.constant 0 : index
    %c0_37 = arith.constant 0 : index
    %39 = vector.load %arg6[%c1_35, %c0_36, %c0_37] : memref<4x3x32xbf16, #tpu.memory_space<vmem>>, vector<1x3x32xbf16>
    %40 = vector.shape_cast %39 : vector<1x3x32xbf16> to vector<3x32xbf16>
    %c1_38 = arith.constant 1 : index
    %c0_39 = arith.constant 0 : index
    %c0_40 = arith.constant 0 : index
    %41 = vector.load %arg7[%c1_38, %c0_39, %c0_40] : memref<4x3x1xf32, #tpu.memory_space<vmem>>, vector<1x3x1xf32>
    %42 = vector.shape_cast %41 : vector<1x3x1xf32> to vector<3x1xf32>
    %43 = arith.truncf %27 : vector<3x128xf32> to vector<3x128xbf16>
    %cst_41 = arith.constant dense<0.000000e+00> : vector<32x128xf32>
    %44 = tpu.matmul %32, %43, %cst_41 {dimension_numbers = #tpu.dot_dimension_numbers<[1], [0], [0], [1], [0, 0, 1, 1], [], []>} : vector<32x3xbf16>, vector<3x128xbf16>, vector<32x128xf32> -> vector<32x128xf32>
    %45 = vector.broadcast %34 : vector<32x1xf32> to vector<32x128xf32>
    %46 = arith.addf %44, %45 : vector<32x128xf32>
    %47 = math.sin %46 : vector<32x128xf32>
    %48 = arith.truncf %47 : vector<32x128xf32> to vector<32x128xbf16>
    %cst_42 = arith.constant dense<0.000000e+00> : vector<32x128xf32>
    %49 = tpu.matmul %36, %48, %cst_42 {dimension_numbers = #tpu.dot_dimension_numbers<[1], [0], [0], [1], [0, 0, 1, 1], [], []>} : vector<32x32xbf16>, vector<32x128xbf16>, vector<32x128xf32> -> vector<32x128xf32>
    %50 = vector.broadcast %38 : vector<32x1xf32> to vector<32x128xf32>
    %51 = arith.addf %49, %50 : vector<32x128xf32>
    %52 = math.sin %51 : vector<32x128xf32>
    %53 = arith.truncf %52 : vector<32x128xf32> to vector<32x128xbf16>
    %cst_43 = arith.constant dense<0.000000e+00> : vector<3x128xf32>
    %54 = tpu.matmul %40, %53, %cst_43 {dimension_numbers = #tpu.dot_dimension_numbers<[1], [0], [0], [1], [0, 0, 1, 1], [], []>} : vector<3x32xbf16>, vector<32x128xbf16>, vector<3x128xf32> -> vector<3x128xf32>
    %55 = vector.broadcast %42 : vector<3x1xf32> to vector<3x128xf32>
    %56 = arith.addf %54, %55 : vector<3x128xf32>
    %57 = arith.addf %27, %56 : vector<3x128xf32>
    %c1_44 = arith.constant 1 : index
    %c0_45 = arith.constant 0 : index
    %c0_46 = arith.constant 0 : index
    %58 = vector.load %arg9[%c1_44, %c0_45, %c0_46] : memref<4x3x128xf32, #tpu.memory_space<vmem>>, vector<1x3x128xf32>
    %59 = vector.shape_cast %58 : vector<1x3x128xf32> to vector<3x128xf32>
    %60 = vector.shape_cast %56 : vector<3x128xf32> to vector<1x3x128xf32>
    tpu.vector_store %arg9[%c1_44, %c0_45, %c0_46], %60 {strides = array<i32>} : memref<4x3x128xf32, #tpu.memory_space<vmem>>, vector<1x3x128xf32>,
    %c2 = arith.constant 2 : index
    %c0_47 = arith.constant 0 : index
    %c0_48 = arith.constant 0 : index
    %61 = vector.load %arg2[%c2, %c0_47, %c0_48] : memref<4x32x3xbf16, #tpu.memory_space<vmem>>, vector<1x32x3xbf16>
    %62 = vector.shape_cast %61 : vector<1x32x3xbf16> to vector<32x3xbf16>
    %c2_49 = arith.constant 2 : index
    %c0_50 = arith.constant 0 : index
    %c0_51 = arith.constant 0 : index
    %63 = vector.load %arg3[%c2_49, %c0_50, %c0_51] : memref<4x32x1xf32, #tpu.memory_space<vmem>>, vector<1x32x1xf32>
    %64 = vector.shape_cast %63 : vector<1x32x1xf32> to vector<32x1xf32>
    %c2_52 = arith.constant 2 : index
    %c0_53 = arith.constant 0 : index
    %c0_54 = arith.constant 0 : index
    %65 = vector.load %arg4[%c2_52, %c0_53, %c0_54] : memref<4x32x32xbf16, #tpu.memory_space<vmem>>, vector<1x32x32xbf16>
    %66 = vector.shape_cast %65 : vector<1x32x32xbf16> to vector<32x32xbf16>
    %c2_55 = arith.constant 2 : index
    %c0_56 = arith.constant 0 : index
    %c0_57 = arith.constant 0 : index
    %67 = vector.load %arg5[%c2_55, %c0_56, %c0_57] : memref<4x32x1xf32, #tpu.memory_space<vmem>>, vector<1x32x1xf32>
    %68 = vector.shape_cast %67 : vector<1x32x1xf32> to vector<32x1xf32>
    %c2_58 = arith.constant 2 : index
    %c0_59 = arith.constant 0 : index
    %c0_60 = arith.constant 0 : index
    %69 = vector.load %arg6[%c2_58, %c0_59, %c0_60] : memref<4x3x32xbf16, #tpu.memory_space<vmem>>, vector<1x3x32xbf16>
    %70 = vector.shape_cast %69 : vector<1x3x32xbf16> to vector<3x32xbf16>
    %c2_61 = arith.constant 2 : index
    %c0_62 = arith.constant 0 : index
    %c0_63 = arith.constant 0 : index
    %71 = vector.load %arg7[%c2_61, %c0_62, %c0_63] : memref<4x3x1xf32, #tpu.memory_space<vmem>>, vector<1x3x1xf32>
    %72 = vector.shape_cast %71 : vector<1x3x1xf32> to vector<3x1xf32>
    %73 = arith.truncf %57 : vector<3x128xf32> to vector<3x128xbf16>
    %cst_64 = arith.constant dense<0.000000e+00> : vector<32x128xf32>
    %74 = tpu.matmul %62, %73, %cst_64 {dimension_numbers = #tpu.dot_dimension_numbers<[1], [0], [0], [1], [0, 0, 1, 1], [], []>} : vector<32x3xbf16>, vector<3x128xbf16>, vector<32x128xf32> -> vector<32x128xf32>
    %75 = vector.broadcast %64 : vector<32x1xf32> to vector<32x128xf32>
    %76 = arith.addf %74, %75 : vector<32x128xf32>
    %77 = math.sin %76 : vector<32x128xf32>
    %78 = arith.truncf %77 : vector<32x128xf32> to vector<32x128xbf16>
    %cst_65 = arith.constant dense<0.000000e+00> : vector<32x128xf32>
    %79 = tpu.matmul %66, %78, %cst_65 {dimension_numbers = #tpu.dot_dimension_numbers<[1], [0], [0], [1], [0, 0, 1, 1], [], []>} : vector<32x32xbf16>, vector<32x128xbf16>, vector<32x128xf32> -> vector<32x128xf32>
    %80 = vector.broadcast %68 : vector<32x1xf32> to vector<32x128xf32>
    %81 = arith.addf %79, %80 : vector<32x128xf32>
    %82 = math.sin %81 : vector<32x128xf32>
    %83 = arith.truncf %82 : vector<32x128xf32> to vector<32x128xbf16>
    %cst_66 = arith.constant dense<0.000000e+00> : vector<3x128xf32>
    %84 = tpu.matmul %70, %83, %cst_66 {dimension_numbers = #tpu.dot_dimension_numbers<[1], [0], [0], [1], [0, 0, 1, 1], [], []>} : vector<3x32xbf16>, vector<32x128xbf16>, vector<3x128xf32> -> vector<3x128xf32>
    %85 = vector.broadcast %72 : vector<3x1xf32> to vector<3x128xf32>
    %86 = arith.addf %84, %85 : vector<3x128xf32>
    %87 = arith.addf %57, %86 : vector<3x128xf32>
    %c2_67 = arith.constant 2 : index
    %c0_68 = arith.constant 0 : index
    %c0_69 = arith.constant 0 : index
    %88 = vector.load %arg9[%c2_67, %c0_68, %c0_69] : memref<4x3x128xf32, #tpu.memory_space<vmem>>, vector<1x3x128xf32>
    %89 = vector.shape_cast %88 : vector<1x3x128xf32> to vector<3x128xf32>
    %90 = vector.shape_cast %86 : vector<3x128xf32> to vector<1x3x128xf32>
    tpu.vector_store %arg9[%c2_67, %c0_68, %c0_69], %90 {strides = array<i32>} : memref<4x3x128xf32, #tpu.memory_space<vmem>>, vector<1x3x128xf32>,
    %c3 = arith.constant 3 : index
    %c0_70 = arith.constant 0 : index
    %c0_71 = arith.constant 0 : index
    %91 = vector.load %arg2[%c3, %c0_70, %c0_71] : memref<4x32x3xbf16, #tpu.memory_space<vmem>>, vector<1x32x3xbf16>
    %92 = vector.shape_cast %91 : vector<1x32x3xbf16> to vector<32x3xbf16>
    %c3_72 = arith.constant 3 : index
    %c0_73 = arith.constant 0 : index
    %c0_74 = arith.constant 0 : index
    %93 = vector.load %arg3[%c3_72, %c0_73, %c0_74] : memref<4x32x1xf32, #tpu.memory_space<vmem>>, vector<1x32x1xf32>
    %94 = vector.shape_cast %93 : vector<1x32x1xf32> to vector<32x1xf32>
    %c3_75 = arith.constant 3 : index
    %c0_76 = arith.constant 0 : index
    %c0_77 = arith.constant 0 : index
    %95 = vector.load %arg4[%c3_75, %c0_76, %c0_77] : memref<4x32x32xbf16, #tpu.memory_space<vmem>>, vector<1x32x32xbf16>
    %96 = vector.shape_cast %95 : vector<1x32x32xbf16> to vector<32x32xbf16>
    %c3_78 = arith.constant 3 : index
    %c0_79 = arith.constant 0 : index
    %c0_80 = arith.constant 0 : index
    %97 = vector.load %arg5[%c3_78, %c0_79, %c0_80] : memref<4x32x1xf32, #tpu.memory_space<vmem>>, vector<1x32x1xf32>
    %98 = vector.shape_cast %97 : vector<1x32x1xf32> to vector<32x1xf32>
    %c3_81 = arith.constant 3 : index
    %c0_82 = arith.constant 0 : index
    %c0_83 = arith.constant 0 : index
    %99 = vector.load %arg6[%c3_81, %c0_82, %c0_83] : memref<4x3x32xbf16, #tpu.memory_space<vmem>>, vector<1x3x32xbf16>
    %100 = vector.shape_cast %99 : vector<1x3x32xbf16> to vector<3x32xbf16>
    %c3_84 = arith.constant 3 : index
    %c0_85 = arith.constant 0 : index
    %c0_86 = arith.constant 0 : index
    %101 = vector.load %arg7[%c3_84, %c0_85, %c0_86] : memref<4x3x1xf32, #tpu.memory_space<vmem>>, vector<1x3x1xf32>
    %102 = vector.shape_cast %101 : vector<1x3x1xf32> to vector<3x1xf32>
    %103 = arith.truncf %87 : vector<3x128xf32> to vector<3x128xbf16>
    %cst_87 = arith.constant dense<0.000000e+00> : vector<32x128xf32>
    %104 = tpu.matmul %92, %103, %cst_87 {dimension_numbers = #tpu.dot_dimension_numbers<[1], [0], [0], [1], [0, 0, 1, 1], [], []>} : vector<32x3xbf16>, vector<3x128xbf16>, vector<32x128xf32> -> vector<32x128xf32>
    %105 = vector.broadcast %94 : vector<32x1xf32> to vector<32x128xf32>
    %106 = arith.addf %104, %105 : vector<32x128xf32>
    %107 = math.sin %106 : vector<32x128xf32>
    %108 = arith.truncf %107 : vector<32x128xf32> to vector<32x128xbf16>
    %cst_88 = arith.constant dense<0.000000e+00> : vector<32x128xf32>
    %109 = tpu.matmul %96, %108, %cst_88 {dimension_numbers = #tpu.dot_dimension_numbers<[1], [0], [0], [1], [0, 0, 1, 1], [], []>} : vector<32x32xbf16>, vector<32x128xbf16>, vector<32x128xf32> -> vector<32x128xf32>
    %110 = vector.broadcast %98 : vector<32x1xf32> to vector<32x128xf32>
    %111 = arith.addf %109, %110 : vector<32x128xf32>
    %112 = math.sin %111 : vector<32x128xf32>
    %113 = arith.truncf %112 : vector<32x128xf32> to vector<32x128xbf16>
    %cst_89 = arith.constant dense<0.000000e+00> : vector<3x128xf32>
    %114 = tpu.matmul %100, %113, %cst_89 {dimension_numbers = #tpu.dot_dimension_numbers<[1], [0], [0], [1], [0, 0, 1, 1], [], []>} : vector<3x32xbf16>, vector<32x128xbf16>, vector<3x128xf32> -> vector<3x128xf32>
    %115 = vector.broadcast %102 : vector<3x1xf32> to vector<3x128xf32>
    %116 = arith.addf %114, %115 : vector<3x128xf32>
    %117 = arith.addf %87, %116 : vector<3x128xf32>
    %c3_90 = arith.constant 3 : index
    %c0_91 = arith.constant 0 : index
    %c0_92 = arith.constant 0 : index
    %118 = vector.load %arg9[%c3_90, %c0_91, %c0_92] : memref<4x3x128xf32, #tpu.memory_space<vmem>>, vector<1x3x128xf32>
    %119 = vector.shape_cast %118 : vector<1x3x128xf32> to vector<3x128xf32>
    %120 = vector.shape_cast %116 : vector<3x128xf32> to vector<1x3x128xf32>
    tpu.vector_store %arg9[%c3_90, %c0_91, %c0_92], %120 {strides = array<i32>} : memref<4x3x128xf32, #tpu.memory_space<vmem>>, vector<1x3x128xf32>,
    %c0_93 = arith.constant 0 : index
    %c0_94 = arith.constant 0 : index
    %121 = vector.load %arg8[%c0_93, %c0_94] : memref<3x128xf32, #tpu.memory_space<vmem>>, vector<3x128xf32>
    tpu.vector_store %arg8[%c0_93, %c0_94], %117 {strides = array<i32>} : memref<3x128xf32, #tpu.memory_space<vmem>>, vector<3x128xf32>,
    return
  }
  func.func @transform_0(%arg0: i32) -> (i32, i32) {
    %c0_i32 = arith.constant 0 : i32
    %c0_i32_0 = arith.constant 0 : i32
    return %c0_i32, %arg0 : i32, i32
  }
  func.func @transform_1(%arg0: i32) -> (i32, i32, i32) {
    %c0_i32 = arith.constant 0 : i32
    %c0_i32_0 = arith.constant 0 : i32
    %c0_i32_1 = arith.constant 0 : i32
    %c0_i32_2 = arith.constant 0 : i32
    return %c0_i32, %c0_i32_0, %c0_i32_1 : i32, i32, i32
  }
  func.func @transform_2(%arg0: i32) -> (i32, i32, i32) {
    %c0_i32 = arith.constant 0 : i32
    %c0_i32_0 = arith.constant 0 : i32
    %c0_i32_1 = arith.constant 0 : i32
    %c0_i32_2 = arith.constant 0 : i32
    return %c0_i32, %c0_i32_0, %c0_i32_1 : i32, i32, i32
  }
  func.func @transform_3(%arg0: i32) -> (i32, i32, i32) {
    %c0_i32 = arith.constant 0 : i32
    %c0_i32_0 = arith.constant 0 : i32
    %c0_i32_1 = arith.constant 0 : i32
    %c0_i32_2 = arith.constant 0 : i32
    return %c0_i32, %c0_i32_0, %c0_i32_1 : i32, i32, i32
  }
  func.func @transform_4(%arg0: i32) -> (i32, i32, i32) {
    %c0_i32 = arith.constant 0 : i32
    %c0_i32_0 = arith.constant 0 : i32
    %c0_i32_1 = arith.constant 0 : i32
    %c0_i32_2 = arith.constant 0 : i32
    return %c0_i32, %c0_i32_0, %c0_i32_1 : i32, i32, i32
  }
  func.func @transform_5(%arg0: i32) -> (i32, i32, i32) {
    %c0_i32 = arith.constant 0 : i32
    %c0_i32_0 = arith.constant 0 : i32
    %c0_i32_1 = arith.constant 0 : i32
    %c0_i32_2 = arith.constant 0 : i32
    return %c0_i32, %c0_i32_0, %c0_i32_1 : i32, i32, i32
  }
  func.func @transform_6(%arg0: i32) -> (i32, i32, i32) {
    %c0_i32 = arith.constant 0 : i32
    %c0_i32_0 = arith.constant 0 : i32
    %c0_i32_1 = arith.constant 0 : i32
    %c0_i32_2 = arith.constant 0 : i32
    return %c0_i32, %c0_i32_0, %c0_i32_1 : i32, i32, i32
  }
  func.func @transform_7(%arg0: i32) -> (i32, i32) {
    %c0_i32 = arith.constant 0 : i32
    %c0_i32_0 = arith.constant 0 : i32
    return %c0_i32, %arg0 : i32, i32
  }
  func.func @transform_8(%arg0: i32) -> (i32, i32, i32) {
    %c0_i32 = arith.constant 0 : i32
    %c0_i32_0 = arith.constant 0 : i32
    %c0_i32_1 = arith.constant 0 : i32
    return %c0_i32, %c0_i32_0, %arg0 : i32, i32, i32
  }
}

</mosaic_0001>

<bundles_post_ra>
// kernel: resnet_forward.1
= control target key start
LH: loop header
LB: loop body
LE: loop exit
PB: predicated region body
PF: predicated region fallthrough
CT: control target
= control target key end

     0   :  { %vm86_vm0 = vcmask 1040384   ;;  %vm87_vm1 = vcmask 1041408   ;;  %vm79_vm2 = vcmask 23552   ;;  %v5012_v1 = vmov 65535   ;;  %s7503_s0 = inlined_call_operand.vmem [shape: f32[3,128], index: 0, kind: input, shape index: {}, may-alias: {0,7}]   ;;  %s7504_s1 = inlined_call_operand.vmem [shape: bf16[4,32,3], index: 1, kind: input, shape index: {}]   ;;  %s7505_s2 = inlined_call_operand.vmem [shape: f32[4,32,1], index: 2, kind: input, shape index: {}]   ;;  %s7506_s4 = inlined_call_operand.vmem [shape: f32[4,32,1], index: 4, kind: input, shape index: {}]   ;;  %s7507_s6 = inlined_call_operand.vmem [shape: f32[4,3,1], index: 6, kind: input, shape index: {}]   ;;  %s7508_s3 = inlined_call_operand.vmem [shape: bf16[4,32,32], index: 3, kind: input, shape index: {}]   ;;  %s7509_s5 = inlined_call_operand.vmem [shape: bf16[4,3,32], index: 5, kind: input, shape index: {}]   ;;  %s7510_s8 = inlined_call_operand.vmem [shape: f32[4,3,128], index: 8, kind: output, shape index: {1}]   ;;  %s7511_s7 = inlined_call_operand.vmem [shape: f32[3,128], index: 7, kind: output, shape index: {0}, may-alias: {0,7}]  }
   0x1   :  { %v29_v0 = vld [vmem:[%s7503_s0] sm:$0x7]  ;;  %v88_v2 = vsel %vm86_vm0, 4294967295, %v5012_v1  ;;  %v36_v7 = vld [vmem:[%s7505_s2 + $0x10] sm:$0xff]  ;;  %v5013_v9 = vmov 0   ;;  %v4868_v10 = vld [vmem:[%s7504_s1 + $0x8] sm:$0xff]  }
   0x2   :  { %v4867_v3 = vld [vmem:[%s7504_s1] sm:$0xff]   ;;  %v48_v4 = vpack.c.bf16 %v29_v0, %v29_v0  ;;  %v5073_v5 = vsel %vm87_vm1, %v88_v2, 0  ;;  %4865 = vset.pattern.permute.xlu0 %v5013_v9  ;;  %4866 = vset.pattern.permute.xlu1 %v5013_v9  ;;  %v35_v11 = vld [vmem:[%s7505_s2 + $0x8] sm:$0xff]  ;;  %v37_v12 = vld [vmem:[%s7505_s2 + $0x18] sm:$0xff] }
   0x3   :  { %4641 = vmatprep.mubr.msk.bf16.mxu0 %vm79_vm2, %v4867_v3  ;;  %v34_v6 = vld [vmem:[%s7505_s2] sm:$0xff]  ;;  %61 = vperm.xlu1 %4866, %v36_v7   ;;  %v43_v14 = vld [vmem:[%s7506_s4 + $0x8] sm:$0xff]  ;;  %v44_v15 = vld [vmem:[%s7506_s4 + $0x10] sm:$0xff] }
   0x4   :  { %v91_v8 = vand.u32 %v5073_v5, %v48_v4  ;;  %51 = vperm.xlu0 %4865, %v34_v6   ;;  %v42_v13 = vld [vmem:[%s7506_s4] sm:$0xff]  ;;  %v45_v16 = vld [vmem:[%s7506_s4 + $0x18] sm:$0xff]  ;;  %v4424_v19 = vld [vmem:[%s7505_s2 + $0x28] sm:$0xff] }
   0x5   :  { %v47_v17 = vld [vmem:[%s7507_s6] sm:$0x7]  ;;  %v4425_v20 = vld [vmem:[%s7505_s2 + $0x30] sm:$0xff]  ;;  %v4426_v21 = vld [vmem:[%s7505_s2 + $0x38] sm:$0xff] }
   0x6   :  { %4639 = vmatprep.subr.bf16.mxu0 %v91_v8  ;;  %v4423_v18 = vld [vmem:[%s7505_s2 + $0x20] sm:$0xff]  ;;  %v4432_v23 = vld [vmem:[%s7506_s4 + $0x28] sm:$0xff]  ;;  %v4433_v24 = vld [vmem:[%s7506_s4 + $0x30] sm:$0xff] }
   0x7   :  { %4640 = vmatpush3.bf16.msra.mxu0 %v91_v8  ;;  %66 = vperm.xlu1 %4866, %v37_v12   ;;  %v4431_v22 = vld [vmem:[%s7506_s4 + $0x20] sm:$0xff]  ;;  %v4434_v25 = vld [vmem:[%s7506_s4 + $0x38] sm:$0xff]  ;;  %v4484_v28 = vld [vmem:[%s7505_s2 + $0x48] sm:$0xff] }
   0x8   :  { %56 = vperm.xlu0 %4865, %v35_v11   ;;  %v4436_v26 = vld [vmem:[%s7507_s6 + $0x4] sm:$0x7]  ;;  %v4485_v29 = vld [vmem:[%s7505_s2 + $0x50] sm:$0xff]  ;;  %v4486_v30 = vld [vmem:[%s7505_s2 + $0x58] sm:$0xff] }
   0x9   :  { %v4483_v27 = vld [vmem:[%s7505_s2 + $0x40] sm:$0xff]  ;;  %v4492_v32 = vld [vmem:[%s7506_s4 + $0x48] sm:$0xff]  ;;  %v4493_v33 = vld [vmem:[%s7506_s4 + $0x50] sm:$0xff] }
   0xa   :  { %4642 = vmatmul.mubr.msk.bf16.vlgmr.msra.gmra.mrb[0].mxu0 %vm79_vm2, %v4868_v10  ;;  %v4491_v31 = vld [vmem:[%s7506_s4 + $0x40] sm:$0xff]  ;;  %v4494_v34 = vld [vmem:[%s7506_s4 + $0x58] sm:$0xff]  ;;  %v4496_v35 = vld [vmem:[%s7507_s6 + $0x8] sm:$0x7] }
   0xb   :  { %567 = vperm.xlu1 %4866, %v43_v14   ;;  %v4543_v36 = vld [vmem:[%s7505_s2 + $0x60] sm:$0xff]  ;;  %v4544_v37 = vld [vmem:[%s7505_s2 + $0x68] sm:$0xff]  ;;  %v4545_v38 = vld [vmem:[%s7505_s2 + $0x70] sm:$0xff] }
   0xc   :  { %562 = vperm.xlu0 %4865, %v42_v13   ;;  %v4546_v39 = vld [vmem:[%s7505_s2 + $0x78] sm:$0xff]  ;;  %v4551_v40 = vld [vmem:[%s7506_s4 + $0x60] sm:$0xff]  ;;  %v4552_v41 = vld [vmem:[%s7506_s4 + $0x68] sm:$0xff] }
   0xd   :  { %v4553_v42 = vld [vmem:[%s7506_s4 + $0x70] sm:$0xff]  ;;  %v4554_v43 = vld [vmem:[%s7506_s4 + $0x78] sm:$0xff]  ;;  %v4556_v44 = vld [vmem:[%s7507_s6 + $0xc] sm:$0x7] }
   0xf   :  { %577 = vperm.xlu1 %4866, %v45_v16  }
  0x10   :  { %572 = vperm.xlu0 %4865, %v44_v15  }
  0x13   :  { %1141 = vperm.xlu1 %4866, %v4423_v18  }
  0x14   :  { %1066 = vperm.xlu0 %4865, %v47_v17  }
  0x17   :  { %1151 = vperm.xlu1 %4866, %v4425_v20  }
  0x18   :  { %1146 = vperm.xlu0 %4865, %v4424_v19  }
  0x1b   :  { %1647 = vperm.xlu1 %4866, %v4431_v22  }
  0x1c   :  { %1156 = vperm.xlu0 %4865, %v4426_v21  }
  0x1f   :  { %1657 = vperm.xlu1 %4866, %v4433_v24  }
  0x20   :  { %1652 = vperm.xlu0 %4865, %v4432_v23  }
  0x23   :  { %2150 = vperm.xlu1 %4866, %v4436_v26   ;;  %v5014_v26 = vmov 683565275  }
  0x24   :  { %1662 = vperm.xlu0 %4865, %v4434_v25  }
  0x27   :  { %2231 = vperm.xlu1 %4866, %v4484_v28   ;;  %v5015_v28 = vmov 2475754826  }
  0x28   :  { %2226 = vperm.xlu0 %4865, %v4483_v27  }
  0x2b   :  { %2241 = vperm.xlu1 %4866, %v4486_v30   ;;  %v5016_v30 = vmov 2131351028  }
  0x2c   :  { %2236 = vperm.xlu0 %4865, %v4485_v29  }
  0x2f   :  { %2737 = vperm.xlu1 %4866, %v4492_v32   ;;  %v5017_v32 = vmov 2102212464  }
  0x30   :  { %2732 = vperm.xlu0 %4865, %v4491_v31  }
  0x33   :  { %2747 = vperm.xlu1 %4866, %v4494_v34   ;;  %v5018_v34 = vmov 920167782  }
  0x34   :  { %2742 = vperm.xlu0 %4865, %v4493_v33  }
  0x37   :  { %3311 = vperm.xlu1 %4866, %v4543_v36  }
  0x38   :  { %3235 = vperm.xlu0 %4865, %v4496_v35  }
  0x3b   :  { %3321 = vperm.xlu1 %4866, %v4545_v38  }
  0x3c   :  { %3316 = vperm.xlu0 %4865, %v4544_v37  }
  0x3f   :  { %3817 = vperm.xlu1 %4866, %v4551_v40  }
  0x40   :  { %3326 = vperm.xlu0 %4865, %v4546_v39  }
  0x43   :  { %3827 = vperm.xlu1 %4866, %v4553_v42  }
  0x44   :  { %3822 = vperm.xlu0 %4865, %v4552_v41   ;;  %v5019_v41 = vmov 1326507024  }
  0x47   :  { %4320 = vperm.xlu1 %4866, %v4556_v44  }
  0x48   :  { %3832 = vperm.xlu0 %4865, %v4554_v43  }
  0x82   :  { %v62_v45 = vpop.permute.xlu1 %61 }
  0x83   :  { %v52_v46 = vpop.permute.xlu0 %51 }
  0x86   :  { %v67_v50 = vpop.permute.xlu1 %66 }
  0x87   :  { %v57_v57 = vpop.permute.xlu0 %56 }
  0xdd   :  { %v4643_v47 = vpop.f32.mrb[0].mxu0 }
  0xde   :  { %v5189_v48 = vadd.f32 %v4643_v47, %v62_v45  ;;  %v127_v49 = vpop.f32.mrb[1].mxu0 }
  0xdf   :  { %v5191_v51 = vadd.f32 %v127_v49, %v52_v46  ;;  %v4644_v52 = vpop.f32.mrb[2].mxu0 }
  0xe0   :  { %v350_v53 = vand.u32 2147483647, %v5189_v48  ;;  %v353_v54 = vand.u32 2139095040, %v5189_v48  ;;  %v5195_v55 = vadd.f32 %v4644_v52, %v67_v50  ;;  %v130_v56 = vpop.f32.mrb[3].mxu0 }
  0xe1   :  { %v142_v58 = vand.u32 2147483647, %v5191_v51  ;;  %v145_v59 = vand.u32 2139095040, %v5191_v51  ;;  %v5201_v62 = vadd.f32 %v130_v56, %v57_v57 }
  0xe2   :  { %v354_v60 = vshrl.u32 %v353_v54, 23  ;;  %v357_v61 = vand.u32 8388607, %v350_v53  ;;  %v454_v1 = vand.u32 2147483647, %v5195_v55  ;;  %v457_v2 = vand.u32 2139095040, %v5195_v55 }
  0xe3   :  { %v146_v63 = vshrl.u32 %v145_v59, 23  ;;  %v149_v0 = vand.u32 8388607, %v142_v58  ;;  %v249_v13 = vand.u32 2139095040, %v5201_v62 }
  0xe4   :  { %v4390_v3 = vadd.s32 4294967169, %v354_v60  ;;  %v358_v4 = vor.u32 8388608, %v357_v61  ;;  %v458_v8 = vshrl.u32 %v457_v2, 23  ;;  %v5209_v10 = vand.u32 8388607, %v454_v1 }
  0xe5   :  { %v4382_v6 = vadd.s32 4294967169, %v146_v63  ;;  %v150_v7 = vor.u32 8388608, %v149_v0  ;;  %v5221_v24 = vshrl.u32 %v249_v13, 23 }
  0xe6   :  { %v360_v9 = vadd.s32 1, %v4390_v3  ;;  %v4394_v12 = vadd.s32 4294967169, %v458_v8  ;;  %v5212_v15 = vshll.u32 %v358_v4, 8  ;;  %v462_v20 = vor.u32 8388608, %v5209_v10 }
  0xe7   :  { %v152_v11 = vadd.s32 1, %v4382_v6  ;;  %v5214_v16 = vshll.u32 %v150_v7, 8 }
  0xe8   :  { %vm361_vm3 = vcmp.gt.s32.totalorder %v360_v9, 0  ;;  %v5219_v23 = vadd.s32 1, %v4394_v12 }
  0xe9   :  { %v362_v14 = vsel %vm361_vm3, %v360_v9, 0  ;;  %vm153_vm4 = vcmp.gt.s32.totalorder %v152_v11, 0 }
  0xea   :  { %v363_v17 = vshrl.u32 %v362_v14, 5  ;;  %v364_v18 = vand.u32 31, %v362_v14  ;;  %v154_v19 = vsel %vm153_vm4, %v152_v11, 0  ;;  %vm465_vm9 = vcmp.gt.s32.totalorder %v5219_v23, 0 }
  0xeb   :  { %v5217_v21 = vshrl.u32 %v154_v19, 5  ;;  %v156_v22 = vand.u32 31, %v154_v19 }
  0xec   :  { %v365_v25 = vsub.s32 32, %v364_v18  ;;  %v367_v27 = vshll.u32 %v5014_v26, %v364_v18  ;;  %v370_v29 = vshll.u32 %v5015_v28, %v364_v18  ;;  %v373_v31 = vshll.u32 %v5016_v30, %v364_v18 }
  0xed   :  { %v376_v33 = vshll.u32 %v5017_v32, %v364_v18  ;;  %v379_v35 = vshll.u32 %v5018_v34, %v364_v18  ;;  %vm382_vm5 = vcmp.lt.s32.totalorder %v363_v17, 1  ;;  %vm383_vm6 = vcmp.lt.s32.totalorder %v363_v17, 2 }
  0xee   :  { %v366_v36 = vshrl.u32 %v5014_v26, %v365_v25  ;;  %v368_v37 = vshrl.u32 %v5015_v28, %v365_v25  ;;  %v371_v38 = vshrl.u32 %v5016_v30, %v365_v25  ;;  %v374_v39 = vshrl.u32 %v5017_v32, %v365_v25 }
  0xef   :  { %v377_v40 = vshrl.u32 %v5018_v34, %v365_v25  ;;  %v380_v42 = vshrl.u32 %v5019_v41, %v365_v25  ;;  %vm384_vm7 = vcmp.lt.s32.totalorder %v363_v17, 3  ;;  %vm385_vm8 = vcmp.lt.s32.totalorder %v363_v17, 4 }
  0xf0   :  { %v369_v43 = vor.u32 %v368_v37, %v367_v27  ;;  %v372_v44 = vor.u32 %v371_v38, %v370_v29  ;;  %v375_v45 = vor.u32 %v374_v39, %v373_v31  ;;  %v157_v46 = vsub.s32 32, %v156_v22 }
  0xf1   :  { %v378_v47 = vor.u32 %v377_v40, %v376_v33  ;;  %v381_v49 = vor.u32 %v380_v42, %v379_v35  ;;  %v159_v50 = vshll.u32 %v5014_v26, %v156_v22  ;;  %v162_v63 = vshll.u32 %v5015_v28, %v156_v22 }
  0xf2   :  { %v386_v52 = vsel %vm382_vm5, %v366_v36, %v369_v43  ;;  %v387_v54 = vsel %vm385_vm8, %v375_v45, 2102212464  ;;  %v390_v56 = vsel %vm382_vm5, %v369_v43, %v372_v44  ;;  %v394_v57 = vsel %vm382_vm5, %v372_v44, %v375_v45 }
  0xf3   :  { %v388_v59 = vsel %vm384_vm7, %v372_v44, %v387_v54  ;;  %v391_v60 = vsel %vm385_vm8, %v378_v47, 920167782  ;;  %v395_v61 = vsel %vm385_vm8, %v381_v49, 1326507024  ;;  %v158_v3 = vshrl.u32 %v5014_v26, %v157_v46 }
  0xf4   :  { %v392_v0 = vsel %vm384_vm7, %v375_v45, %v391_v60  ;;  %v396_v2 = vsel %vm384_vm7, %v378_v47, %v395_v61  ;;  %v160_v4 = vshrl.u32 %v5015_v28, %v157_v46  ;;  %v389_v6 = vsel %vm383_vm6, %v386_v52, %v388_v59 }
  0xf5   :  { %v393_v7 = vsel %vm383_vm6, %v390_v56, %v392_v0  ;;  %v397_v8 = vsel %vm383_vm6, %v394_v57, %v396_v2  ;;  %v163_v9 = vshrl.u32 %v5016_v30, %v157_v46  ;;  %v165_v25 = vshll.u32 %v5016_v30, %v156_v22 }
  0xf6   :  { %v5250_v11 = vmul.u32.u64.low %v5212_v15, %v397_v8  ;;  %v5251_v12 = vmul.u32.u64.high %v5212_v15, %v397_v8, %v5250_v11  ;;  %v5254_v13 = vmul.u32.u64.low %v5212_v15, %v393_v7  ;;  %v5255_v14 = vmul.u32.u64.high %v5212_v15, %v393_v7, %v5254_v13 }
  0xf7   :  { %v161_v18 = vor.u32 %v160_v4, %v159_v50  ;;  %v164_v19 = vor.u32 %v163_v9, %v162_v63  ;;  %v166_v27 = vshrl.u32 %v5017_v32, %v157_v46  ;;  %v405_v17 = vmul.u32 %v5212_v15, %v389_v6 }
  0xf8   :  { %v168_v29 = vshll.u32 %v5017_v32, %v156_v22  ;;  %v169_v31 = vshrl.u32 %v5018_v34, %v157_v46  ;;  %v172_v33 = vshrl.u32 %v5019_v41, %v157_v46  ;;  %v171_v36 = vshll.u32 %v5018_v34, %v156_v22 }
  0xf9   :  { %v167_v35 = vor.u32 %v166_v27, %v165_v25  ;;  %vm174_vm10 = vcmp.lt.s32.totalorder %v5217_v21, 1  ;;  %vm175_vm11 = vcmp.lt.s32.totalorder %v5217_v21, 2  ;;  %vm407_vm12 = vc.u32 %v5251_v12, %v5254_v13 }
  0xfa   :  { %v408_v37 = vadd.s32 1, %v5255_v14  ;;  %v170_v38 = vor.u32 %v169_v31, %v168_v29  ;;  %vm176_vm13 = vcmp.lt.s32.totalorder %v5217_v21, 3  ;;  %v173_v15 = vor.u32 %v172_v33, %v171_v36 }
  0xfb   :  { %vm177_vm14 = vcmp.lt.s32.totalorder %v5217_v21, 4  ;;  %v178_v39 = vsel %vm174_vm10, %v158_v3, %v161_v18  ;;  %v182_v40 = vsel %vm174_vm10, %v161_v18, %v164_v19  ;;  %v186_v44 = vsel %vm174_vm10, %v164_v19, %v167_v35 }
  0xfc   :  { %v409_v42 = vsel %vm407_vm12, %v408_v37, %v5255_v14  ;;  %v179_v22 = vsel %vm177_vm14, %v167_v35, 2102212464  ;;  %v183_v43 = vsel %vm177_vm14, %v170_v38, 920167782  ;;  %v187_v49 = vsel %vm177_vm14, %v173_v15, 1326507024 }
  0xfd   :  { %v410_v45 = vadd.s32 %v409_v42, %v405_v17  ;;  %v180_v46 = vsel %vm176_vm13, %v164_v19, %v179_v22  ;;  %v184_v47 = vsel %vm176_vm13, %v167_v35, %v183_v43  ;;  %v188_v52 = vsel %vm176_vm13, %v170_v38, %v187_v49 }
  0xfe   :  { %v185_v50 = vsel %vm175_vm11, %v182_v40, %v184_v47  ;;  %v466_v54 = vsel %vm465_vm9, %v5219_v23, 0  ;;  %v4386_v56 = vadd.s32 4294967169, %v5221_v24  ;;  %v189_v59 = vsel %vm175_vm11, %v186_v44, %v188_v52 }
  0xff   :  { %v411_v57 = vadd.s32 536870912, %v410_v45  ;;  %v5282_v60 = vmul.u32.u64.low %v5214_v16, %v185_v50  ;;  %v5283_v61 = vmul.u32.u64.high %v5214_v16, %v185_v50, %v5282_v60  ;;  %v181_v63 = vsel %vm175_vm11, %v178_v39, %v180_v46 }
 0x100   :  { %v5289_v0 = vmul.u32.u64.low %v5214_v16, %v189_v59  ;;  %v5290_v2 = vmul.u32.u64.high %v5214_v16, %v189_v59, %v5289_v0  ;;  %v467_v3 = vshrl.u32 %v466_v54, 5  ;;  %v468_v24 = vand.u32 31, %v466_v54 }
 0x101   :  { %v5292_v23 = vshrl.u32 %v411_v57, 30  ;;  %v5296_v4 = vshll.u32 %v462_v20, 8  ;;  %v197_v7 = vmul.u32 %v5214_v16, %v181_v63  ;;  %v200_v8 = vadd.s32 1, %v5283_v61 }
 0x102   :  { %v469_v21 = vsub.s32 32, %v468_v24  ;;  %vm199_vm15 = vc.u32 %v5290_v2, %v5282_v60  ;;  %v471_v9 = vshll.u32 %v5014_v26, %v468_v24  ;;  %vm486_vm0 = vcmp.lt.s32.totalorder %v467_v3, 1 }
 0x103   :  { %v413_v6 = vshll.u32 %v5292_v23, 30  ;;  %v256_v11 = vadd.s32 1, %v4386_v56  ;;  %v201_v14 = vsel %vm199_vm15, %v200_v8, %v5283_v61  ;;  %v474_v20 = vshll.u32 %v5015_v28, %v468_v24 }
 0x104   :  { %v472_v10 = vshrl.u32 %v5015_v28, %v469_v21  ;;  %v477_v18 = vshll.u32 %v5016_v30, %v468_v24  ;;  %v202_v16 = vadd.s32 %v201_v14, %v197_v7  ;;  %v475_v25 = vshrl.u32 %v5016_v30, %v469_v21 }
 0x105   :  { %v5308_v19 = vsub.s32 %v410_v45, %v413_v6  ;;  %v478_v27 = vshrl.u32 %v5017_v32, %v469_v21  ;;  %v480_v29 = vshll.u32 %v5017_v32, %v468_v24  ;;  %v481_v31 = vshrl.u32 %v5018_v34, %v469_v21 }
 0x106   :  { %v473_v17 = vor.u32 %v472_v10, %v471_v9  ;;  %v483_v33 = vshll.u32 %v5018_v34, %v468_v24  ;;  %v203_v35 = vadd.s32 536870912, %v202_v16  ;;  %v476_v36 = vor.u32 %v475_v25, %v474_v20 }
 0x107   :  { %v479_v37 = vor.u32 %v478_v27, %v477_v18  ;;  %v484_v38 = vshrl.u32 %v5019_v41, %v469_v21  ;;  %v482_v15 = vor.u32 %v481_v31, %v480_v29  ;;  %vm487_vm1 = vcmp.lt.s32.totalorder %v467_v3, 2 }
 0x108   :  { %vm488_vm3 = vcmp.lt.s32.totalorder %v467_v3, 3  ;;  %vm489_vm4 = vcmp.lt.s32.totalorder %v467_v3, 4  ;;  %v5316_v39 = vshrl.u32 %v203_v35, 30  ;;  %v494_v22 = vsel %vm486_vm0, %v473_v17, %v476_v36 }
 0x109   :  { %v485_v40 = vor.u32 %v484_v38, %v483_v33  ;;  %v491_v42 = vsel %vm489_vm4, %v479_v37, 2102212464  ;;  %v416_v43 = vsub.s32 0, %v5308_v19  ;;  %v470_v44 = vshrl.u32 %v5014_v26, %v469_v21 }
 0x10a   :  { %v495_v45 = vsel %vm489_vm4, %v482_v15, 920167782  ;;  %v498_v46 = vsel %vm486_vm0, %v476_v36, %v479_v37  ;;  %v205_v47 = vshll.u32 %v5316_v39, 30  ;;  %vm257_vm5 = vcmp.gt.s32.totalorder %v256_v11, 0 }
 0x10b   :  { %v496_v49 = vsel %vm488_vm3, %v479_v37, %v495_v45  ;;  %v499_v50 = vsel %vm489_vm4, %v485_v40, 1326507024  ;;  %v490_v52 = vsel %vm486_vm0, %v470_v44, %v473_v17  ;;  %v492_v54 = vsel %vm488_vm3, %v476_v36, %v491_v42 }
 0x10c   :  { %v497_v56 = vsel %vm487_vm1, %v494_v22, %v496_v49  ;;  %v500_v57 = vsel %vm488_vm3, %v482_v15, %v499_v50  ;;  %v5328_v59 = vsub.s32 %v202_v16, %v205_v47  ;;  %v258_v7 = vsel %vm257_vm5, %v256_v11, 0 }
 0x10d   :  { %v501_v61 = vsel %vm487_vm1, %v498_v46, %v500_v57  ;;  %v5332_v63 = vmul.u32.u64.low %v5296_v4, %v497_v56  ;;  %v5333_v0 = vmul.u32.u64.high %v5296_v4, %v497_v56, %v5332_v63  ;;  %v4391_v8 = vmin.u32 %v416_v43, %v5308_v19 }
 0x10e   :  { %v5337_v24 = vmul.u32.u64.low %v5296_v4, %v501_v61  ;;  %v5338_v6 = vmul.u32.u64.high %v5296_v4, %v501_v61, %v5337_v24  ;;  %v208_v21 = vsub.s32 0, %v5328_v59  ;;  %v493_v9 = vsel %vm487_vm1, %v490_v52, %v492_v54 }
 0x10f   :  { %v260_v14 = vand.u32 31, %v258_v7  ;;  %v512_v20 = vadd.s32 1, %v5333_v0  ;;  %v246_v18 = vand.u32 2147483647, %v5201_v62  ;;  %v509_v16 = vmul.u32 %v5296_v4, %v493_v9 }
 0x110   :  { %v4383_v10 = vmin.u32 %v208_v21, %v5328_v59  ;;  %vm511_vm6 = vc.u32 %v5338_v6, %v5332_v63  ;;  %v418_v25 = vclz %v4391_v8  ;;  %v259_v42 = vshrl.u32 %v258_v7, 5 }
 0x111   :  { %v513_v27 = vsel %vm511_vm6, %v512_v20, %v5333_v0  ;;  %v261_v17 = vsub.s32 32, %v260_v14  ;;  %v253_v3 = vand.u32 8388607, %v246_v18  ;;  %v263_v22 = vshll.u32 %v5014_v26, %v260_v14 }
 0x112   :  { %v210_v11 = vclz %v4383_v10  ;;  %v514_v29 = vadd.s32 %v513_v27, %v509_v16  ;;  %v4392_v33 = vadd.s32 4294967294, %v418_v25  ;;  %v266_v43 = vshll.u32 %v5015_v28, %v260_v14 }
 0x113   :  { %v264_v36 = vshrl.u32 %v5015_v28, %v261_v17  ;;  %v267_v37 = vshrl.u32 %v5016_v30, %v261_v17  ;;  %v270_v38 = vshrl.u32 %v5017_v32, %v261_v17  ;;  %v273_v15 = vshrl.u32 %v5018_v34, %v261_v17 }
 0x114   :  { %v515_v31 = vadd.s32 536870912, %v514_v29  ;;  %v4384_v35 = vadd.s32 4294967294, %v210_v11  ;;  %v254_v40 = vor.u32 8388608, %v253_v3  ;;  %v269_v45 = vshll.u32 %v5016_v30, %v260_v14 }
 0x115   :  { %v272_v46 = vshll.u32 %v5017_v32, %v260_v14  ;;  %v276_v47 = vshrl.u32 %v5019_v41, %v261_v17  ;;  %vm4393_vm7 = vcmp.lt.s32.totalorder %v4392_v33, 0  ;;  %v265_v49 = vor.u32 %v264_v36, %v263_v22 }
 0x116   :  { %v5354_v4 = vshrl.u32 %v515_v31, 30  ;;  %vm4385_vm8 = vcmp.lt.s32.totalorder %v4384_v35, 0  ;;  %v268_v50 = vor.u32 %v267_v37, %v266_v43  ;;  %v271_v54 = vor.u32 %v270_v38, %v269_v45 }
 0x117   :  { %v274_v56 = vor.u32 %v273_v15, %v272_v46  ;;  %v275_v57 = vshll.u32 %v5018_v34, %v260_v14  ;;  %v294_v61 = vshll.u32 %v254_v40, 8  ;;  %v213_v0 = vsel %vm4385_vm8, 0, %v4384_v35 }
 0x118   :  { %v517_v44 = vshll.u32 %v5354_v4, 30  ;;  %vm278_vm9 = vcmp.lt.s32.totalorder %v259_v42, 1  ;;  %v5368_v8 = vsel %vm4393_vm7, 0, %v4392_v33  ;;  %v262_v21 = vshrl.u32 %v5014_v26, %v261_v17 }
 0x119   :  { %v277_v7 = vor.u32 %v276_v47, %v275_v57  ;;  %vm281_vm10 = vcmp.lt.s32.totalorder %v259_v42, 4  ;;  %v286_v9 = vsel %vm278_vm9, %v265_v49, %v268_v50  ;;  %vm280_vm11 = vcmp.lt.s32.totalorder %v259_v42, 3 }
 0x11a   :  { %v5364_v52 = vsub.s32 %v514_v29, %v517_v44  ;;  %v283_v20 = vsel %vm281_vm10, %v271_v54, 2102212464  ;;  %v287_v16 = vsel %vm281_vm10, %v274_v56, 920167782  ;;  %v218_v25 = vsub.s32 4294967266, %v213_v0 }
 0x11b   :  { %vm279_vm12 = vcmp.lt.s32.totalorder %v259_v42, 2  ;;  %v288_v14 = vsel %vm280_vm11, %v271_v54, %v287_v16  ;;  %v290_v11 = vsel %vm278_vm9, %v268_v50, %v271_v54  ;;  %v282_v29 = vsel %vm278_vm9, %v262_v21, %v265_v49 }
 0x11c   :  { %v520_v24 = vsub.s32 0, %v5364_v52  ;;  %v289_v3 = vsel %vm279_vm12, %v286_v9, %v288_v14  ;;  %v291_v31 = vsel %vm281_vm10, %v277_v7, 1326507024  ;;  %v284_v33 = vsel %vm280_vm11, %v268_v50, %v283_v20 }
 0x11d   :  { %v292_v35 = vsel %vm280_vm11, %v274_v56, %v291_v31  ;;  %v5373_v36 = vmul.u32.u64.low %v294_v61, %v289_v3  ;;  %v5374_v17 = vmul.u32.u64.high %v294_v61, %v289_v3, %v5373_v36  ;;  %v426_v22 = vsub.s32 4294967266, %v5368_v8 }
 0x11e   :  { %v4395_v10 = vmin.u32 %v520_v24, %v5364_v52  ;;  %v293_v38 = vsel %vm279_vm12, %v290_v11, %v292_v35  ;;  %v285_v43 = vsel %vm279_vm12, %v282_v29, %v284_v33  ;;  %v219_v44 = vadd.s32 127, %v218_v25 }
 0x11f   :  { %v5378_v15 = vmul.u32.u64.low %v294_v61, %v293_v38  ;;  %v5379_v40 = vmul.u32.u64.high %v294_v61, %v293_v38, %v5378_v15  ;;  %v304_v46 = vadd.s32 1, %v5374_v17  ;;  %v214_v49 = vsub.s32 32, %v213_v0 }
 0x120   :  { %v522_v27 = vclz %v4395_v10  ;;  %v301_v50 = vmul.u32 %v294_v61, %v285_v43  ;;  %v427_v54 = vadd.s32 127, %v426_v22  ;;  %v198_v24 = vadd.s32 %v5282_v60, %v5290_v2  ;;  %v4869_v10 = vld [vmem:[%s7508_s3] sm:$0xff]  }
 0x121   :  { %vm303_vm14 = vc.u32 %v5379_v40, %v5373_v36  ;;  %v220_v7 = vshll.u32 %v219_v44, 23  ;;  %v422_v9 = vsub.s32 32, %v5368_v8  ;;  %v510_v20 = vadd.s32 %v5332_v63, %v5338_v6 }
 0x122   :  { %v4396_v37 = vadd.s32 4294967294, %v522_v27  ;;  %v305_v57 = vsel %vm303_vm14, %v304_v46, %v5374_v17  ;;  %v216_v61 = vshrl.u32 %v198_v24, %v214_v49  ;;  %v406_v14 = vadd.s32 %v5254_v13, %v5251_v12 }
 0x123   :  { %v306_v21 = vadd.s32 %v305_v57, %v301_v50  ;;  %v428_v11 = vshll.u32 %v427_v54, 23  ;;  %v215_v60 = vshll.u32 %v5328_v59, %v213_v0  ;;  %v221_v2 = vor.u32 4788187, %v220_v7 }
 0x124   :  { %vm4397_vm13 = vcmp.lt.s32.totalorder %v4396_v37, 0  ;;  %vm590_vm15 = vcmask 261120   ;;  %v424_v3 = vshrl.u32 %v406_v14, %v422_v9  ;;  %v423_v12 = vshll.u32 %v5308_v19, %v5368_v8 }
 0x125   :  { %v525_v45 = vsel %vm4397_vm13, 0, %v4396_v37  ;;  %v307_v25 = vadd.s32 536870912, %v306_v21  ;;  %4649 = vmatprep.mubr.msk.bf16.mxu1 %vm590_vm15, %v4869_v10  ;;  %v217_v31 = vor.u32 %v216_v61, %v215_v60  ;;  %v429_v13 = vor.u32 4788187, %v428_v11 }
 0x126   :  { %v530_v47 = vsub.s32 4294967266, %v525_v45  ;;  %v526_v42 = vsub.s32 32, %v525_v45  ;;  %v527_v33 = vshll.u32 %v5364_v52, %v525_v45  ;;  %v222_v35 = vand.u32 2147483647, %v221_v2 }
 0x127   :  { %v5398_v29 = vshrl.u32 %v307_v25, 30  ;;  %v425_v17 = vor.u32 %v424_v3, %v423_v12  ;;  %v224_v37 = vcvt.s32.f32 %v217_v31  ;;  %v430_v22 = vand.u32 2147483647, %v429_v13 }
 0x128   :  { %v531_v56 = vadd.s32 127, %v530_v47  ;;  %v528_v27 = vshrl.u32 %v510_v20, %v526_v42  ;;  %vm144_vm1 = vcmp.lt.s32.totalorder %v5191_v51, 0  ;;  %v302_v24 = vadd.s32 %v5373_v36, %v5379_v40 }
 0x129   :  { %v309_v6 = vshll.u32 %v5398_v29, 30  ;;  %v225_v43 = vmul.f32 %v224_v37, %v222_v35  ;;  %v432_v47 = vcvt.s32.f32 %v425_v17  ;;  %vm456_vm3 = vcmp.lt.s32.totalorder %v5195_v55, 0 }
 0x12a   :  { %v532_v16 = vshll.u32 %v531_v56, 23  ;;  %v529_v59 = vor.u32 %v528_v27, %v527_v33  ;;  %vm5413_vm4 = vcmp.le.f32.partialorder %v142_v58, 0.7853982  ;;  %vm352_vm5 = vcmp.lt.s32.totalorder %v5189_v48, 0 }
 0x12b   :  { %v310_v0 = vsub.s32 %v306_v21, %v309_v6  ;;  %v433_v49 = vmul.f32 %v432_v47, %v430_v22  ;;  %v226_v50 = vxor.u32 2147483648, %v225_v43  ;;  %vm5427_vm6 = vcmp.le.f32.partialorder %v454_v1, 0.7853982 }
 0x12c   :  { %v533_v63 = vor.u32 4788187, %v532_v16  ;;  %v536_v44 = vcvt.s32.f32 %v529_v59  ;;  %vm5436_vm7 = vcmp.le.f32.partialorder %v350_v53, 0.7853982  ;;  %v228_v2 = vsub.s32 4, %v5316_v39 }
 0x12d   :  { %v312_v15 = vsub.s32 0, %v310_v0  ;;  %v434_v19 = vxor.u32 2147483648, %v433_v49  ;;  %v227_v57 = vsel %vm144_vm1, %v226_v50, %v225_v43  ;;  %v436_v27 = vsub.s32 4, %v5292_v23 }
 0x12e   :  { %v534_v38 = vand.u32 2147483647, %v533_v63  ;;  %v230_v36 = vsel %vm5413_vm4, %v5191_v51, %v227_v57  ;;  %v540_v3 = vsub.s32 4, %v5354_v4  ;;  %v229_v63 = vsel %vm144_vm1, %v228_v2, %v5316_v39 }
 0x12f   :  { %v4387_v46 = vmin.u32 %v312_v15, %v310_v0  ;;  %v435_v40 = vsel %vm352_vm5, %v434_v19, %v433_v49  ;;  %4883 = vcosq.f32 %v230_v36  ;;  %v332_v6 = vsub.s32 4, %v5398_v29 }
 0x130   :  { %v537_v52 = vmul.f32 %v536_v44, %v534_v38  ;;  %v438_v1 = vsel %vm5436_vm7, %v5189_v48, %v435_v40  ;;  %4885 = vsinq.f32 %v230_v36  ;;  %v437_v12 = vsel %vm352_vm5, %v436_v27, %v5292_v23 }
 0x131   :  { %v314_v45 = vclz %v4387_v46  ;;  %v541_v13 = vsel %vm456_vm3, %v540_v3, %v5354_v4  ;;  %vm248_vm8 = vcmp.lt.s32.totalorder %v5201_v62, 0  ;;  %v231_v59 = vsel %vm5413_vm4, 0, %v229_v63 }
 0x132   :  { %v538_v56 = vxor.u32 2147483648, %v537_v52  ;;  %vm5461_vm9 = vcmp.le.f32.partialorder %v246_v18, 0.7853982  ;;  %v333_v17 = vsel %vm248_vm8, %v332_v6, %v5398_v29  ;;  %v439_v23 = vsel %vm5436_vm7, 0, %v437_v12  ;;  %v568_v12 = vpop.permute.xlu1 %567 }
 0x133   :  { %v4388_v54 = vadd.s32 4294967294, %v314_v45  ;;  %v543_v4 = vsel %vm5427_vm6, 0, %v541_v13  ;;  %v235_v15 = vadd.s32 3, %v231_v59  ;;  %v335_v22 = vsel %vm5461_vm9, 0, %v333_v17 }
 0x134   :  { %v539_v9 = vsel %vm456_vm3, %v538_v56, %v537_v52  ;;  %v443_v43 = vadd.s32 3, %v439_v23  ;;  %v547_v29 = vadd.s32 3, %v543_v4  ;;  %v339_v45 = vadd.s32 3, %v335_v22 }
 0x135   :  { %vm4389_vm0 = vcmp.lt.s32.totalorder %v4388_v54, 0  ;;  %v542_v14 = vsel %vm5427_vm6, %v5195_v55, %v539_v9  ;;  %v236_v52 = vand.u32 3, %v235_v15  ;;  %vm234_vm6 = vweird.f32 %v5191_v51  ;;  %v4870_v51 = vld [vmem:[%s7508_s3 + $0x8] sm:$0xff]  }
 0x136   :  { %v317_v8 = vsel %vm4389_vm0, 0, %v4388_v54  ;;  %4887 = vcosq.f32 %v542_v14  ;;  %v444_v50 = vand.u32 3, %v443_v43  ;;  %v548_v54 = vand.u32 3, %v547_v29  ;;  %v578_v39 = vpop.permute.xlu1 %577 }
 0x137   :  { %v318_v7 = vsub.s32 32, %v317_v8  ;;  %v322_v42 = vsub.s32 4294967266, %v317_v8  ;;  %v319_v10 = vshll.u32 %v310_v0, %v317_v8  ;;  %4889 = vsinq.f32 %v542_v14 }
 0x138   :  { %4891 = vsinq.f32 %v438_v1  ;;  %vm238_vm10 = vcmp.eq.s32.totalorder %v236_v52, 0  ;;  %vm241_vm11 = vcmp.eq.s32.totalorder %v236_v52, 2  ;;  %vm446_vm12 = vcmp.eq.s32.totalorder %v444_v50, 0 }
 0x139   :  { %v320_v61 = vshrl.u32 %v302_v24, %v318_v7  ;;  %v323_v20 = vadd.s32 127, %v322_v42  ;;  %4893 = vcosq.f32 %v438_v1  ;;  %v4884_v38 = vpop.eup %4883  ;;  %v340_v7 = vand.u32 3, %v339_v45 }
 0x13a   :  { %v4886_v18 = vpop.eup %4885  ;;  %v242_v19 = vxor.u32 2147483648, %v4884_v38  ;;  %vm550_vm13 = vcmp.eq.s32.totalorder %v548_v54, 0  ;;  %vm553_vm14 = vcmp.eq.s32.totalorder %v548_v54, 2  ;;  %vm237_vm0 = vcmp.lt.s32.totalorder %v236_v52, 2 }
 0x13b   :  { %v321_v16 = vor.u32 %v320_v61, %v319_v10  ;;  %v324_v25 = vshll.u32 %v323_v20, 23  ;;  %v239_v56 = vxor.u32 2147483648, %v4886_v18  ;;  %vm449_vm1 = vcmp.eq.s32.totalorder %v444_v50, 2 }
 0x13c   :  { %v243_v10 = vsel %vm241_vm11, %v242_v19, %v4886_v18  ;;  %vm345_vm3 = vcmp.eq.s32.totalorder %v340_v7, 2  ;;  %vm549_vm4 = vcmp.lt.s32.totalorder %v548_v54, 2  ;;  %vm342_vm5 = vcmp.eq.s32.totalorder %v340_v7, 0 }
 0x13d   :  { %v325_v60 = vor.u32 4788187, %v324_v25  ;;  %v328_v33 = vcvt.s32.f32 %v321_v16  ;;  %v240_v9 = vsel %vm238_vm10, %v4884_v38, %v239_v56  ;;  %vm341_vm7 = vcmp.lt.s32.totalorder %v340_v7, 2 }
 0x13e   :  { %v244_v14 = vsel %vm237_vm0, %v240_v9, %v243_v10  ;;  %vm546_vm10 = vweird.f32 %v5195_v55  ;;  %vm442_vm11 = vweird.f32 %v5189_v48  ;;  %v5020_v55 = vmov 0.0  }
 0x13f   :  { %v326_v31 = vand.u32 2147483647, %v325_v60  ;;  %v245_v3 = vsel %vm234_vm6, nan, %v244_v14  ;;  %4653 = vmatprep.subr.bf16.mxu0 %v5020_v55 }
 0x140   :  { %v4888_v44 = vpop.eup %4887 }
 0x141   :  { %v329_v53 = vmul.f32 %v328_v33, %v326_v31  ;;  %v4890_v46 = vpop.eup %4889  ;;  %v554_v57 = vxor.u32 2147483648, %v4888_v44 }
 0x142   :  { %v4892_v47 = vpop.eup %4891  ;;  %v551_v8 = vxor.u32 2147483648, %v4890_v46 }
 0x143   :  { %v330_v35 = vxor.u32 2147483648, %v329_v53  ;;  %v4894_v49 = vpop.eup %4893  ;;  %v447_v24 = vxor.u32 2147483648, %v4892_v47  ;;  %v555_v20 = vsel %vm553_vm14, %v554_v57, %v4890_v46 }
 0x144   :  { %v450_v42 = vxor.u32 2147483648, %v4894_v49  ;;  %v552_v61 = vsel %vm550_vm13, %v4888_v44, %v551_v8 }
 0x145   :  { %v331_v0 = vsel %vm248_vm8, %v330_v35, %v329_v53  ;;  %v448_v58 = vsel %vm446_vm12, %v4894_v49, %v447_v24  ;;  %v556_v60 = vsel %vm549_vm4, %v552_v61, %v555_v20  ;;  %vm445_vm8 = vcmp.lt.s32.totalorder %v444_v50, 2 }
 0x146   :  { %v334_v37 = vsel %vm5461_vm9, %v5201_v62, %v331_v0  ;;  %v451_v25 = vsel %vm449_vm1, %v450_v42, %v4892_v47  ;;  %vm338_vm9 = vweird.f32 %v5201_v62  ;;  %v557_v33 = vsel %vm546_vm10, nan, %v556_v60  ;;  %v563_v62 = vpop.permute.xlu0 %562 }
 0x147   :  { %4895 = vcosq.f32 %v334_v37  ;;  %v452_v27 = vsel %vm445_vm8, %v448_v58, %v451_v25 }
 0x148   :  { %4897 = vsinq.f32 %v334_v37  ;;  %v453_v63 = vsel %vm442_vm11, nan, %v452_v27 }
 0x149   :  { %v559_v6 = vpack.c.bf16 %v557_v33, %v453_v63 }
 0x14a   :  { %v573_v13 = vpop.permute.xlu0 %572 }
 0x151   :  { %v4896_v21 = vpop.eup %4895 }
 0x152   :  { %v4898_v36 = vpop.eup %4897  ;;  %v346_v40 = vxor.u32 2147483648, %v4896_v21 }
 0x153   :  { %v343_v16 = vxor.u32 2147483648, %v4898_v36 }
 0x154   :  { %v347_v11 = vsel %vm345_vm3, %v346_v40, %v4898_v36 }
 0x155   :  { %v344_v2 = vsel %vm342_vm5, %v4896_v21, %v343_v16 }
 0x156   :  { %v348_v1 = vsel %vm341_vm7, %v344_v2, %v347_v11 }
 0x157   :  { %v349_v31 = vsel %vm338_vm9, nan, %v348_v1 }
 0x158   :  { %v558_v53 = vpack.c.bf16 %v349_v31, %v245_v3 }
 0x15a   :  { %4645 = vmatprep.subr.bf16.mxu1 %v558_v53 }
 0x15b   :  { %4646 = vmatpush3.bf16.msra.mxu1 %v558_v53 }
 0x15c   :  { %4647 = vmatprep.subr.bf16.mxu1 %v559_v6 }
 0x15f   :  { %4648 = vmatpush3.bf16.msra.mxu1 %v559_v6 }
 0x162   :  { %4650 = vmatmul.mubr.msk.bf16.vlgmr.msra.gmra.mrb[0].mxu1 %vm590_vm15, %v4870_v51 }
 0x235   :  { %v4651_v35 = vpop.f32.mrb[0].mxu1 }
 0x236   :  { %v5484_v48 = vadd.f32 %v4651_v35, %v573_v13  ;;  %v631_v59 = vpop.f32.mrb[1].mxu1 }
 0x237   :  { %v5486_v0 = vadd.f32 %v631_v59, %v563_v62  ;;  %v4652_v17 = vpop.f32.mrb[2].mxu1 }
 0x238   :  { %v854_v23 = vand.u32 2147483647, %v5484_v48  ;;  %v857_v4 = vand.u32 2139095040, %v5484_v48  ;;  %v5490_v37 = vadd.f32 %v4652_v17, %v578_v39  ;;  %v634_v38 = vpop.f32.mrb[3].mxu1 }
 0x239   :  { %v646_v15 = vand.u32 2147483647, %v5486_v0  ;;  %v649_v18 = vand.u32 2139095040, %v5486_v0  ;;  %v5505_v10 = vadd.f32 %v634_v38, %v568_v12 }
 0x23a   :  { %v858_v22 = vshrl.u32 %v857_v4, 23  ;;  %v861_v43 = vand.u32 8388607, %v854_v23  ;;  %v961_v46 = vand.u32 2139095040, %v5490_v37 }
 0x23b   :  { %v650_v29 = vshrl.u32 %v649_v18, 23  ;;  %v653_v44 = vand.u32 8388607, %v646_v15 }
 0x23c   :  { %v4410_v47 = vadd.s32 4294967169, %v858_v22  ;;  %v962_v45 = vshrl.u32 %v961_v46, 23  ;;  %v862_v50 = vor.u32 8388608, %v861_v43 }
 0x23d   :  { %v4402_v52 = vadd.s32 4294967169, %v650_v29  ;;  %v654_v54 = vor.u32 8388608, %v653_v44 }
 0x23e   :  { %v864_v49 = vadd.s32 1, %v4410_v47  ;;  %v4414_v19 = vadd.s32 4294967169, %v962_v45  ;;  %v5499_v42 = vshll.u32 %v862_v50, 8 }
 0x23f   :  { %v656_v56 = vadd.s32 1, %v4402_v52  ;;  %v5501_v21 = vshll.u32 %v654_v54, 8 }
 0x240   :  { %vm865_vm12 = vcmp.gt.s32.totalorder %v864_v49, 0  ;;  %v5503_v9 = vadd.s32 1, %v4414_v19 }
 0x241   :  { %v866_v8 = vsel %vm865_vm12, %v864_v49, 0  ;;  %vm657_vm13 = vcmp.gt.s32.totalorder %v656_v56, 0 }
 0x242   :  { %v867_v57 = vshrl.u32 %v866_v8, 5  ;;  %v868_v24 = vand.u32 31, %v866_v8  ;;  %v658_v7 = vsel %vm657_vm13, %v656_v56, 0  ;;  %vm969_vm4 = vcmp.gt.s32.totalorder %v5503_v9, 0 }
 0x243   :  { %v5508_v36 = vshrl.u32 %v658_v7, 5  ;;  %v660_v40 = vand.u32 31, %v658_v7 }
 0x244   :  { %v869_v61 = vsub.s32 32, %v868_v24  ;;  %v871_v20 = vshll.u32 %v5014_v26, %v868_v24  ;;  %v874_v58 = vshll.u32 %v5015_v28, %v868_v24  ;;  %v877_v16 = vshll.u32 %v5016_v30, %v868_v24 }
 0x245   :  { %v880_v25 = vshll.u32 %v5017_v32, %v868_v24  ;;  %v883_v14 = vshll.u32 %v5018_v34, %v868_v24  ;;  %vm886_vm14 = vcmp.lt.s32.totalorder %v867_v57, 1  ;;  %vm887_vm0 = vcmp.lt.s32.totalorder %v867_v57, 2 }
 0x246   :  { %v872_v11 = vshrl.u32 %v5015_v28, %v869_v61  ;;  %v875_v60 = vshrl.u32 %v5016_v30, %v869_v61  ;;  %v878_v2 = vshrl.u32 %v5017_v32, %v869_v61  ;;  %v870_v1 = vshrl.u32 %v5014_v26, %v869_v61 }
 0x247   :  { %v881_v27 = vshrl.u32 %v5018_v34, %v869_v61  ;;  %v884_v3 = vshrl.u32 %v5019_v41, %v869_v61  ;;  %v661_v63 = vsub.s32 32, %v660_v40  ;;  %vm888_vm1 = vcmp.lt.s32.totalorder %v867_v57, 3 }
 0x248   :  { %v873_v31 = vor.u32 %v872_v11, %v871_v20  ;;  %v876_v33 = vor.u32 %v875_v60, %v874_v58  ;;  %v879_v53 = vor.u32 %v878_v2, %v877_v16  ;;  %vm889_vm3 = vcmp.lt.s32.totalorder %v867_v57, 4 }
 0x249   :  { %v882_v6 = vor.u32 %v881_v27, %v880_v25  ;;  %v885_v51 = vor.u32 %v884_v3, %v883_v14  ;;  %v663_v4 = vshll.u32 %v5014_v26, %v660_v40  ;;  %v664_v22 = vshrl.u32 %v5015_v28, %v661_v63 }
 0x24a   :  { %v890_v62 = vsel %vm886_vm14, %v870_v1, %v873_v31  ;;  %v891_v12 = vsel %vm889_vm3, %v879_v53, 2102212464  ;;  %v894_v13 = vsel %vm886_vm14, %v873_v31, %v876_v33  ;;  %v898_v35 = vsel %vm886_vm14, %v876_v33, %v879_v53 }
 0x24b   :  { %v892_v59 = vsel %vm888_vm1, %v876_v33, %v891_v12  ;;  %v895_v39 = vsel %vm889_vm3, %v882_v6, 920167782  ;;  %v899_v17 = vsel %vm889_vm3, %v885_v51, 1326507024  ;;  %v666_v43 = vshll.u32 %v5015_v28, %v660_v40 }
 0x24c   :  { %v896_v38 = vsel %vm888_vm1, %v879_v53, %v895_v39  ;;  %v900_v18 = vsel %vm888_vm1, %v882_v6, %v899_v17  ;;  %v893_v29 = vsel %vm887_vm0, %v890_v62, %v892_v59  ;;  %v667_v47 = vshrl.u32 %v5016_v30, %v661_v63 }
 0x24d   :  { %v897_v44 = vsel %vm887_vm0, %v894_v13, %v896_v38  ;;  %v901_v46 = vsel %vm887_vm0, %v898_v35, %v900_v18  ;;  %v665_v54 = vor.u32 %v664_v22, %v663_v4  ;;  %v669_v19 = vshll.u32 %v5016_v30, %v660_v40 }
 0x24e   :  { %v5532_v52 = vmul.u32.u64.low %v5499_v42, %v901_v46  ;;  %v5533_v45 = vmul.u32.u64.high %v5499_v42, %v901_v46, %v5532_v52  ;;  %v5536_v49 = vmul.u32.u64.low %v5499_v42, %v897_v44  ;;  %v5537_v50 = vmul.u32.u64.high %v5499_v42, %v897_v44, %v5536_v49 }
 0x24f   :  { %v668_v56 = vor.u32 %v667_v47, %v666_v43  ;;  %v670_v8 = vshrl.u32 %v5017_v32, %v661_v63  ;;  %v662_v57 = vshrl.u32 %v5014_v26, %v661_v63  ;;  %v672_v24 = vshll.u32 %v5017_v32, %v660_v40 }
 0x250   :  { %v673_v7 = vshrl.u32 %v5018_v34, %v661_v63  ;;  %v676_v61 = vshrl.u32 %v5019_v41, %v661_v63  ;;  %v909_v20 = vmul.u32 %v5499_v42, %v893_v29  ;;  %v675_v16 = vshll.u32 %v5018_v34, %v660_v40 }
 0x251   :  { %v671_v58 = vor.u32 %v670_v8, %v669_v19  ;;  %vm678_vm5 = vcmp.lt.s32.totalorder %v5508_v36, 1  ;;  %vm911_vm6 = vc.u32 %v5533_v45, %v5536_v49  ;;  %v912_v25 = vadd.s32 1, %v5537_v50 }
 0x252   :  { %v674_v14 = vor.u32 %v673_v7, %v672_v24  ;;  %vm679_vm7 = vcmp.lt.s32.totalorder %v5508_v36, 2  ;;  %v677_v11 = vor.u32 %v676_v61, %v675_v16  ;;  %vm680_vm8 = vcmp.lt.s32.totalorder %v5508_v36, 3 }
 0x253   :  { %vm681_vm9 = vcmp.lt.s32.totalorder %v5508_v36, 4  ;;  %v686_v60 = vsel %vm678_vm5, %v665_v54, %v668_v56  ;;  %v913_v42 = vsel %vm911_vm6, %v912_v25, %v5537_v50  ;;  %v690_v1 = vsel %vm678_vm5, %v668_v56, %v671_v58 }
 0x254   :  { %v683_v2 = vsel %vm681_vm9, %v671_v58, 2102212464  ;;  %v687_v40 = vsel %vm681_vm9, %v674_v14, 920167782  ;;  %v914_v27 = vadd.s32 %v913_v42, %v909_v20  ;;  %v682_v3 = vsel %vm678_vm5, %v662_v57, %v665_v54 }
 0x255   :  { %v688_v31 = vsel %vm680_vm8, %v671_v58, %v687_v40  ;;  %v691_v33 = vsel %vm681_vm9, %v677_v11, 1326507024  ;;  %v684_v53 = vsel %vm680_vm8, %v668_v56, %v683_v2  ;;  %v970_v51 = vsel %vm969_vm4, %v5503_v9, 0 }
 0x256   :  { %v689_v63 = vsel %vm679_vm7, %v686_v60, %v688_v31  ;;  %v692_v6 = vsel %vm680_vm8, %v674_v14, %v691_v33  ;;  %v915_v35 = vadd.s32 536870912, %v914_v27  ;;  %v685_v17 = vsel %vm679_vm7, %v682_v3, %v684_v53 }
 0x257   :  { %v693_v62 = vsel %vm679_vm7, %v690_v1, %v692_v6  ;;  %v5564_v12 = vmul.u32.u64.low %v5501_v21, %v689_v63  ;;  %v5565_v13 = vmul.u32.u64.high %v5501_v21, %v689_v63, %v5564_v12  ;;  %v958_v4 = vand.u32 2147483647, %v5490_v37 }
 0x258   :  { %v5569_v59 = vmul.u32.u64.low %v5501_v21, %v693_v62  ;;  %v5570_v39 = vmul.u32.u64.high %v5501_v21, %v693_v62, %v5569_v59  ;;  %v972_v38 = vand.u32 31, %v970_v51  ;;  %v753_v9 = vand.u32 2139095040, %v5505_v10 }
 0x259   :  { %v704_v18 = vadd.s32 1, %v5565_v13  ;;  %v5577_v43 = vshrl.u32 %v915_v35, 30  ;;  %v701_v29 = vmul.u32 %v5501_v21, %v685_v17  ;;  %v965_v36 = vand.u32 8388607, %v958_v4 }
 0x25a   :  { %v973_v22 = vsub.s32 32, %v972_v38  ;;  %vm703_vm10 = vc.u32 %v5570_v39, %v5564_v12  ;;  %v754_v46 = vshrl.u32 %v753_v9, 23  ;;  %v975_v52 = vshll.u32 %v5014_v26, %v972_v38 }
 0x25b   :  { %v705_v44 = vsel %vm703_vm10, %v704_v18, %v5565_v13  ;;  %v971_v56 = vshrl.u32 %v970_v51, 5  ;;  %v978_v19 = vshll.u32 %v5015_v28, %v972_v38  ;;  %v981_v21 = vshll.u32 %v5016_v30, %v972_v38 }
 0x25c   :  { %v706_v47 = vadd.s32 %v705_v44, %v701_v29  ;;  %v976_v50 = vshrl.u32 %v5015_v28, %v973_v22  ;;  %v979_v54 = vshrl.u32 %v5016_v30, %v973_v22  ;;  %v982_v8 = vshrl.u32 %v5017_v32, %v973_v22 }
 0x25d   :  { %v917_v57 = vshll.u32 %v5577_v43, 30  ;;  %v984_v58 = vshll.u32 %v5017_v32, %v972_v38  ;;  %v985_v16 = vshrl.u32 %v5018_v34, %v973_v22  ;;  %v987_v14 = vshll.u32 %v5018_v34, %v972_v38 }
 0x25e   :  { %v707_v24 = vadd.s32 536870912, %v706_v47  ;;  %v977_v7 = vor.u32 %v976_v50, %v975_v52  ;;  %v980_v61 = vor.u32 %v979_v54, %v978_v19  ;;  %v983_v20 = vor.u32 %v982_v8, %v981_v21 }
 0x25f   :  { %v988_v11 = vshrl.u32 %v5019_v41, %v973_v22  ;;  %v4406_v60 = vadd.s32 4294967169, %v754_v46  ;;  %v966_v42 = vor.u32 8388608, %v965_v36  ;;  %v986_v2 = vor.u32 %v985_v16, %v984_v58 }
 0x260   :  { %v5594_v25 = vshrl.u32 %v707_v24, 30  ;;  %vm990_vm11 = vcmp.lt.s32.totalorder %v971_v56, 1  ;;  %vm992_vm12 = vcmp.lt.s32.totalorder %v971_v56, 3  ;;  %vm993_vm13 = vcmp.lt.s32.totalorder %v971_v56, 4 }
 0x261   :  { %v989_v1 = vor.u32 %v988_v11, %v987_v14  ;;  %v5599_v3 = vsub.s32 %v914_v27, %v917_v57  ;;  %v998_v31 = vsel %vm990_vm11, %v977_v7, %v980_v61  ;;  %v999_v33 = vsel %vm993_vm13, %v986_v2, 920167782 }
 0x262   :  { %v709_v40 = vshll.u32 %v5594_v25, 30  ;;  %v1002_v53 = vsel %vm990_vm11, %v980_v61, %v983_v20  ;;  %v1000_v63 = vsel %vm992_vm12, %v983_v20, %v999_v33  ;;  %v760_v51 = vadd.s32 1, %v4406_v60 }
 0x263   :  { %v1003_v6 = vsel %vm993_vm13, %v989_v1, 1326507024  ;;  %v974_v62 = vshrl.u32 %v5014_v26, %v973_v22  ;;  %vm991_vm14 = vcmp.lt.s32.totalorder %v971_v56, 2  ;;  %v995_v13 = vsel %vm993_vm13, %v983_v20, 2102212464 }
 0x264   :  { %v1004_v35 = vsel %vm992_vm12, %v986_v2, %v1003_v6  ;;  %v5606_v59 = vsub.s32 %v706_v47, %v709_v40  ;;  %v1001_v27 = vsel %vm991_vm14, %v998_v31, %v1000_v63  ;;  %v1006_v38 = vshll.u32 %v966_v42, 8 }
 0x265   :  { %v1005_v17 = vsel %vm991_vm14, %v1002_v53, %v1004_v35  ;;  %v920_v9 = vsub.s32 0, %v5599_v3  ;;  %v994_v18 = vsel %vm990_vm11, %v974_v62, %v977_v7  ;;  %v996_v29 = vsel %vm992_vm12, %v980_v61, %v995_v13 }
 0x266   :  { %v5613_v44 = vmul.u32.u64.low %v1006_v38, %v1005_v17  ;;  %v5614_v36 = vmul.u32.u64.high %v1006_v38, %v1005_v17, %v5613_v44  ;;  %vm761_vm0 = vcmp.gt.s32.totalorder %v760_v51, 0  ;;  %v712_v47 = vsub.s32 0, %v5606_v59 }
 0x267   :  { %v5616_v22 = vmul.u32.u64.low %v1006_v38, %v1001_v27  ;;  %v5617_v46 = vmul.u32.u64.high %v1006_v38, %v1001_v27, %v5616_v22  ;;  %v762_v52 = vsel %vm761_vm0, %v760_v51, 0  ;;  %v997_v50 = vsel %vm991_vm14, %v994_v18, %v996_v29 }
 0x268   :  { %v764_v54 = vand.u32 31, %v762_v52  ;;  %v4411_v19 = vmin.u32 %v920_v9, %v5599_v3  ;;  %v4403_v8 = vmin.u32 %v712_v47, %v5606_v59  ;;  %v1013_v57 = vmul.u32 %v1006_v38, %v997_v50 }
 0x269   :  { %vm1015_vm1 = vc.u32 %v5614_v36, %v5616_v22  ;;  %v1016_v21 = vadd.s32 1, %v5617_v46  ;;  %v750_v7 = vand.u32 2147483647, %v5505_v10  ;;  %v763_v62 = vshrl.u32 %v762_v52, 5 }
 0x26a   :  { %v765_v61 = vsub.s32 32, %v764_v54  ;;  %v922_v20 = vclz %v4411_v19  ;;  %v714_v56 = vclz %v4403_v8  ;;  %v767_v31 = vshll.u32 %v5014_v26, %v764_v54 }
 0x26b   :  { %v1017_v24 = vsel %vm1015_vm1, %v1016_v21, %v5617_v46  ;;  %v757_v14 = vand.u32 8388607, %v750_v7  ;;  %v770_v33 = vshll.u32 %v5015_v28, %v764_v54  ;;  %v776_v53 = vshll.u32 %v5017_v32, %v764_v54 }
 0x26c   :  { %v1018_v58 = vadd.s32 %v1017_v24, %v1013_v57  ;;  %v768_v11 = vshrl.u32 %v5015_v28, %v765_v61  ;;  %v771_v60 = vshrl.u32 %v5016_v30, %v765_v61  ;;  %v4412_v42 = vadd.s32 4294967294, %v922_v20 }
 0x26d   :  { %v774_v40 = vshrl.u32 %v5017_v32, %v765_v61  ;;  %v777_v1 = vshrl.u32 %v5018_v34, %v765_v61  ;;  %v780_v63 = vshrl.u32 %v5019_v41, %v765_v61  ;;  %v4404_v6 = vadd.s32 4294967294, %v714_v56 }
 0x26e   :  { %v1019_v16 = vadd.s32 536870912, %v1018_v58  ;;  %v773_v13 = vshll.u32 %v5016_v30, %v764_v54  ;;  %v769_v35 = vor.u32 %v768_v11, %v767_v31  ;;  %v772_v27 = vor.u32 %v771_v60, %v770_v33 }
 0x26f   :  { %v778_v17 = vor.u32 %v777_v1, %v776_v53  ;;  %v779_v38 = vshll.u32 %v5018_v34, %v764_v54  ;;  %vm4413_vm3 = vcmp.lt.s32.totalorder %v4412_v42, 0  ;;  %v758_v29 = vor.u32 8388608, %v757_v14 }
 0x270   :  { %v5633_v2 = vshrl.u32 %v1019_v16, 30  ;;  %v775_v18 = vor.u32 %v774_v40, %v773_v13  ;;  %vm4405_vm4 = vcmp.lt.s32.totalorder %v4404_v6, 0  ;;  %vm782_vm5 = vcmp.lt.s32.totalorder %v763_v62, 1 }
 0x271   :  { %v781_v44 = vor.u32 %v780_v63, %v779_v38  ;;  %vm785_vm6 = vcmp.lt.s32.totalorder %v763_v62, 4  ;;  %v766_v47 = vshrl.u32 %v5014_v26, %v765_v61  ;;  %vm784_vm7 = vcmp.lt.s32.totalorder %v763_v62, 3 }
 0x272   :  { %v1021_v51 = vshll.u32 %v5633_v2, 30  ;;  %v790_v52 = vsel %vm782_vm5, %v769_v35, %v772_v27  ;;  %v791_v50 = vsel %vm785_vm6, %v778_v17, 920167782  ;;  %vm783_vm8 = vcmp.lt.s32.totalorder %v763_v62, 2 }
 0x273   :  { %v787_v54 = vsel %vm785_vm6, %v775_v18, 2102212464  ;;  %v792_v21 = vsel %vm784_vm7, %v775_v18, %v791_v50  ;;  %v794_v57 = vsel %vm782_vm5, %v772_v27, %v775_v18  ;;  %v795_v24 = vsel %vm785_vm6, %v781_v44, 1326507024 }
 0x274   :  { %v5644_v9 = vsub.s32 %v1018_v58, %v1021_v51  ;;  %v793_v8 = vsel %vm783_vm8, %v790_v52, %v792_v21  ;;  %v798_v20 = vshll.u32 %v758_v29, 8  ;;  %v717_v58 = vsel %vm4405_vm4, 0, %v4404_v6 }
 0x275   :  { %v786_v61 = vsel %vm782_vm5, %v766_v47, %v769_v35  ;;  %v796_v16 = vsel %vm784_vm7, %v778_v17, %v795_v24  ;;  %v788_v14 = vsel %vm784_vm7, %v772_v27, %v787_v54  ;;  %v925_v53 = vsel %vm4413_vm3, 0, %v4412_v42 }
 0x276   :  { %v1024_v46 = vsub.s32 0, %v5644_v9  ;;  %v797_v11 = vsel %vm783_vm8, %v794_v57, %v796_v16  ;;  %v5655_v60 = vmul.u32.u64.low %v798_v20, %v793_v8  ;;  %v5656_v40 = vmul.u32.u64.high %v798_v20, %v793_v8, %v5655_v60 }
 0x277   :  { %v5659_v31 = vmul.u32.u64.low %v798_v20, %v797_v11  ;;  %v5660_v33 = vmul.u32.u64.high %v798_v20, %v797_v11, %v5659_v31  ;;  %v722_v63 = vsub.s32 4294967266, %v717_v58  ;;  %v789_v6 = vsel %vm783_vm8, %v786_v61, %v788_v14 }
 0x278   :  { %v4415_v19 = vmin.u32 %v1024_v46, %v5644_v9  ;;  %v808_v13 = vadd.s32 1, %v5656_v40  ;;  %v930_v35 = vsub.s32 4294967266, %v925_v53  ;;  %v805_v38 = vmul.u32 %v798_v20, %v789_v6 }
 0x279   :  { %v723_v17 = vadd.s32 127, %v722_v63  ;;  %vm807_vm10 = vc.u32 %v5660_v33, %v5655_v60  ;;  %v718_v29 = vsub.s32 32, %v717_v58  ;;  %v702_v62 = vadd.s32 %v5564_v12, %v5570_v39 }
 0x27a   :  { %v1026_v56 = vclz %v4415_v19  ;;  %v809_v18 = vsel %vm807_vm10, %v808_v13, %v5656_v40  ;;  %v931_v42 = vadd.s32 127, %v930_v35  ;;  %v926_v19 = vsub.s32 32, %v925_v53 }
 0x27b   :  { %v810_v46 = vadd.s32 %v809_v18, %v805_v38  ;;  %v724_v47 = vshll.u32 %v723_v17, 23  ;;  %vm5021_vm11 = vmmov 0   ;;  %v720_v54 = vshrl.u32 %v702_v62, %v718_v29 }
 0x27c   :  { %v4416_v1 = vadd.s32 4294967294, %v1026_v56  ;;  %4657 = vmatprep.mubr.msk.bf16.mxu0 %vm5021_vm11, %v5020_v55  ;;  %v1014_v21 = vadd.s32 %v5616_v22, %v5614_v36  ;;  %v910_v24 = vadd.s32 %v5536_v49, %v5533_v45  ;;  %v932_v20 = vshll.u32 %v931_v42, 23 }
 0x27d   :  { %v811_v50 = vadd.s32 536870912, %v810_v46  ;;  %v719_v12 = vshll.u32 %v5606_v59, %v717_v58  ;;  %v725_v39 = vor.u32 4788187, %v724_v47  ;;  %v927_v36 = vshll.u32 %v5599_v3, %v925_v53 }
 0x27e   :  { %vm4417_vm9 = vcmp.lt.s32.totalorder %v4416_v1, 0  ;;  %v928_v16 = vshrl.u32 %v910_v24, %v926_v19  ;;  %v933_v22 = vor.u32 4788187, %v932_v20  ;;  %v806_v53 = vadd.s32 %v5655_v60, %v5660_v33 }
 0x27f   :  { %v1029_v51 = vsel %vm4417_vm9, 0, %v4416_v1  ;;  %v5674_v57 = vshrl.u32 %v811_v50, 30  ;;  %v721_v14 = vor.u32 %v720_v54, %v719_v12  ;;  %v726_v31 = vand.u32 2147483647, %v725_v39 }
 0x280   :  { %v1034_v27 = vsub.s32 4294967266, %v1029_v51  ;;  %v1030_v52 = vsub.s32 32, %v1029_v51  ;;  %v1031_v11 = vshll.u32 %v5644_v9, %v1029_v51  ;;  %v929_v45 = vor.u32 %v928_v16, %v927_v36 }
 0x281   :  { %v813_v61 = vshll.u32 %v5674_v57, 30  ;;  %v728_v49 = vcvt.s32.f32 %v721_v14  ;;  %v934_v58 = vand.u32 2147483647, %v933_v22  ;;  %vm648_vm13 = vcmp.lt.s32.totalorder %v5486_v0, 0 }
 0x282   :  { %v1035_v44 = vadd.s32 127, %v1034_v27  ;;  %v1032_v56 = vshrl.u32 %v1014_v21, %v1030_v52  ;;  %v936_v38 = vcvt.s32.f32 %v929_v45  ;;  %vm960_vm14 = vcmp.lt.s32.totalorder %v5490_v37, 0 }
 0x283   :  { %v814_v1 = vsub.s32 %v810_v46, %v813_v61  ;;  %v729_v35 = vmul.f32 %v728_v49, %v726_v31  ;;  %vm5690_vm0 = vcmp.le.f32.partialorder %v646_v15, 0.7853982  ;;  %vm856_vm1 = vcmp.lt.s32.totalorder %v5484_v48, 0 }
 0x284   :  { %v1036_v8 = vshll.u32 %v1035_v44, 23  ;;  %v1033_v63 = vor.u32 %v1032_v56, %v1031_v11  ;;  %v937_v9 = vmul.f32 %v936_v38, %v934_v58  ;;  %vm5704_vm3 = vcmp.le.f32.partialorder %v958_v4, 0.7853982 }
 0x285   :  { %v816_v6 = vsub.s32 0, %v814_v1  ;;  %v730_v51 = vxor.u32 2147483648, %v729_v35  ;;  %vm5710_vm4 = vcmp.le.f32.partialorder %v854_v23, 0.7853982  ;;  %v732_v39 = vsub.s32 4, %v5594_v25 }
 0x286   :  { %v1037_v40 = vor.u32 4788187, %v1036_v8  ;;  %v1040_v27 = vcvt.s32.f32 %v1033_v63  ;;  %v938_v62 = vxor.u32 2147483648, %v937_v9  ;;  %v940_v61 = vsub.s32 4, %v5577_v43 }
 0x287   :  { %v4407_v59 = vmin.u32 %v816_v6, %v814_v1  ;;  %v731_v47 = vsel %vm648_vm13, %v730_v51, %v729_v35  ;;  %v1044_v23 = vsub.s32 4, %v5633_v2  ;;  %vm752_vm5 = vcmp.lt.s32.totalorder %v5505_v10, 0 }
 0x288   :  { %v1038_v13 = vand.u32 2147483647, %v1037_v40  ;;  %v734_v8 = vsel %vm5690_vm0, %v5486_v0, %v731_v47  ;;  %v939_v24 = vsel %vm856_vm1, %v938_v62, %v937_v9  ;;  %v836_v40 = vsub.s32 4, %v5674_v57 }
 0x289   :  { %v818_v17 = vclz %v4407_v59  ;;  %4899 = vcosq.f32 %v734_v8  ;;  %v942_v14 = vsel %vm5710_vm4, %v5484_v48, %v939_v24  ;;  %v941_v36 = vsel %vm856_vm1, %v940_v61, %v5577_v43 }
 0x28a   :  { %v1041_v18 = vmul.f32 %v1040_v27, %v1038_v13  ;;  %4901 = vsinq.f32 %v734_v8  ;;  %v1045_v31 = vsel %vm960_vm14, %v1044_v23, %v5633_v2  ;;  %vm751_vm6 = vcmp.le.f32.partialorder %v750_v7, 0.7853982 }
 0x28b   :  { %v4408_v29 = vadd.s32 4294967294, %v818_v17  ;;  %v837_v6 = vsel %vm752_vm5, %v836_v40, %v5674_v57  ;;  %v943_v43 = vsel %vm5710_vm4, 0, %v941_v36  ;;  %v1047_v49 = vsel %vm5704_vm3, 0, %v1045_v31 }
 0x28c   :  { %v1042_v3 = vxor.u32 2147483648, %v1041_v18  ;;  %v839_v13 = vsel %vm751_vm6, 0, %v837_v6  ;;  %v947_v58 = vadd.s32 3, %v943_v43  ;;  %v1051_v27 = vadd.s32 3, %v1047_v49  ;;  %v4872_v49 = vld [vmem:[%s7504_s1 + $0x18] sm:$0xff]  }
 0x28d   :  { %vm4409_vm12 = vcmp.lt.s32.totalorder %v4408_v29, 0  ;;  %v843_v17 = vadd.s32 3, %v839_v13 }
 0x28e   :  { %v821_v44 = vsel %vm4409_vm12, 0, %v4408_v29  ;;  %v1043_v60 = vsel %vm960_vm14, %v1042_v3, %v1041_v18  ;;  %v948_v51 = vand.u32 3, %v947_v58  ;;  %v1052_v3 = vand.u32 3, %v1051_v27 }
 0x28f   :  { %v822_v46 = vsub.s32 32, %v821_v44  ;;  %v826_v42 = vsub.s32 4294967266, %v821_v44  ;;  %v823_v52 = vshll.u32 %v814_v1, %v821_v44  ;;  %v1046_v56 = vsel %vm5704_vm3, %v5490_v37, %v1043_v60 }
 0x290   :  { %4903 = vcosq.f32 %v1046_v56  ;;  %v733_v1 = vsel %vm648_vm13, %v732_v39, %v5594_v25  ;;  %vm950_vm10 = vcmp.eq.s32.totalorder %v948_v51, 0  ;;  %vm953_vm12 = vcmp.eq.s32.totalorder %v948_v51, 2 }
 0x291   :  { %v824_v50 = vshrl.u32 %v806_v53, %v822_v46  ;;  %v827_v19 = vadd.s32 127, %v826_v42  ;;  %4905 = vsinq.f32 %v1046_v56  ;;  %v735_v63 = vsel %vm5690_vm0, 0, %v733_v1 }
 0x292   :  { %4907 = vsinq.f32 %v942_v14  ;;  %v739_v2 = vadd.s32 3, %v735_v63  ;;  %v844_v53 = vand.u32 3, %v843_v17  ;;  %vm1054_vm13 = vcmp.eq.s32.totalorder %v1052_v3, 0  ;;  %v5011_v63 = vld [vmem:[%s7503_s0] sm:$0x7] }
 0x293   :  { %v825_v33 = vor.u32 %v824_v50, %v823_v52  ;;  %v828_v21 = vshll.u32 %v827_v19, 23  ;;  %4909 = vcosq.f32 %v942_v14  ;;  %v4900_v59 = vpop.eup %4899  ;;  %vm1057_vm14 = vcmp.eq.s32.totalorder %v1052_v3, 2 }
 0x294   :  { %v4902_v35 = vpop.eup %4901  ;;  %v740_v57 = vand.u32 3, %v739_v2  ;;  %v746_v9 = vxor.u32 2147483648, %v4900_v59  ;;  %vm849_vm0 = vcmp.eq.s32.totalorder %v844_v53, 2  ;;  %vm846_vm1 = vcmp.eq.s32.totalorder %v844_v53, 0  ;;  %v1142_v2 = vpop.permute.xlu1 %1141 }
 0x295   :  { %v829_v20 = vor.u32 4788187, %v828_v21  ;;  %v832_v16 = vcvt.s32.f32 %v825_v33  ;;  %v743_v29 = vxor.u32 2147483648, %v4902_v35  ;;  %vm845_vm3 = vcmp.lt.s32.totalorder %v844_v53, 2 }
 0x296   :  { %vm741_vm7 = vcmp.lt.s32.totalorder %v740_v57, 2  ;;  %vm742_vm8 = vcmp.eq.s32.totalorder %v740_v57, 0  ;;  %vm745_vm9 = vcmp.eq.s32.totalorder %v740_v57, 2  ;;  %vm1053_vm4 = vcmp.lt.s32.totalorder %v1052_v3, 2 }
 0x297   :  { %v830_v4 = vand.u32 2147483647, %v829_v20  ;;  %v744_v52 = vsel %vm742_vm8, %v4900_v59, %v743_v29  ;;  %v747_v50 = vsel %vm745_vm9, %v746_v9, %v4902_v35  ;;  %vm949_vm8 = vcmp.lt.s32.totalorder %v948_v51, 2 }
 0x298   :  { %v748_v24 = vsel %vm741_vm7, %v744_v52, %v747_v50  ;;  %vm1050_vm7 = vweird.f32 %v5490_v37  ;;  %vm946_vm9 = vweird.f32 %v5484_v48  ;;  %v1067_v37 = vpop.permute.xlu0 %1066  ;;  %v1152_v59 = vpop.permute.xlu1 %1151 }
 0x299   :  { %v833_v11 = vmul.f32 %v832_v16, %v830_v4 }
 0x29a   :  { %v4904_v7 = vpop.eup %4903 }
 0x29b   :  { %v834_v22 = vxor.u32 2147483648, %v833_v11  ;;  %v4906_v38 = vpop.eup %4905  ;;  %v1058_v42 = vxor.u32 2147483648, %v4904_v7 }
 0x29c   :  { %v4908_v18 = vpop.eup %4907  ;;  %v1055_v46 = vxor.u32 2147483648, %v4906_v38  ;;  %v1147_v13 = vpop.permute.xlu0 %1146 }
 0x29d   :  { %v835_v25 = vsel %vm752_vm5, %v834_v22, %v833_v11  ;;  %v4910_v44 = vpop.eup %4909  ;;  %v951_v62 = vxor.u32 2147483648, %v4908_v18  ;;  %v1059_v8 = vsel %vm1057_vm14, %v1058_v42, %v4906_v38  ;;  %vm738_vm5 = vweird.f32 %v5486_v0  ;;  %v46_v0 = vld [vmem:[%s7509_s5] sm:$0x3] }
 0x29e   :  { %v838_v45 = vsel %vm751_vm6, %v5505_v10, %v835_v25  ;;  %v954_v19 = vxor.u32 2147483648, %v4910_v44  ;;  %v1056_v21 = vsel %vm1054_vm13, %v4904_v7, %v1055_v46  ;;  %vm842_vm6 = vweird.f32 %v5505_v10  ;;  %v4871_v10 = vld [vmem:[%s7504_s1 + $0x10] sm:$0xff]  }
 0x29f   :  { %4911 = vcosq.f32 %v838_v45  ;;  %v952_v20 = vsel %vm950_vm10, %v4910_v44, %v951_v62  ;;  %v1060_v61 = vsel %vm1053_vm4, %v1056_v21, %v1059_v8  ;;  %v749_v4 = vsel %vm738_vm5, nan, %v748_v24  ;;  %4663 = vmatprep.mubr.msk.bf16.mxu1 %vm79_vm2, %v4871_v10 }
 0x2a0   :  { %4913 = vsinq.f32 %v838_v45  ;;  %v955_v39 = vsel %vm953_vm12, %v954_v19, %v4908_v18  ;;  %v1061_v11 = vsel %vm1050_vm7, nan, %v1060_v61  ;;  %v1157_v7 = vpop.permute.xlu0 %1156 }
 0x2a1   :  { %v956_v23 = vsel %vm949_vm8, %v952_v20, %v955_v39 }
 0x2a2   :  { %v957_v40 = vsel %vm946_vm9, nan, %v956_v23 }
 0x2a3   :  { %v1063_v1 = vpack.c.bf16 %v1061_v11, %v957_v40 }
 0x2a9   :  { %v4912_v47 = vpop.eup %4911 }
 0x2aa   :  { %v4914_v54 = vpop.eup %4913  ;;  %v850_v60 = vxor.u32 2147483648, %v4912_v47 }
 0x2ab   :  { %v847_v33 = vxor.u32 2147483648, %v4914_v54 }
 0x2ac   :  { %v851_v15 = vsel %vm849_vm0, %v850_v60, %v4914_v54 }
 0x2ad   :  { %v848_v12 = vsel %vm846_vm1, %v4912_v47, %v847_v33 }
 0x2ae   :  { %v852_v56 = vsel %vm845_vm3, %v848_v12, %v851_v15 }
 0x2af   :  { %v853_v16 = vsel %vm842_vm6, nan, %v852_v56  ;;  %v4873_v56 = vld [vmem:[%s7508_s3 + $0x10] sm:$0xff]  }
 0x2b0   :  { %v1062_v14 = vpack.c.bf16 %v853_v16, %v749_v4 }
 0x2b2   :  { %4654 = vmatpush3.bf16.msra.mxu0 %v1062_v14 }
 0x2b3   :  { %4655 = vmatprep.subr.bf16.mxu0 %v5020_v55 }
 0x2b6   :  { %4656 = vmatpush3.bf16.msra.mxu0 %v1063_v1 }
 0x2b9   :  { %4658 = vmatmul.mubr.msk.bf16.vlgmr.msra.gmra.mrb[4].mxu0 %vm590_vm15, %v46_v0 }
 0x2ba   :  { %4671 = vmatprep.mubr.msk.bf16.mxu0 %vm590_vm15, %v4873_v56 }
 0x38c   :  { %v1106_v36 = vpop.f32.mrb[4].mxu0 }
 0x38d   :  { %v1107_v48 = vadd.f32 %v1106_v36, %v1067_v37  ;;  %v4659_v22 = vpop.f32.mrb[5].mxu0 }
 0x38e   :  { %v1109_v31 = vpop.f32.mrb[6].mxu0 }
 0x38f   :  { %v5761_v25 = vadd.f32 %v5011_v63, %v1107_v48  ;;  %1113 = vst [vmem:[%s7510_s8] sm:$0x7] %v1107_v48  ;;  %v4660_v6 = vpop.f32.mrb[7].mxu0 }
 0x391   :  { %v1138_v43 = vpack.c.bf16 %v5761_v25, %v5761_v25 }
 0x393   :  { %v1176_v45 = vand.u32 %v1138_v43, %v5073_v5 }
 0x395   :  { %4661 = vmatprep.subr.bf16.mxu1 %v1176_v45 }
 0x396   :  { %4662 = vmatpush3.bf16.msra.mxu1 %v1176_v45 }
 0x397   :  { %4675 = vmatprep.subr.bf16.mxu1 %v5020_v55 }
 0x399   :  { %4664 = vmatmul.mubr.msk.bf16.vlgmr.msra.gmra.mrb[4].mxu1 %vm79_vm2, %v4872_v49 }
 0x39a   :  { %4679 = vmatprep.mubr.msk.bf16.mxu1 %vm5021_vm11, %v5020_v55 }
 0x46c   :  { %v4665_v58 = vpop.f32.mrb[4].mxu1 }
 0x46d   :  { %v5776_v35 = vadd.f32 %v4665_v58, %v1152_v59  ;;  %v1212_v27 = vpop.f32.mrb[5].mxu1 }
 0x46e   :  { %v5778_v17 = vadd.f32 %v1212_v27, %v1142_v2  ;;  %v4666_v38 = vpop.f32.mrb[6].mxu1 }
 0x46f   :  { %v1435_v57 = vand.u32 2147483647, %v5776_v35  ;;  %v1438_v18 = vand.u32 2139095040, %v5776_v35  ;;  %v5782_v29 = vadd.f32 %v4666_v38, %v1157_v7  ;;  %v1215_v9 = vpop.f32.mrb[7].mxu1 }
 0x470   :  { %v1227_v51 = vand.u32 2147483647, %v5778_v17  ;;  %v1230_v44 = vand.u32 2139095040, %v5778_v17  ;;  %v5792_v50 = vadd.f32 %v1215_v9, %v1147_v13 }
 0x471   :  { %v1439_v3 = vshrl.u32 %v1438_v18, 23  ;;  %v1442_v53 = vand.u32 8388607, %v1435_v57  ;;  %v1542_v62 = vand.u32 2139095040, %v5782_v29  ;;  %v1539_v52 = vand.u32 2147483647, %v5782_v29 }
 0x472   :  { %v1231_v46 = vshrl.u32 %v1230_v44, 23  ;;  %v1234_v42 = vand.u32 8388607, %v1227_v51  ;;  %v1334_v20 = vand.u32 2139095040, %v5792_v50 }
 0x473   :  { %v4449_v47 = vadd.s32 4294967169, %v1439_v3  ;;  %v1443_v19 = vor.u32 8388608, %v1442_v53  ;;  %v1543_v60 = vshrl.u32 %v1542_v62, 23  ;;  %v5796_v15 = vand.u32 8388607, %v1539_v52 }
 0x474   :  { %v4441_v54 = vadd.s32 4294967169, %v1231_v46  ;;  %v1235_v21 = vor.u32 8388608, %v1234_v42  ;;  %v5814_v36 = vshrl.u32 %v1334_v20, 23 }
 0x475   :  { %v1445_v33 = vadd.s32 1, %v4449_v47  ;;  %v4453_v24 = vadd.s32 4294967169, %v1543_v60  ;;  %v5799_v39 = vshll.u32 %v1443_v19, 8  ;;  %v1547_v40 = vor.u32 8388608, %v5796_v15 }
 0x476   :  { %v1237_v8 = vadd.s32 1, %v4441_v54  ;;  %v5804_v14 = vshll.u32 %v1235_v21, 8 }
 0x477   :  { %vm1446_vm10 = vcmp.gt.s32.totalorder %v1445_v33, 0  ;;  %v5809_v1 = vadd.s32 1, %v4453_v24 }
 0x478   :  { %v1447_v12 = vsel %vm1446_vm10, %v1445_v33, 0  ;;  %vm1238_vm12 = vcmp.gt.s32.totalorder %v1237_v8, 0 }
 0x479   :  { %v1448_v61 = vshrl.u32 %v1447_v12, 5  ;;  %v1449_v4 = vand.u32 31, %v1447_v12  ;;  %v1239_v16 = vsel %vm1238_vm12, %v1237_v8, 0  ;;  %vm1550_vm3 = vcmp.gt.s32.totalorder %v5809_v1, 0 }
 0x47a   :  { %v5806_v23 = vshrl.u32 %v1239_v16, 5  ;;  %v1241_v11 = vand.u32 31, %v1239_v16 }
 0x47b   :  { %v1450_v0 = vsub.s32 32, %v1449_v4  ;;  %v1452_v10 = vshll.u32 %v5014_v26, %v1449_v4  ;;  %v1455_v37 = vshll.u32 %v5015_v28, %v1449_v4  ;;  %v1458_v48 = vshll.u32 %v5016_v30, %v1449_v4 }
 0x47c   :  { %v1461_v22 = vshll.u32 %v5017_v32, %v1449_v4  ;;  %v1464_v31 = vshll.u32 %v5018_v34, %v1449_v4  ;;  %vm1467_vm13 = vcmp.lt.s32.totalorder %v1448_v61, 1  ;;  %vm1468_vm14 = vcmp.lt.s32.totalorder %v1448_v61, 2 }
 0x47d   :  { %v1453_v63 = vshrl.u32 %v5015_v28, %v1450_v0  ;;  %v1456_v6 = vshrl.u32 %v5016_v30, %v1450_v0  ;;  %v1459_v43 = vshrl.u32 %v5017_v32, %v1450_v0  ;;  %v1451_v45 = vshrl.u32 %v5014_v26, %v1450_v0 }
 0x47e   :  { %v1462_v49 = vshrl.u32 %v5018_v34, %v1450_v0  ;;  %v1465_v2 = vshrl.u32 %v5019_v41, %v1450_v0  ;;  %vm1469_vm0 = vcmp.lt.s32.totalorder %v1448_v61, 3  ;;  %v1242_v27 = vsub.s32 32, %v1241_v11 }
 0x47f   :  { %v1454_v13 = vor.u32 %v1453_v63, %v1452_v10  ;;  %v1457_v59 = vor.u32 %v1456_v6, %v1455_v37  ;;  %v1460_v58 = vor.u32 %v1459_v43, %v1458_v48  ;;  %vm1470_vm1 = vcmp.lt.s32.totalorder %v1448_v61, 4 }
 0x480   :  { %v1463_v7 = vor.u32 %v1462_v49, %v1461_v22  ;;  %v1466_v38 = vor.u32 %v1465_v2, %v1464_v31  ;;  %v1244_v18 = vshll.u32 %v5014_v26, %v1241_v11  ;;  %v1247_v47 = vshll.u32 %v5015_v28, %v1241_v11 }
 0x481   :  { %v1471_v9 = vsel %vm1467_vm13, %v1451_v45, %v1454_v13  ;;  %v1472_v44 = vsel %vm1470_vm1, %v1460_v58, 2102212464  ;;  %v1475_v3 = vsel %vm1467_vm13, %v1454_v13, %v1457_v59  ;;  %v1479_v53 = vsel %vm1467_vm13, %v1457_v59, %v1460_v58 }
 0x482   :  { %v1473_v46 = vsel %vm1469_vm0, %v1457_v59, %v1472_v44  ;;  %v1476_v42 = vsel %vm1470_vm1, %v1463_v7, 920167782  ;;  %v1480_v62 = vsel %vm1470_vm1, %v1466_v38, 1326507024  ;;  %v1243_v60 = vshrl.u32 %v5014_v26, %v1242_v27 }
 0x483   :  { %v1477_v19 = vsel %vm1469_vm0, %v1460_v58, %v1476_v42  ;;  %v1481_v54 = vsel %vm1469_vm0, %v1463_v7, %v1480_v62  ;;  %v1245_v33 = vshrl.u32 %v5015_v28, %v1242_v27  ;;  %v1474_v21 = vsel %vm1468_vm14, %v1471_v9, %v1473_v46 }
 0x484   :  { %v1478_v8 = vsel %vm1468_vm14, %v1475_v3, %v1477_v19  ;;  %v1482_v24 = vsel %vm1468_vm14, %v1479_v53, %v1481_v54  ;;  %v1248_v20 = vshrl.u32 %v5016_v30, %v1242_v27  ;;  %v1250_v37 = vshll.u32 %v5016_v30, %v1241_v11 }
 0x485   :  { %v5841_v12 = vmul.u32.u64.low %v5799_v39, %v1482_v24  ;;  %v5842_v56 = vmul.u32.u64.high %v5799_v39, %v1482_v24, %v5841_v12  ;;  %v5845_v4 = vmul.u32.u64.low %v5799_v39, %v1478_v8  ;;  %v5846_v16 = vmul.u32.u64.high %v5799_v39, %v1478_v8, %v5845_v4 }
 0x486   :  { %v1246_v0 = vor.u32 %v1245_v33, %v1244_v18  ;;  %v1249_v10 = vor.u32 %v1248_v20, %v1247_v47  ;;  %v1251_v48 = vshrl.u32 %v5017_v32, %v1242_v27  ;;  %v1490_v61 = vmul.u32 %v5799_v39, %v1474_v21 }
 0x487   :  { %v1253_v22 = vshll.u32 %v5017_v32, %v1241_v11  ;;  %v1254_v31 = vshrl.u32 %v5018_v34, %v1242_v27  ;;  %v1257_v63 = vshrl.u32 %v5019_v41, %v1242_v27  ;;  %v1256_v43 = vshll.u32 %v5018_v34, %v1241_v11 }
 0x488   :  { %v1252_v6 = vor.u32 %v1251_v48, %v1250_v37  ;;  %vm1259_vm4 = vcmp.lt.s32.totalorder %v5806_v23, 1  ;;  %vm1260_vm5 = vcmp.lt.s32.totalorder %v5806_v23, 2  ;;  %vm1492_vm6 = vc.u32 %v5842_v56, %v5845_v4 }
 0x489   :  { %v1493_v45 = vadd.s32 1, %v5846_v16  ;;  %v1255_v49 = vor.u32 %v1254_v31, %v1253_v22  ;;  %vm1261_vm8 = vcmp.lt.s32.totalorder %v5806_v23, 3  ;;  %v1258_v39 = vor.u32 %v1257_v63, %v1256_v43 }
 0x48a   :  { %vm1262_vm7 = vcmp.lt.s32.totalorder %v5806_v23, 4  ;;  %v1263_v2 = vsel %vm1259_vm4, %v1243_v60, %v1246_v0  ;;  %v1267_v13 = vsel %vm1259_vm4, %v1246_v0, %v1249_v10  ;;  %v1271_v27 = vsel %vm1259_vm4, %v1249_v10, %v1252_v6 }
 0x48b   :  { %v1494_v59 = vsel %vm1492_vm6, %v1493_v45, %v5846_v16  ;;  %v1264_v11 = vsel %vm1262_vm7, %v1252_v6, 2102212464  ;;  %v1268_v58 = vsel %vm1262_vm7, %v1255_v49, 920167782  ;;  %v1272_v9 = vsel %vm1262_vm7, %v1258_v39, 1326507024 }
 0x48c   :  { %v1495_v7 = vadd.s32 %v1494_v59, %v1490_v61  ;;  %v1265_v38 = vsel %vm1261_vm8, %v1249_v10, %v1264_v11  ;;  %v1269_v18 = vsel %vm1261_vm8, %v1252_v6, %v1268_v58  ;;  %v1273_v53 = vsel %vm1261_vm8, %v1255_v49, %v1272_v9 }
 0x48d   :  { %v1266_v44 = vsel %vm1260_vm5, %v1263_v2, %v1265_v38  ;;  %v1270_v3 = vsel %vm1260_vm5, %v1267_v13, %v1269_v18  ;;  %v1551_v46 = vsel %vm1550_vm3, %v5809_v1, 0  ;;  %v1274_v62 = vsel %vm1260_vm5, %v1271_v27, %v1273_v53 }
 0x48e   :  { %v1496_v42 = vadd.s32 536870912, %v1495_v7  ;;  %v5874_v47 = vmul.u32.u64.low %v5804_v14, %v1270_v3  ;;  %v5875_v19 = vmul.u32.u64.high %v5804_v14, %v1270_v3, %v5874_v47  ;;  %v1552_v33 = vshrl.u32 %v1551_v46, 5 }
 0x48f   :  { %v5879_v54 = vmul.u32.u64.low %v5804_v14, %v1274_v62  ;;  %v5880_v60 = vmul.u32.u64.high %v5804_v14, %v1274_v62, %v5879_v54  ;;  %v1553_v8 = vand.u32 31, %v1551_v46  ;;  %v1282_v24 = vmul.u32 %v5804_v14, %v1266_v44 }
 0x490   :  { %v5882_v21 = vshrl.u32 %v1496_v42, 30  ;;  %v5887_v1 = vshll.u32 %v1547_v40, 8  ;;  %v1285_v20 = vadd.s32 1, %v5875_v19  ;;  %v4445_v16 = vadd.s32 4294967169, %v5814_v36 }
 0x491   :  { %v1554_v12 = vsub.s32 32, %v1553_v8  ;;  %vm1284_vm9 = vc.u32 %v5880_v60, %v5874_v47  ;;  %v1556_v0 = vshll.u32 %v5014_v26, %v1553_v8  ;;  %v1559_v10 = vshll.u32 %v5015_v28, %v1553_v8 }
 0x492   :  { %v1498_v23 = vshll.u32 %v5882_v21, 30  ;;  %vm1571_vm10 = vcmp.lt.s32.totalorder %v1552_v33, 1  ;;  %v1286_v15 = vsel %vm1284_vm9, %v1285_v20, %v5875_v19  ;;  %v1562_v37 = vshll.u32 %v5016_v30, %v1553_v8 }
 0x493   :  { %v1557_v40 = vshrl.u32 %v5015_v28, %v1554_v12  ;;  %v1287_v48 = vadd.s32 %v1286_v15, %v1282_v24  ;;  %v1560_v61 = vshrl.u32 %v5016_v30, %v1554_v12  ;;  %v1563_v36 = vshrl.u32 %v5017_v32, %v1554_v12 }
 0x494   :  { %v5896_v14 = vsub.s32 %v1495_v7, %v1498_v23  ;;  %v1565_v22 = vshll.u32 %v5017_v32, %v1553_v8  ;;  %v1566_v6 = vshrl.u32 %v5018_v34, %v1554_v12  ;;  %v1568_v43 = vshll.u32 %v5018_v34, %v1553_v8 }
 0x495   :  { %v1558_v63 = vor.u32 %v1557_v40, %v1556_v0  ;;  %v1288_v45 = vadd.s32 536870912, %v1287_v48  ;;  %v1561_v49 = vor.u32 %v1560_v61, %v1559_v10  ;;  %v1564_v39 = vor.u32 %v1563_v36, %v1562_v37 }
 0x496   :  { %v1501_v31 = vsub.s32 0, %v5896_v14  ;;  %v1569_v2 = vshrl.u32 %v5019_v41, %v1554_v12  ;;  %v1567_v13 = vor.u32 %v1566_v6, %v1565_v22  ;;  %vm1572_vm12 = vcmp.lt.s32.totalorder %v1552_v33, 2 }
 0x497   :  { %vm1573_vm13 = vcmp.lt.s32.totalorder %v1552_v33, 3  ;;  %vm1574_vm14 = vcmp.lt.s32.totalorder %v1552_v33, 4  ;;  %v5908_v59 = vshrl.u32 %v1288_v45, 30  ;;  %v1579_v27 = vsel %vm1571_vm10, %v1558_v63, %v1561_v49 }
 0x498   :  { %v1570_v11 = vor.u32 %v1569_v2, %v1568_v43  ;;  %v1576_v58 = vsel %vm1574_vm14, %v1564_v39, 2102212464  ;;  %v1555_v7 = vshrl.u32 %v5014_v26, %v1554_v12  ;;  %v1580_v38 = vsel %vm1574_vm14, %v1567_v13, 920167782 }
 0x499   :  { %v1583_v18 = vsel %vm1571_vm10, %v1561_v49, %v1564_v39  ;;  %v1341_v9 = vadd.s32 1, %v4445_v16  ;;  %v4450_v44 = vmin.u32 %v1501_v31, %v5896_v14  ;;  %v1290_v3 = vshll.u32 %v5908_v59, 30 }
 0x49a   :  { %v1581_v53 = vsel %vm1573_vm13, %v1564_v39, %v1580_v38  ;;  %v1584_v46 = vsel %vm1574_vm14, %v1570_v11, 1326507024  ;;  %v1575_v42 = vsel %vm1571_vm10, %v1555_v7, %v1558_v63  ;;  %v1577_v62 = vsel %vm1573_vm13, %v1561_v49, %v1576_v58 }
 0x49b   :  { %v1582_v19 = vsel %vm1572_vm12, %v1579_v27, %v1581_v53  ;;  %v1585_v54 = vsel %vm1573_vm13, %v1567_v13, %v1584_v46  ;;  %v5920_v8 = vsub.s32 %v1287_v48, %v1290_v3  ;;  %vm1342_vm0 = vcmp.gt.s32.totalorder %v1341_v9, 0 }
 0x49c   :  { %v1586_v24 = vsel %vm1572_vm12, %v1583_v18, %v1585_v54  ;;  %v5924_v23 = vmul.u32.u64.low %v5887_v1, %v1582_v19  ;;  %v5925_v20 = vmul.u32.u64.high %v5887_v1, %v1582_v19, %v5924_v23  ;;  %v1578_v10 = vsel %vm1572_vm12, %v1575_v42, %v1577_v62 }
 0x49d   :  { %v5929_v12 = vmul.u32.u64.low %v5887_v1, %v1586_v24  ;;  %v5930_v16 = vmul.u32.u64.high %v5887_v1, %v1586_v24, %v5929_v12  ;;  %v1293_v0 = vsub.s32 0, %v5920_v8  ;;  %v1343_v15 = vsel %vm1342_vm0, %v1341_v9, 0 }
 0x49e   :  { %v1331_v40 = vand.u32 2147483647, %v5792_v50  ;;  %v1503_v37 = vclz %v4450_v44  ;;  %v1597_v61 = vadd.s32 1, %v5925_v20  ;;  %v1345_v36 = vand.u32 31, %v1343_v15 }
 0x49f   :  { %v4442_v48 = vmin.u32 %v1293_v0, %v5920_v8  ;;  %v1594_v22 = vmul.u32 %v5887_v1, %v1578_v10  ;;  %vm1596_vm1 = vc.u32 %v5930_v16, %v5924_v23  ;;  %v1344_v27 = vshrl.u32 %v1343_v15, 5 }
 0x4a0   :  { %v1598_v63 = vsel %vm1596_vm1, %v1597_v61, %v5925_v20  ;;  %v1346_v6 = vsub.s32 32, %v1345_v36  ;;  %v4451_v43 = vadd.s32 4294967294, %v1503_v37  ;;  %v1338_v45 = vand.u32 8388607, %v1331_v40 }
 0x4a1   :  { %v1295_v31 = vclz %v4442_v48  ;;  %v1599_v33 = vadd.s32 %v1598_v63, %v1594_v22  ;;  %v1348_v7 = vshll.u32 %v5014_v26, %v1345_v36  ;;  %v1351_v18 = vshll.u32 %v5015_v28, %v1345_v36 }
 0x4a2   :  { %v1349_v2 = vshrl.u32 %v5015_v28, %v1346_v6  ;;  %v1352_v1 = vshrl.u32 %v5016_v30, %v1346_v6  ;;  %v1355_v11 = vshrl.u32 %v5017_v32, %v1346_v6  ;;  %vm4452_vm3 = vcmp.lt.s32.totalorder %v4451_v43, 0 }
 0x4a3   :  { %v1600_v49 = vadd.s32 536870912, %v1599_v33  ;;  %v4443_v39 = vadd.s32 4294967294, %v1295_v31  ;;  %v1339_v58 = vor.u32 8388608, %v1338_v45  ;;  %v1354_v9 = vshll.u32 %v5016_v30, %v1345_v36 }
 0x4a4   :  { %v1358_v44 = vshrl.u32 %v5018_v34, %v1346_v6  ;;  %v1350_v3 = vor.u32 %v1349_v2, %v1348_v7  ;;  %v1357_v53 = vshll.u32 %v5017_v32, %v1345_v36  ;;  %v1361_v46 = vshrl.u32 %v5019_v41, %v1346_v6 }
 0x4a5   :  { %v5944_v13 = vshrl.u32 %v1600_v49, 30  ;;  %vm4444_vm4 = vcmp.lt.s32.totalorder %v4443_v39, 0  ;;  %v1353_v62 = vor.u32 %v1352_v1, %v1351_v18  ;;  %v1356_v19 = vor.u32 %v1355_v11, %v1354_v9 }
 0x4a6   :  { %v1360_v54 = vshll.u32 %v5018_v34, %v1345_v36  ;;  %v1359_v24 = vor.u32 %v1358_v44, %v1357_v53  ;;  %v1298_v20 = vsel %vm4444_vm4, 0, %v4443_v39  ;;  %v5960_v10 = vsel %vm4452_vm3, 0, %v4451_v43 }
 0x4a7   :  { %v1602_v38 = vshll.u32 %v5944_v13, 30  ;;  %vm1363_vm5 = vcmp.lt.s32.totalorder %v1344_v27, 1  ;;  %vm1366_vm6 = vcmp.lt.s32.totalorder %v1344_v27, 4  ;;  %v1379_v15 = vshll.u32 %v1339_v58, 8 }
 0x4a8   :  { %v1362_v0 = vor.u32 %v1361_v46, %v1360_v54  ;;  %v1347_v48 = vshrl.u32 %v5014_v26, %v1346_v6  ;;  %v1368_v61 = vsel %vm1366_vm6, %v1356_v19, 2102212464  ;;  %v1371_v22 = vsel %vm1363_vm5, %v1350_v3, %v1353_v62 }
 0x4a9   :  { %v5955_v42 = vsub.s32 %v1599_v33, %v1602_v38  ;;  %v1303_v31 = vsub.s32 4294967266, %v1298_v20  ;;  %vm1364_vm8 = vcmp.lt.s32.totalorder %v1344_v27, 2  ;;  %vm1365_vm7 = vcmp.lt.s32.totalorder %v1344_v27, 3 }
 0x4aa   :  { %v1372_v36 = vsel %vm1366_vm6, %v1359_v24, 920167782  ;;  %v1375_v45 = vsel %vm1363_vm5, %v1353_v62, %v1356_v19  ;;  %v1376_v49 = vsel %vm1366_vm6, %v1362_v0, 1326507024  ;;  %v1367_v39 = vsel %vm1363_vm5, %v1347_v48, %v1350_v3 }
 0x4ab   :  { %v1605_v12 = vsub.s32 0, %v5955_v42  ;;  %v1373_v33 = vsel %vm1365_vm7, %v1356_v19, %v1372_v36  ;;  %v1369_v43 = vsel %vm1365_vm7, %v1353_v62, %v1368_v61  ;;  %v1377_v1 = vsel %vm1365_vm7, %v1359_v24, %v1376_v49 }
 0x4ac   :  { %v1374_v2 = vsel %vm1364_vm8, %v1371_v22, %v1373_v33  ;;  %v1378_v58 = vsel %vm1364_vm8, %v1375_v45, %v1377_v1  ;;  %v1511_v9 = vsub.s32 4294967266, %v5960_v10  ;;  %v1370_v3 = vsel %vm1364_vm8, %v1367_v39, %v1369_v43 }
 0x4ad   :  { %v4454_v37 = vmin.u32 %v1605_v12, %v5955_v42  ;;  %v5966_v7 = vmul.u32.u64.low %v1379_v15, %v1374_v2  ;;  %v5967_v6 = vmul.u32.u64.high %v1379_v15, %v1374_v2, %v5966_v7  ;;  %v1304_v53 = vadd.s32 127, %v1303_v31 }
 0x4ae   :  { %v5970_v38 = vmul.u32.u64.low %v1379_v15, %v1378_v58  ;;  %v5971_v18 = vmul.u32.u64.high %v1379_v15, %v1378_v58, %v5970_v38  ;;  %v1299_v19 = vsub.s32 32, %v1298_v20  ;;  %v1386_v24 = vmul.u32 %v1379_v15, %v1370_v3 }
 0x4af   :  { %v1607_v63 = vclz %v4454_v37  ;;  %v1389_v62 = vadd.s32 1, %v5967_v6  ;;  %v1512_v12 = vadd.s32 127, %v1511_v9  ;;  %v1283_v37 = vadd.s32 %v5874_v47, %v5880_v60 }
 0x4b0   :  { %vm1388_vm10 = vc.u32 %v5971_v18, %v5966_v7  ;;  %v1305_v48 = vshll.u32 %v1304_v53, 23  ;;  %v1507_v22 = vsub.s32 32, %v5960_v10  ;;  %v1595_v36 = vadd.s32 %v5924_v23, %v5930_v16 }
 0x4b1   :  { %v4455_v11 = vadd.s32 4294967294, %v1607_v63  ;;  %v1390_v0 = vsel %vm1388_vm10, %v1389_v62, %v5967_v6  ;;  %v1301_v31 = vshrl.u32 %v1283_v37, %v1299_v19  ;;  %v1491_v15 = vadd.s32 %v5845_v4, %v5842_v56 }
 0x4b2   :  { %v1391_v27 = vadd.s32 %v1390_v0, %v1386_v24  ;;  %v1513_v45 = vshll.u32 %v1512_v12, 23  ;;  %v1300_v49 = vshll.u32 %v5920_v8, %v1298_v20  ;;  %v1306_v39 = vor.u32 4788187, %v1305_v48 }
 0x4b3   :  { %vm4456_vm9 = vcmp.lt.s32.totalorder %v4455_v11, 0  ;;  %v1509_v60 = vshrl.u32 %v1491_v15, %v1507_v22  ;;  %v1508_v23 = vshll.u32 %v5896_v14, %v5960_v10  ;;  %vm1229_vm13 = vcmp.lt.s32.totalorder %v5778_v17, 0 }
 0x4b4   :  { %v1610_v44 = vsel %vm4456_vm9, 0, %v4455_v11  ;;  %v1392_v33 = vadd.s32 536870912, %v1391_v27  ;;  %v1302_v2 = vor.u32 %v1301_v31, %v1300_v49  ;;  %v1514_v16 = vor.u32 4788187, %v1513_v45 }
 0x4b5   :  { %v1615_v46 = vsub.s32 4294967266, %v1610_v44  ;;  %v1611_v61 = vsub.s32 32, %v1610_v44  ;;  %v1612_v1 = vshll.u32 %v5955_v42, %v1610_v44  ;;  %v1307_v6 = vand.u32 2147483647, %v1306_v39 }
 0x4b6   :  { %v5987_v47 = vshrl.u32 %v1392_v33, 30  ;;  %v1510_v38 = vor.u32 %v1509_v60, %v1508_v23  ;;  %v1309_v8 = vcvt.s32.f32 %v1302_v2  ;;  %v1515_v3 = vand.u32 2147483647, %v1514_v16 }
 0x4b7   :  { %v1616_v54 = vadd.s32 127, %v1615_v46  ;;  %v1613_v43 = vshrl.u32 %v1595_v36, %v1611_v61  ;;  %v1387_v48 = vadd.s32 %v5966_v7, %v5971_v18  ;;  %vm6000_vm14 = vcmp.le.f32.partialorder %v1227_v51, 0.7853982 }
 0x4b8   :  { %v1394_v58 = vshll.u32 %v5987_v47, 30  ;;  %v1310_v53 = vmul.f32 %v1309_v8, %v1307_v6  ;;  %v1517_v19 = vcvt.s32.f32 %v1510_v38  ;;  %vm1541_vm0 = vcmp.lt.s32.totalorder %v5782_v29, 0 }
 0x4b9   :  { %v1617_v63 = vshll.u32 %v1616_v54, 23  ;;  %v1614_v56 = vor.u32 %v1613_v43, %v1612_v1  ;;  %vm1437_vm1 = vcmp.lt.s32.totalorder %v5776_v35, 0  ;;  %vm6015_vm3 = vcmp.le.f32.partialorder %v1539_v52, 0.7853982 }
 0x4ba   :  { %v1395_v4 = vsub.s32 %v1391_v27, %v1394_v58  ;;  %v1518_v54 = vmul.f32 %v1517_v19, %v1515_v3  ;;  %v1311_v24 = vxor.u32 2147483648, %v1310_v53  ;;  %vm6024_vm4 = vcmp.le.f32.partialorder %v1435_v57, 0.7853982 }
 0x4bb   :  { %v1618_v11 = vor.u32 4788187, %v1617_v63  ;;  %v1621_v46 = vcvt.s32.f32 %v1614_v56  ;;  %v1313_v60 = vsub.s32 4, %v5908_v59  ;;  %v1521_v2 = vsub.s32 4, %v5882_v21 }
 0x4bc   :  { %v1397_v9 = vsub.s32 0, %v1395_v4  ;;  %v1519_v14 = vxor.u32 2147483648, %v1518_v54  ;;  %v1312_v37 = vsel %vm1229_vm13, %v1311_v24, %v1310_v53  ;;  %v1625_v1 = vsub.s32 4, %v5944_v13 }
 0x4bd   :  { %v1619_v20 = vand.u32 2147483647, %v1618_v11  ;;  %v1315_v7 = vsel %vm6000_vm14, %v5778_v17, %v1312_v37  ;;  %v1314_v23 = vsel %vm1229_vm13, %v1313_v60, %v5908_v59  ;;  %v1417_v16 = vsub.s32 4, %v5987_v47 }
 0x4be   :  { %v4446_v62 = vmin.u32 %v1397_v9, %v1395_v4  ;;  %v1520_v51 = vsel %vm1437_vm1, %v1519_v14, %v1518_v54  ;;  %4915 = vcosq.f32 %v1315_v7  ;;  %v1522_v6 = vsel %vm1437_vm1, %v1521_v2, %v5882_v21 }
 0x4bf   :  { %v1622_v42 = vmul.f32 %v1621_v46, %v1619_v20  ;;  %v1523_v52 = vsel %vm6024_vm4, %v5776_v35, %v1520_v51  ;;  %4917 = vsinq.f32 %v1315_v7  ;;  %v1626_v56 = vsel %vm1541_vm0, %v1625_v1, %v5944_v13 }
 0x4c0   :  { %v1399_v44 = vclz %v4446_v62  ;;  %vm6046_vm5 = vcmp.le.f32.partialorder %v1331_v40, 0.7853982  ;;  %vm1333_vm6 = vcmp.lt.s32.totalorder %v5792_v50, 0  ;;  %v1316_v59 = vsel %vm6000_vm14, 0, %v1314_v23 }
 0x4c1   :  { %v1623_v0 = vxor.u32 2147483648, %v1622_v42  ;;  %v1418_v20 = vsel %vm1333_vm6, %v1417_v16, %v5987_v47  ;;  %v1524_v21 = vsel %vm6024_vm4, 0, %v1522_v6  ;;  %v1628_v13 = vsel %vm6015_vm3, 0, %v1626_v56 }
 0x4c2   :  { %v4447_v12 = vadd.s32 4294967294, %v1399_v44  ;;  %v1320_v3 = vadd.s32 3, %v1316_v59  ;;  %v1420_v46 = vsel %vm6046_vm5, 0, %v1418_v20  ;;  %v1528_v62 = vadd.s32 3, %v1524_v21 }
 0x4c3   :  { %v1624_v31 = vsel %vm1541_vm0, %v1623_v0, %v1622_v42  ;;  %v1632_v47 = vadd.s32 3, %v1628_v13  ;;  %v1424_v24 = vadd.s32 3, %v1420_v46  ;;  %vm1319_vm4 = vweird.f32 %v5778_v17  ;;  %v4874_v17 = vld [vmem:[%s7508_s3 + $0x18] sm:$0xff]  }
 0x4c4   :  { %vm4448_vm12 = vcmp.lt.s32.totalorder %v4447_v12, 0  ;;  %v1627_v49 = vsel %vm6015_vm3, %v5782_v29, %v1624_v31  ;;  %v1321_v54 = vand.u32 3, %v1320_v3  ;;  %v1529_v0 = vand.u32 3, %v1528_v62 }
 0x4c5   :  { %v1402_v10 = vsel %vm4448_vm12, 0, %v4447_v12  ;;  %4919 = vcosq.f32 %v1627_v49  ;;  %v1633_v14 = vand.u32 3, %v1632_v47  ;;  %v1425_v22 = vand.u32 3, %v1424_v24 }
 0x4c6   :  { %v1403_v61 = vsub.s32 32, %v1402_v10  ;;  %v1407_v27 = vsub.s32 4294967266, %v1402_v10  ;;  %v1404_v36 = vshll.u32 %v1395_v4, %v1402_v10  ;;  %4921 = vsinq.f32 %v1627_v49 }
 0x4c7   :  { %4923 = vsinq.f32 %v1523_v52  ;;  %vm1323_vm8 = vcmp.eq.s32.totalorder %v1321_v54, 0  ;;  %vm1326_vm7 = vcmp.eq.s32.totalorder %v1321_v54, 2  ;;  %vm1531_vm9 = vcmp.eq.s32.totalorder %v1529_v0, 0 }
 0x4c8   :  { %v1405_v63 = vshrl.u32 %v1387_v48, %v1403_v61  ;;  %v1408_v33 = vadd.s32 127, %v1407_v27  ;;  %4925 = vcosq.f32 %v1523_v52  ;;  %v4916_v9 = vpop.eup %4915  ;;  %vm1635_vm10 = vcmp.eq.s32.totalorder %v1633_v14, 0 }
 0x4c9   :  { %v4918_v53 = vpop.eup %4917  ;;  %v1327_v37 = vxor.u32 2147483648, %v4916_v9  ;;  %vm1638_vm12 = vcmp.eq.s32.totalorder %v1633_v14, 2  ;;  %vm1322_vm13 = vcmp.lt.s32.totalorder %v1321_v54, 2  ;;  %vm1534_vm14 = vcmp.eq.s32.totalorder %v1529_v0, 2 }
 0x4ca   :  { %v1406_v15 = vor.u32 %v1405_v63, %v1404_v36  ;;  %v1409_v45 = vshll.u32 %v1408_v33, 23  ;;  %v1324_v10 = vxor.u32 2147483648, %v4918_v53  ;;  %vm1430_vm0 = vcmp.eq.s32.totalorder %v1425_v22, 2 }
 0x4cb   :  { %v1328_v33 = vsel %vm1326_vm7, %v1327_v37, %v4918_v53  ;;  %vm1634_vm1 = vcmp.lt.s32.totalorder %v1633_v14, 2  ;;  %vm1427_vm3 = vcmp.eq.s32.totalorder %v1425_v22, 0  ;;  %vm1631_vm7 = vweird.f32 %v5782_v29  ;;  %v1653_v29 = vpop.permute.xlu0 %1652 }
 0x4cc   :  { %v1410_v43 = vor.u32 4788187, %v1409_v45  ;;  %v1413_v58 = vcvt.s32.f32 %v1406_v15  ;;  %v1325_v63 = vsel %vm1323_vm8, %v4916_v9, %v1324_v10  ;;  %vm1423_vm8 = vweird.f32 %v5792_v50 }
 0x4ce   :  { %v1411_v11 = vand.u32 2147483647, %v1410_v43  ;;  %v1329_v43 = vsel %vm1322_vm13, %v1325_v63, %v1328_v33 }
 0x4cf   :  { %v4920_v19 = vpop.eup %4919 }
 0x4d0   :  { %v1414_v57 = vmul.f32 %v1413_v58, %v1411_v11  ;;  %v4922_v42 = vpop.eup %4921  ;;  %v1639_v61 = vxor.u32 2147483648, %v4920_v19  ;;  %v1330_v58 = vsel %vm1319_vm4, nan, %v1329_v43 }
 0x4d1   :  { %v4924_v44 = vpop.eup %4923  ;;  %v1636_v48 = vxor.u32 2147483648, %v4922_v42 }
 0x4d2   :  { %v1415_v4 = vxor.u32 2147483648, %v1414_v57  ;;  %v4926_v12 = vpop.eup %4925  ;;  %v1532_v27 = vxor.u32 2147483648, %v4924_v44  ;;  %v1640_v51 = vsel %vm1638_vm12, %v1639_v61, %v4922_v42 }
 0x4d3   :  { %v1535_v31 = vxor.u32 2147483648, %v4926_v12  ;;  %v1637_v7 = vsel %vm1635_vm10, %v4920_v19, %v1636_v48 }
 0x4d4   :  { %v1416_v8 = vsel %vm1333_vm6, %v1415_v4, %v1414_v57  ;;  %v1533_v45 = vsel %vm1531_vm9, %v4926_v12, %v1532_v27  ;;  %v1641_v52 = vsel %vm1634_vm1, %v1637_v7, %v1640_v51  ;;  %vm1530_vm6 = vcmp.lt.s32.totalorder %v1529_v0, 2 }
 0x4d5   :  { %v1419_v40 = vsel %vm6046_vm5, %v5792_v50, %v1416_v8  ;;  %v1536_v39 = vsel %vm1534_vm14, %v1535_v31, %v4924_v44  ;;  %vm1426_vm5 = vcmp.lt.s32.totalorder %v1425_v22, 2  ;;  %v1642_v23 = vsel %vm1631_vm7, nan, %v1641_v52  ;;  %v1648_v50 = vpop.permute.xlu1 %1647 }
 0x4d6   :  { %4927 = vcosq.f32 %v1419_v40  ;;  %v1537_v11 = vsel %vm1530_vm6, %v1533_v45, %v1536_v39  ;;  %vm1527_vm9 = vweird.f32 %v5776_v35  ;;  %v1663_v35 = vpop.permute.xlu0 %1662 }
 0x4d7   :  { %4929 = vsinq.f32 %v1419_v40  ;;  %v1538_v6 = vsel %vm1527_vm9, nan, %v1537_v11 }
 0x4d8   :  { %v1644_v56 = vpack.c.bf16 %v1642_v23, %v1538_v6 }
 0x4d9   :  { %v1658_v4 = vpop.permute.xlu1 %1657 }
 0x4e0   :  { %v4928_v36 = vpop.eup %4927 }
 0x4e1   :  { %v4930_v18 = vpop.eup %4929  ;;  %v1431_v15 = vxor.u32 2147483648, %v4928_v36 }
 0x4e2   :  { %v1428_v49 = vxor.u32 2147483648, %v4930_v18 }
 0x4e3   :  { %v1432_v60 = vsel %vm1430_vm0, %v1431_v15, %v4930_v18 }
 0x4e4   :  { %v1429_v2 = vsel %vm1427_vm3, %v4928_v36, %v1428_v49 }
 0x4e5   :  { %v1433_v1 = vsel %vm1426_vm5, %v1429_v2, %v1432_v60 }
 0x4e6   :  { %v1434_v57 = vsel %vm1423_vm8, nan, %v1433_v1 }
 0x4e7   :  { %v1643_v16 = vpack.c.bf16 %v1434_v57, %v1330_v58 }
 0x4e9   :  { %4667 = vmatprep.subr.bf16.mxu0 %v1643_v16 }
 0x4ea   :  { %4668 = vmatpush3.bf16.msra.mxu0 %v1643_v16 }
 0x4eb   :  { %4669 = vmatprep.subr.bf16.mxu0 %v1644_v56 }
 0x4ee   :  { %4670 = vmatpush3.bf16.msra.mxu0 %v1644_v56 }
 0x4f1   :  { %4672 = vmatmul.mubr.msk.bf16.vlgmr.msra.gmra.mrb[8].mxu0 %vm590_vm15, %v4874_v17 }
 0x5c4   :  { %v4673_v38 = vpop.f32.mrb[8].mxu0 }
 0x5c5   :  { %v6071_v59 = vadd.f32 %v4673_v38, %v1658_v4  ;;  %v1715_v8 = vpop.f32.mrb[9].mxu0 }
 0x5c6   :  { %v6073_v20 = vadd.f32 %v1715_v8, %v1648_v50  ;;  %v4674_v21 = vpop.f32.mrb[10].mxu0 }
 0x5c7   :  { %v1938_v13 = vand.u32 2147483647, %v6071_v59  ;;  %v1941_v40 = vand.u32 2139095040, %v6071_v59  ;;  %v6077_v9 = vadd.f32 %v4674_v21, %v1663_v35  ;;  %v1718_v3 = vpop.f32.mrb[11].mxu0 }
 0x5c8   :  { %v1730_v53 = vand.u32 2147483647, %v6073_v20  ;;  %v1733_v46 = vand.u32 2139095040, %v6073_v20  ;;  %v6092_v7 = vadd.f32 %v1718_v3, %v1653_v29 }
 0x5c9   :  { %v1942_v62 = vshrl.u32 %v1941_v40, 23  ;;  %v1945_v47 = vand.u32 8388607, %v1938_v13  ;;  %v2045_v44 = vand.u32 2139095040, %v6077_v9 }
 0x5ca   :  { %v1734_v19 = vshrl.u32 %v1733_v46, 23  ;;  %v1737_v42 = vand.u32 8388607, %v1730_v53 }
 0x5cb   :  { %v4469_v54 = vadd.s32 4294967169, %v1942_v62  ;;  %v2046_v12 = vshrl.u32 %v2045_v44, 23  ;;  %v1946_v14 = vor.u32 8388608, %v1945_v47 }
 0x5cc   :  { %v4461_v24 = vadd.s32 4294967169, %v1734_v19  ;;  %v1738_v10 = vor.u32 8388608, %v1737_v42 }
 0x5cd   :  { %v1948_v0 = vadd.s32 1, %v4469_v54  ;;  %v4473_v48 = vadd.s32 4294967169, %v2046_v12  ;;  %v6086_v36 = vshll.u32 %v1946_v14, 8 }
 0x5ce   :  { %v1740_v37 = vadd.s32 1, %v4461_v24  ;;  %v6088_v63 = vshll.u32 %v1738_v10, 8 }
 0x5cf   :  { %vm1949_vm10 = vcmp.gt.s32.totalorder %v1948_v0, 0  ;;  %v6090_v33 = vadd.s32 1, %v4473_v48 }
 0x5d0   :  { %v1950_v61 = vsel %vm1949_vm10, %v1948_v0, 0  ;;  %vm1741_vm12 = vcmp.gt.s32.totalorder %v1740_v37, 0 }
 0x5d1   :  { %v1951_v27 = vshrl.u32 %v1950_v61, 5  ;;  %v1952_v22 = vand.u32 31, %v1950_v61  ;;  %v1742_v31 = vsel %vm1741_vm12, %v1740_v37, 0  ;;  %vm2053_vm3 = vcmp.gt.s32.totalorder %v6090_v33, 0 }
 0x5d2   :  { %v6095_v15 = vshrl.u32 %v1742_v31, 5  ;;  %v1744_v45 = vand.u32 31, %v1742_v31 }
 0x5d3   :  { %v1953_v51 = vsub.s32 32, %v1952_v22  ;;  %v1955_v18 = vshll.u32 %v5014_v26, %v1952_v22  ;;  %v1958_v49 = vshll.u32 %v5015_v28, %v1952_v22  ;;  %v1961_v39 = vshll.u32 %v5016_v30, %v1952_v22 }
 0x5d4   :  { %v1964_v43 = vshll.u32 %v5017_v32, %v1952_v22  ;;  %v1967_v60 = vshll.u32 %v5018_v34, %v1952_v22  ;;  %vm1970_vm13 = vcmp.lt.s32.totalorder %v1951_v27, 1  ;;  %vm1971_vm14 = vcmp.lt.s32.totalorder %v1951_v27, 2 }
 0x5d5   :  { %v1956_v52 = vshrl.u32 %v5015_v28, %v1953_v51  ;;  %v1959_v2 = vshrl.u32 %v5016_v30, %v1953_v51  ;;  %v1962_v1 = vshrl.u32 %v5017_v32, %v1953_v51  ;;  %v1954_v11 = vshrl.u32 %v5014_v26, %v1953_v51 }
 0x5d6   :  { %v1965_v58 = vshrl.u32 %v5018_v34, %v1953_v51  ;;  %v1968_v57 = vshrl.u32 %v5019_v41, %v1953_v51  ;;  %v1745_v56 = vsub.s32 32, %v1744_v45  ;;  %vm1972_vm0 = vcmp.lt.s32.totalorder %v1951_v27, 3 }
 0x5d7   :  { %v1957_v23 = vor.u32 %v1956_v52, %v1955_v18  ;;  %v1960_v16 = vor.u32 %v1959_v2, %v1958_v49  ;;  %v1963_v6 = vor.u32 %v1962_v1, %v1961_v39  ;;  %vm1973_vm1 = vcmp.lt.s32.totalorder %v1951_v27, 4 }
 0x5d8   :  { %v1966_v17 = vor.u32 %v1965_v58, %v1964_v43  ;;  %v1969_v50 = vor.u32 %v1968_v57, %v1967_v60  ;;  %v1747_v3 = vshll.u32 %v5014_v26, %v1744_v45  ;;  %v1748_v47 = vshrl.u32 %v5015_v28, %v1745_v56 }
 0x5d9   :  { %v1974_v29 = vsel %vm1970_vm13, %v1954_v11, %v1957_v23  ;;  %v1975_v4 = vsel %vm1973_vm1, %v1963_v6, 2102212464  ;;  %v1978_v38 = vsel %vm1970_vm13, %v1957_v23, %v1960_v16  ;;  %v1982_v8 = vsel %vm1970_vm13, %v1960_v16, %v1963_v6 }
 0x5da   :  { %v1976_v35 = vsel %vm1972_vm0, %v1960_v16, %v1975_v4  ;;  %v1979_v21 = vsel %vm1973_vm1, %v1966_v17, 920167782  ;;  %v1983_v40 = vsel %vm1973_vm1, %v1969_v50, 1326507024  ;;  %v1750_v19 = vshll.u32 %v5015_v28, %v1744_v45 }
 0x5db   :  { %v1980_v46 = vsel %vm1972_vm0, %v1963_v6, %v1979_v21  ;;  %v1984_v62 = vsel %vm1972_vm0, %v1966_v17, %v1983_v40  ;;  %v1977_v42 = vsel %vm1971_vm14, %v1974_v29, %v1976_v35  ;;  %v1751_v24 = vshrl.u32 %v5016_v30, %v1745_v56 }
 0x5dc   :  { %v1981_v44 = vsel %vm1971_vm14, %v1978_v38, %v1980_v46  ;;  %v1985_v54 = vsel %vm1971_vm14, %v1982_v8, %v1984_v62  ;;  %v1749_v37 = vor.u32 %v1748_v47, %v1747_v3  ;;  %v1753_v61 = vshll.u32 %v5016_v30, %v1744_v45 }
 0x5dd   :  { %v6119_v12 = vmul.u32.u64.low %v6086_v36, %v1985_v54  ;;  %v6120_v0 = vmul.u32.u64.high %v6086_v36, %v1985_v54, %v6119_v12  ;;  %v6123_v14 = vmul.u32.u64.low %v6086_v36, %v1981_v44  ;;  %v6124_v10 = vmul.u32.u64.high %v6086_v36, %v1981_v44, %v6123_v14 }
 0x5de   :  { %v1752_v48 = vor.u32 %v1751_v24, %v1750_v19  ;;  %v1754_v22 = vshrl.u32 %v5017_v32, %v1745_v56  ;;  %v1746_v27 = vshrl.u32 %v5014_v26, %v1745_v56  ;;  %v1756_v31 = vshll.u32 %v5017_v32, %v1744_v45 }
 0x5df   :  { %v1757_v51 = vshrl.u32 %v5018_v34, %v1745_v56  ;;  %v1760_v18 = vshrl.u32 %v5019_v41, %v1745_v56  ;;  %v1993_v49 = vmul.u32 %v6086_v36, %v1977_v42  ;;  %v1759_v43 = vshll.u32 %v5018_v34, %v1744_v45 }
 0x5e0   :  { %v1755_v39 = vor.u32 %v1754_v22, %v1753_v61  ;;  %vm1762_vm4 = vcmp.lt.s32.totalorder %v6095_v15, 1  ;;  %vm1995_vm5 = vc.u32 %v6120_v0, %v6123_v14  ;;  %v1996_v60 = vadd.s32 1, %v6124_v10 }
 0x5e1   :  { %v1758_v52 = vor.u32 %v1757_v51, %v1756_v31  ;;  %vm1763_vm6 = vcmp.lt.s32.totalorder %v6095_v15, 2  ;;  %v1761_v2 = vor.u32 %v1760_v18, %v1759_v43  ;;  %vm1764_vm8 = vcmp.lt.s32.totalorder %v6095_v15, 3 }
 0x5e2   :  { %vm1765_vm7 = vcmp.lt.s32.totalorder %v6095_v15, 4  ;;  %v1770_v1 = vsel %vm1762_vm4, %v1749_v37, %v1752_v48  ;;  %v1997_v36 = vsel %vm1995_vm5, %v1996_v60, %v6124_v10  ;;  %v1774_v58 = vsel %vm1762_vm4, %v1752_v48, %v1755_v39 }
 0x5e3   :  { %v1767_v11 = vsel %vm1765_vm7, %v1755_v39, 2102212464  ;;  %v1771_v45 = vsel %vm1765_vm7, %v1758_v52, 920167782  ;;  %v1998_v57 = vadd.s32 %v1997_v36, %v1993_v49  ;;  %v1766_v23 = vsel %vm1762_vm4, %v1746_v27, %v1749_v37 }
 0x5e4   :  { %v1772_v16 = vsel %vm1764_vm8, %v1755_v39, %v1771_v45  ;;  %v1775_v6 = vsel %vm1765_vm7, %v1761_v2, 1326507024  ;;  %v1768_v56 = vsel %vm1764_vm8, %v1752_v48, %v1767_v11  ;;  %v2054_v29 = vsel %vm2053_vm3, %v6090_v33, 0 }
 0x5e5   :  { %v1773_v17 = vsel %vm1763_vm6, %v1770_v1, %v1772_v16  ;;  %v1776_v50 = vsel %vm1764_vm8, %v1758_v52, %v1775_v6  ;;  %v1999_v35 = vadd.s32 536870912, %v1998_v57  ;;  %v1769_v3 = vsel %vm1763_vm6, %v1766_v23, %v1768_v56 }
 0x5e6   :  { %v1777_v4 = vsel %vm1763_vm6, %v1774_v58, %v1776_v50  ;;  %v6151_v38 = vmul.u32.u64.low %v6088_v63, %v1773_v17  ;;  %v6152_v8 = vmul.u32.u64.high %v6088_v63, %v1773_v17, %v6151_v38  ;;  %v2042_v46 = vand.u32 2147483647, %v6077_v9 }
 0x5e7   :  { %v6156_v21 = vmul.u32.u64.low %v6088_v63, %v1777_v4  ;;  %v6157_v40 = vmul.u32.u64.high %v6088_v63, %v1777_v4, %v6156_v21  ;;  %v2056_v62 = vand.u32 31, %v2054_v29  ;;  %v1837_v33 = vand.u32 2139095040, %v6092_v7 }
 0x5e8   :  { %v1788_v47 = vadd.s32 1, %v6152_v8  ;;  %v6164_v42 = vshrl.u32 %v1999_v35, 30  ;;  %v1785_v44 = vmul.u32 %v6088_v63, %v1769_v3  ;;  %v2049_v15 = vand.u32 8388607, %v2042_v46 }
 0x5e9   :  { %v2057_v19 = vsub.s32 32, %v2056_v62  ;;  %vm1787_vm9 = vc.u32 %v6157_v40, %v6151_v38  ;;  %v1838_v24 = vshrl.u32 %v1837_v33, 23  ;;  %v2059_v10 = vshll.u32 %v5014_v26, %v2056_v62 }
 0x5ea   :  { %v1789_v54 = vsel %vm1787_vm9, %v1788_v47, %v6152_v8  ;;  %v2055_v61 = vshrl.u32 %v2054_v29, 5  ;;  %v2062_v22 = vshll.u32 %v5015_v28, %v2056_v62  ;;  %v2065_v63 = vshll.u32 %v5016_v30, %v2056_v62 }
 0x5eb   :  { %v1790_v12 = vadd.s32 %v1789_v54, %v1785_v44  ;;  %v2060_v37 = vshrl.u32 %v5015_v28, %v2057_v19  ;;  %v2063_v48 = vshrl.u32 %v5016_v30, %v2057_v19  ;;  %v2066_v27 = vshrl.u32 %v5017_v32, %v2057_v19 }
 0x5ec   :  { %v2001_v31 = vshll.u32 %v6164_v42, 30  ;;  %v2068_v43 = vshll.u32 %v5017_v32, %v2056_v62  ;;  %v2069_v60 = vshrl.u32 %v5018_v34, %v2057_v19  ;;  %v2071_v2 = vshll.u32 %v5018_v34, %v2056_v62 }
 0x5ed   :  { %v1791_v51 = vadd.s32 536870912, %v1790_v12  ;;  %v2061_v18 = vor.u32 %v2060_v37, %v2059_v10  ;;  %v2064_v49 = vor.u32 %v2063_v48, %v2062_v22  ;;  %v2067_v39 = vor.u32 %v2066_v27, %v2065_v63 }
 0x5ee   :  { %v2072_v1 = vshrl.u32 %v5019_v41, %v2057_v19  ;;  %v4465_v36 = vadd.s32 4294967169, %v1838_v24  ;;  %v2050_v11 = vor.u32 8388608, %v2049_v15  ;;  %v2070_v45 = vor.u32 %v2069_v60, %v2068_v43 }
 0x5ef   :  { %v6181_v52 = vshrl.u32 %v1791_v51, 30  ;;  %vm2074_vm10 = vcmp.lt.s32.totalorder %v2055_v61, 1  ;;  %vm2076_vm12 = vcmp.lt.s32.totalorder %v2055_v61, 3  ;;  %vm2077_vm13 = vcmp.lt.s32.totalorder %v2055_v61, 4 }
 0x5f0   :  { %v2073_v23 = vor.u32 %v2072_v1, %v2071_v2  ;;  %v6186_v16 = vsub.s32 %v1998_v57, %v2001_v31  ;;  %v2082_v6 = vsel %vm2074_vm10, %v2061_v18, %v2064_v49  ;;  %v2083_v56 = vsel %vm2077_vm13, %v2070_v45, 920167782 }
 0x5f1   :  { %v1793_v58 = vshll.u32 %v6181_v52, 30  ;;  %v2086_v17 = vsel %vm2074_vm10, %v2064_v49, %v2067_v39  ;;  %v2084_v50 = vsel %vm2076_vm12, %v2067_v39, %v2083_v56  ;;  %v1844_v4 = vadd.s32 1, %v4465_v36 }
 0x5f2   :  { %v2087_v29 = vsel %vm2077_vm13, %v2073_v23, 1326507024  ;;  %v2058_v8 = vshrl.u32 %v5014_v26, %v2057_v19  ;;  %vm2075_vm14 = vcmp.lt.s32.totalorder %v2055_v61, 2  ;;  %v2079_v35 = vsel %vm2077_vm13, %v2067_v39, 2102212464 }
 0x5f3   :  { %v2088_v21 = vsel %vm2076_vm12, %v2070_v45, %v2087_v29  ;;  %v6193_v3 = vsub.s32 %v1790_v12, %v1793_v58  ;;  %v2085_v57 = vsel %vm2075_vm14, %v2082_v6, %v2084_v50  ;;  %v2090_v33 = vshll.u32 %v2050_v11, 8 }
 0x5f4   :  { %v2089_v62 = vsel %vm2075_vm14, %v2086_v17, %v2088_v21  ;;  %v2004_v47 = vsub.s32 0, %v6186_v16  ;;  %v2078_v44 = vsel %vm2074_vm10, %v2058_v8, %v2061_v18  ;;  %v2080_v54 = vsel %vm2076_vm12, %v2064_v49, %v2079_v35 }
 0x5f5   :  { %v6200_v15 = vmul.u32.u64.low %v2090_v33, %v2089_v62  ;;  %v6201_v24 = vmul.u32.u64.high %v2090_v33, %v2089_v62, %v6200_v15  ;;  %vm1845_vm0 = vcmp.gt.s32.totalorder %v1844_v4, 0  ;;  %v1796_v12 = vsub.s32 0, %v6193_v3 }
 0x5f6   :  { %v6203_v19 = vmul.u32.u64.low %v2090_v33, %v2085_v57  ;;  %v6204_v10 = vmul.u32.u64.high %v2090_v33, %v2085_v57, %v6203_v19  ;;  %v1846_v37 = vsel %vm1845_vm0, %v1844_v4, 0  ;;  %v2081_v48 = vsel %vm2075_vm14, %v2078_v44, %v2080_v54 }
 0x5f7   :  { %v1848_v22 = vand.u32 31, %v1846_v37  ;;  %v4470_v63 = vmin.u32 %v2004_v47, %v6186_v16  ;;  %v4462_v31 = vmin.u32 %v1796_v12, %v6193_v3  ;;  %v2097_v51 = vmul.u32 %v2090_v33, %v2081_v48 }
 0x5f8   :  { %vm2099_vm1 = vc.u32 %v6201_v24, %v6203_v19  ;;  %v2100_v27 = vadd.s32 1, %v6204_v10  ;;  %v1834_v49 = vand.u32 2147483647, %v6092_v7  ;;  %v1847_v35 = vshrl.u32 %v1846_v37, 5 }
 0x5f9   :  { %v1849_v39 = vsub.s32 32, %v1848_v22  ;;  %v2006_v43 = vclz %v4470_v63  ;;  %v1798_v61 = vclz %v4462_v31  ;;  %v1851_v56 = vshll.u32 %v5014_v26, %v1848_v22 }
 0x5fa   :  { %v2101_v18 = vsel %vm2099_vm1, %v2100_v27, %v6204_v10  ;;  %v1841_v1 = vand.u32 8388607, %v1834_v49  ;;  %v1854_v17 = vshll.u32 %v5015_v28, %v1848_v22  ;;  %v1860_v50 = vshll.u32 %v5017_v32, %v1848_v22 }
 0x5fb   :  { %v2102_v60 = vadd.s32 %v2101_v18, %v2097_v51  ;;  %v1852_v36 = vshrl.u32 %v5015_v28, %v1849_v39  ;;  %v1855_v11 = vshrl.u32 %v5016_v30, %v1849_v39  ;;  %v4471_v45 = vadd.s32 4294967294, %v2006_v43 }
 0x5fc   :  { %v1858_v23 = vshrl.u32 %v5017_v32, %v1849_v39  ;;  %v1861_v6 = vshrl.u32 %v5018_v34, %v1849_v39  ;;  %v1864_v29 = vshrl.u32 %v5019_v41, %v1849_v39  ;;  %v4463_v4 = vadd.s32 4294967294, %v1798_v61 }
 0x5fd   :  { %v2103_v2 = vadd.s32 536870912, %v2102_v60  ;;  %v1857_v21 = vshll.u32 %v5016_v30, %v1848_v22  ;;  %v1853_v57 = vor.u32 %v1852_v36, %v1851_v56  ;;  %v1856_v62 = vor.u32 %v1855_v11, %v1854_v17 }
 0x5fe   :  { %v1862_v33 = vor.u32 %v1861_v6, %v1860_v50  ;;  %v1863_v47 = vshll.u32 %v5018_v34, %v1848_v22  ;;  %vm4472_vm3 = vcmp.lt.s32.totalorder %v4471_v45, 0  ;;  %v1842_v15 = vor.u32 8388608, %v1841_v1 }
 0x5ff   :  { %v6220_v58 = vshrl.u32 %v2103_v2, 30  ;;  %v1859_v54 = vor.u32 %v1858_v23, %v1857_v21  ;;  %vm4464_vm4 = vcmp.lt.s32.totalorder %v4463_v4, 0  ;;  %vm1866_vm5 = vcmp.lt.s32.totalorder %v1847_v35, 1 }
 0x600   :  { %v1865_v10 = vor.u32 %v1864_v29, %v1863_v47  ;;  %vm1869_vm6 = vcmp.lt.s32.totalorder %v1847_v35, 4  ;;  %v1850_v37 = vshrl.u32 %v5014_v26, %v1849_v39  ;;  %vm1868_vm8 = vcmp.lt.s32.totalorder %v1847_v35, 3 }
 0x601   :  { %v2105_v8 = vshll.u32 %v6220_v58, 30  ;;  %v1874_v48 = vsel %vm1866_vm5, %v1853_v57, %v1856_v62  ;;  %v1875_v63 = vsel %vm1869_vm6, %v1862_v33, 920167782  ;;  %vm1867_vm7 = vcmp.lt.s32.totalorder %v1847_v35, 2 }
 0x602   :  { %v1871_v22 = vsel %vm1869_vm6, %v1859_v54, 2102212464  ;;  %v1876_v31 = vsel %vm1868_vm8, %v1859_v54, %v1875_v63  ;;  %v1878_v18 = vsel %vm1866_vm5, %v1856_v62, %v1859_v54  ;;  %v1879_v43 = vsel %vm1869_vm6, %v1865_v10, 1326507024 }
 0x603   :  { %v6231_v44 = vsub.s32 %v2102_v60, %v2105_v8  ;;  %v1877_v51 = vsel %vm1867_vm7, %v1874_v48, %v1876_v31  ;;  %v1882_v60 = vshll.u32 %v1842_v15, 8  ;;  %v1801_v61 = vsel %vm4464_vm4, 0, %v4463_v4 }
 0x604   :  { %v1870_v39 = vsel %vm1866_vm5, %v1850_v37, %v1853_v57  ;;  %v1880_v1 = vsel %vm1868_vm8, %v1862_v33, %v1879_v43  ;;  %v1872_v36 = vsel %vm1868_vm8, %v1856_v62, %v1871_v22  ;;  %v2009_v29 = vsel %vm4472_vm3, 0, %v4471_v45 }
 0x605   :  { %v2108_v12 = vsub.s32 0, %v6231_v44  ;;  %v1881_v11 = vsel %vm1867_vm7, %v1878_v18, %v1880_v1  ;;  %v6242_v23 = vmul.u32.u64.low %v1882_v60, %v1877_v51  ;;  %v6243_v6 = vmul.u32.u64.high %v1882_v60, %v1877_v51, %v6242_v23 }
 0x606   :  { %v6245_v17 = vmul.u32.u64.low %v1882_v60, %v1881_v11  ;;  %v6246_v50 = vmul.u32.u64.high %v1882_v60, %v1881_v11, %v6245_v17  ;;  %v1806_v8 = vsub.s32 4294967266, %v1801_v61  ;;  %v1873_v4 = vsel %vm1867_vm7, %v1870_v39, %v1872_v36 }
 0x607   :  { %v4474_v27 = vmin.u32 %v2108_v12, %v6231_v44  ;;  %v1892_v57 = vadd.s32 1, %v6243_v6  ;;  %v2014_v33 = vsub.s32 4294967266, %v2009_v29  ;;  %v1889_v54 = vmul.u32 %v1882_v60, %v1873_v4 }
 0x608   :  { %v1807_v47 = vadd.s32 127, %v1806_v8  ;;  %vm1891_vm10 = vc.u32 %v6246_v50, %v6242_v23  ;;  %v1802_v10 = vsub.s32 32, %v1801_v61  ;;  %v1786_v45 = vadd.s32 %v6151_v38, %v6157_v40 }
 0x609   :  { %v2110_v2 = vclz %v4474_v27  ;;  %v1893_v15 = vsel %vm1891_vm10, %v1892_v57, %v6243_v6  ;;  %v2015_v48 = vadd.s32 127, %v2014_v33  ;;  %v2010_v22 = vsub.s32 32, %v2009_v29 }
 0x60a   :  { %v1894_v37 = vadd.s32 %v1893_v15, %v1889_v54  ;;  %v1808_v35 = vshll.u32 %v1807_v47, 23  ;;  %v1804_v31 = vshrl.u32 %v1786_v45, %v1802_v10  ;;  %v2098_v51 = vadd.s32 %v6203_v19, %v6201_v24 }
 0x60b   :  { %v4475_v56 = vadd.s32 4294967294, %v2110_v2  ;;  %v1994_v60 = vadd.s32 %v6123_v14, %v6120_v0  ;;  %v2016_v2 = vshll.u32 %v2015_v48, 23  ;;  %v1803_v39 = vshll.u32 %v6193_v3, %v1801_v61 }
 0x60c   :  { %v1895_v27 = vadd.s32 536870912, %v1894_v37  ;;  %v1809_v1 = vor.u32 4788187, %v1808_v35  ;;  %v2011_v24 = vshll.u32 %v6186_v16, %v2009_v29  ;;  %v1890_v29 = vadd.s32 %v6242_v23, %v6246_v50 }
 0x60d   :  { %vm4476_vm9 = vcmp.lt.s32.totalorder %v4475_v56, 0  ;;  %v2012_v40 = vshrl.u32 %v1994_v60, %v2010_v22  ;;  %v1805_v11 = vor.u32 %v1804_v31, %v1803_v39  ;;  %v2017_v19 = vor.u32 4788187, %v2016_v2 }
 0x60e   :  { %v2113_v21 = vsel %vm4476_vm9, 0, %v4475_v56  ;;  %v6257_v43 = vshrl.u32 %v1895_v27, 30  ;;  %v1810_v8 = vand.u32 2147483647, %v1809_v1  ;;  %vm1732_vm13 = vcmp.lt.s32.totalorder %v6073_v20, 0 }
 0x60f   :  { %v2118_v62 = vsub.s32 4294967266, %v2113_v21  ;;  %v2114_v63 = vsub.s32 32, %v2113_v21  ;;  %v2115_v6 = vshll.u32 %v6231_v44, %v2113_v21  ;;  %v2013_v0 = vor.u32 %v2012_v40, %v2011_v24 }
 0x610   :  { %v1897_v38 = vshll.u32 %v6257_v43, 30  ;;  %v1812_v14 = vcvt.s32.f32 %v1805_v11  ;;  %v2018_v61 = vand.u32 2147483647, %v2017_v19  ;;  %vm2044_vm14 = vcmp.lt.s32.totalorder %v6077_v9, 0 }
 0x611   :  { %v2119_v12 = vadd.s32 127, %v2118_v62  ;;  %v2116_v36 = vshrl.u32 %v2098_v51, %v2114_v63  ;;  %v2020_v15 = vcvt.s32.f32 %v2013_v0  ;;  %vm6272_vm0 = vcmp.le.f32.partialorder %v1730_v53, 0.7853982 }
 0x612   :  { %v1898_v17 = vsub.s32 %v1894_v37, %v1897_v38  ;;  %v1813_v62 = vmul.f32 %v1812_v14, %v1810_v8  ;;  %vm1940_vm1 = vcmp.lt.s32.totalorder %v6071_v59, 0  ;;  %vm6286_vm3 = vcmp.le.f32.partialorder %v2042_v46, 0.7853982 }
 0x613   :  { %v2120_v18 = vshll.u32 %v2119_v12, 23  ;;  %v2117_v4 = vor.u32 %v2116_v36, %v2115_v6  ;;  %v2021_v44 = vmul.f32 %v2020_v15, %v2018_v61  ;;  %vm6292_vm4 = vcmp.le.f32.partialorder %v1938_v13, 0.7853982 }
 0x614   :  { %v1900_v57 = vsub.s32 0, %v1898_v17  ;;  %v1814_v21 = vxor.u32 2147483648, %v1813_v62  ;;  %v1816_v36 = vsub.s32 4, %v6181_v52  ;;  %v2024_v40 = vsub.s32 4, %v6164_v42 }
 0x615   :  { %v2121_v56 = vor.u32 4788187, %v2120_v18  ;;  %v2124_v47 = vcvt.s32.f32 %v2117_v4  ;;  %v2022_v35 = vxor.u32 2147483648, %v2021_v44  ;;  %v2128_v13 = vsub.s32 4, %v6220_v58 }
 0x616   :  { %v4466_v3 = vmin.u32 %v1900_v57, %v1898_v17  ;;  %v1815_v63 = vsel %vm1732_vm13, %v1814_v21, %v1813_v62  ;;  %v1817_v24 = vsel %vm1732_vm13, %v1816_v36, %v6181_v52  ;;  %v2025_v19 = vsel %vm1940_vm1, %v2024_v40, %v6164_v42 }
 0x617   :  { %v2122_v33 = vand.u32 2147483647, %v2121_v56  ;;  %v1818_v60 = vsel %vm6272_vm0, %v6073_v20, %v1815_v63  ;;  %v2023_v2 = vsel %vm1940_vm1, %v2022_v35, %v2021_v44  ;;  %v2129_v4 = vsel %vm2044_vm14, %v2128_v13, %v6220_v58 }
 0x618   :  { %v1902_v54 = vclz %v4466_v3  ;;  %4931 = vcosq.f32 %v1818_v60  ;;  %v2026_v6 = vsel %vm6292_vm4, %v6071_v59, %v2023_v2  ;;  %vm1836_vm5 = vcmp.lt.s32.totalorder %v6092_v7, 0 }
 0x619   :  { %v2125_v10 = vmul.f32 %v2124_v47, %v2122_v33  ;;  %4933 = vsinq.f32 %v1818_v60  ;;  %v1819_v57 = vsel %vm6272_vm0, 0, %v1817_v24  ;;  %vm1835_vm6 = vcmp.le.f32.partialorder %v1834_v49, 0.7853982 }
 0x61a   :  { %v4467_v12 = vadd.s32 4294967294, %v1902_v54  ;;  %v2027_v42 = vsel %vm6292_vm4, 0, %v2025_v19  ;;  %v2131_v33 = vsel %vm6286_vm3, 0, %v2129_v4  ;;  %v1823_v58 = vadd.s32 3, %v1819_v57 }
 0x61b   :  { %v2126_v16 = vxor.u32 2147483648, %v2125_v10  ;;  %v2031_v62 = vadd.s32 3, %v2027_v42  ;;  %v2135_v54 = vadd.s32 3, %v2131_v33  ;;  %v4876_v33 = vld [vmem:[%s7504_s1 + $0x28] sm:$0xff]  }
 0x61c   :  { %vm4468_vm12 = vcmp.lt.s32.totalorder %v4467_v12, 0 }
 0x61d   :  { %v1905_v37 = vsel %vm4468_vm12, 0, %v4467_v12  ;;  %v2127_v23 = vsel %vm2044_vm14, %v2126_v16, %v2125_v10 }
 0x61e   :  { %v1906_v48 = vsub.s32 32, %v1905_v37  ;;  %v1910_v45 = vsub.s32 4294967266, %v1905_v37  ;;  %v1907_v27 = vshll.u32 %v1898_v17, %v1905_v37  ;;  %v2130_v38 = vsel %vm6286_vm3, %v6077_v9, %v2127_v23 }
 0x61f   :  { %4935 = vcosq.f32 %v2130_v38  ;;  %v1920_v17 = vsub.s32 4, %v6257_v43  ;;  %v2032_v37 = vand.u32 3, %v2031_v62 }
 0x620   :  { %v1908_v22 = vshrl.u32 %v1890_v29, %v1906_v48  ;;  %v1911_v31 = vadd.s32 127, %v1910_v45  ;;  %4937 = vsinq.f32 %v2130_v38  ;;  %v2136_v29 = vand.u32 3, %v2135_v54 }
 0x621   :  { %4939 = vsinq.f32 %v2026_v6  ;;  %v1921_v0 = vsel %vm1836_vm5, %v1920_v17, %v6257_v43  ;;  %v1824_v43 = vand.u32 3, %v1823_v58  ;;  %vm2034_vm10 = vcmp.eq.s32.totalorder %v2032_v37, 0 }
 0x622   :  { %v1909_v50 = vor.u32 %v1908_v22, %v1907_v27  ;;  %v1912_v18 = vshll.u32 %v1911_v31, 23  ;;  %4941 = vcosq.f32 %v2026_v6  ;;  %v1923_v3 = vsel %vm1835_vm6, 0, %v1921_v0  ;;  %v4932_v61 = vpop.eup %4931 }
 0x623   :  { %v4934_v47 = vpop.eup %4933  ;;  %v1927_v15 = vadd.s32 3, %v1923_v3  ;;  %v1830_v21 = vxor.u32 2147483648, %v4932_v61  ;;  %vm1825_vm8 = vcmp.lt.s32.totalorder %v1824_v43, 2  ;;  %vm1826_vm7 = vcmp.eq.s32.totalorder %v1824_v43, 0 }
 0x624   :  { %v1913_v39 = vor.u32 4788187, %v1912_v18  ;;  %v1916_v11 = vcvt.s32.f32 %v1909_v50  ;;  %v1827_v44 = vxor.u32 2147483648, %v4934_v47  ;;  %vm1829_vm9 = vcmp.eq.s32.totalorder %v1824_v43, 2 }
 0x625   :  { %v1928_v48 = vand.u32 3, %v1927_v15  ;;  %v1831_v31 = vsel %vm1829_vm9, %v1830_v21, %v4934_v47  ;;  %vm2037_vm12 = vcmp.eq.s32.totalorder %v2032_v37, 2  ;;  %vm2138_vm13 = vcmp.eq.s32.totalorder %v2136_v29, 0 }
 0x626   :  { %v1914_v46 = vand.u32 2147483647, %v1913_v39  ;;  %v1828_v22 = vsel %vm1826_vm7, %v4932_v61, %v1827_v44  ;;  %vm2141_vm14 = vcmp.eq.s32.totalorder %v2136_v29, 2  ;;  %vm2137_vm4 = vcmp.lt.s32.totalorder %v2136_v29, 2 }
 0x627   :  { %vm1933_vm0 = vcmp.eq.s32.totalorder %v1928_v48, 2  ;;  %v1832_v53 = vsel %vm1825_vm8, %v1828_v22, %v1831_v31  ;;  %vm1930_vm1 = vcmp.eq.s32.totalorder %v1928_v48, 0  ;;  %vm1929_vm3 = vcmp.lt.s32.totalorder %v1928_v48, 2 }
 0x628   :  { %v1917_v56 = vmul.f32 %v1916_v11, %v1914_v46  ;;  %vm2033_vm7 = vcmp.lt.s32.totalorder %v2032_v37, 2  ;;  %vm2134_vm8 = vweird.f32 %v6077_v9  ;;  %vm2030_vm9 = vweird.f32 %v6071_v59  ;;  %v2151_v9 = vpop.permute.xlu1 %2150 }
 0x629   :  { %v4936_v49 = vpop.eup %4935 }
 0x62a   :  { %v1918_v8 = vxor.u32 2147483648, %v1917_v56  ;;  %v4938_v10 = vpop.eup %4937  ;;  %v2142_v35 = vxor.u32 2147483648, %v4936_v49 }
 0x62b   :  { %v4940_v12 = vpop.eup %4939  ;;  %v2139_v45 = vxor.u32 2147483648, %v4938_v10 }
 0x62c   :  { %v1919_v52 = vsel %vm1836_vm5, %v1918_v8, %v1917_v56  ;;  %v4942_v16 = vpop.eup %4941  ;;  %v2035_v63 = vxor.u32 2147483648, %v4940_v12  ;;  %v2143_v2 = vsel %vm2141_vm14, %v2142_v35, %v4938_v10  ;;  %vm1822_vm5 = vweird.f32 %v6073_v20  ;;  %v4435_v20 = vld [vmem:[%s7509_s5 + $0x2] sm:$0x3]  ;;  %v2232_v58 = vpop.permute.xlu1 %2231 }
 0x62d   :  { %v1922_v14 = vsel %vm1835_vm6, %v6092_v7, %v1919_v52  ;;  %v2038_v51 = vxor.u32 2147483648, %v4942_v16  ;;  %v2140_v60 = vsel %vm2138_vm13, %v4936_v49, %v2139_v45  ;;  %vm1926_vm6 = vweird.f32 %v6092_v7  ;;  %v4875_v7 = vld [vmem:[%s7504_s1 + $0x20] sm:$0xff]  }
 0x62e   :  { %4943 = vcosq.f32 %v1922_v14  ;;  %v2036_v1 = vsel %vm2034_vm10, %v4942_v16, %v2035_v63  ;;  %v2144_v46 = vsel %vm2137_vm4, %v2140_v60, %v2143_v2  ;;  %v1833_v11 = vsel %vm1822_vm5, nan, %v1832_v53  ;;  %4685 = vmatprep.mubr.msk.bf16.mxu0 %vm79_vm2, %v4875_v7 }
 0x62f   :  { %4945 = vsinq.f32 %v1922_v14  ;;  %v2039_v38 = vsel %vm2037_vm12, %v2038_v51, %v4940_v12  ;;  %v2145_v17 = vsel %vm2134_vm8, nan, %v2144_v46 }
 0x630   :  { %v2040_v56 = vsel %vm2033_vm7, %v2036_v1, %v2039_v38  ;;  %v2242_v54 = vpop.permute.xlu1 %2241  ;;  %v4877_v38 = vld [vmem:[%s7508_s3 + $0x20] sm:$0xff]  }
 0x631   :  { %v2041_v24 = vsel %vm2030_vm9, nan, %v2040_v56 }
 0x632   :  { %v2147_v19 = vpack.c.bf16 %v2145_v17, %v2041_v24 }
 0x638   :  { %v4944_v27 = vpop.eup %4943 }
 0x639   :  { %v4946_v23 = vpop.eup %4945  ;;  %v1934_v50 = vxor.u32 2147483648, %v4944_v27 }
 0x63a   :  { %v1931_v18 = vxor.u32 2147483648, %v4946_v23 }
 0x63b   :  { %v1935_v39 = vsel %vm1933_vm0, %v1934_v50, %v4946_v23 }
 0x63c   :  { %v1932_v36 = vsel %vm1930_vm1, %v4944_v27, %v1931_v18 }
 0x63d   :  { %v1936_v40 = vsel %vm1929_vm3, %v1932_v36, %v1935_v39 }
 0x63e   :  { %v1937_v6 = vsel %vm1926_vm6, nan, %v1936_v40 }
 0x63f   :  { %v2146_v13 = vpack.c.bf16 %v1937_v6, %v1833_v11 }
 0x641   :  { %4676 = vmatpush3.bf16.msra.mxu1 %v2146_v13 }
 0x642   :  { %4677 = vmatprep.subr.bf16.mxu1 %v5020_v55 }
 0x645   :  { %4678 = vmatpush3.bf16.msra.mxu1 %v2147_v19 }
 0x648   :  { %4680 = vmatmul.mubr.msk.bf16.vlgmr.msra.gmra.mrb[8].mxu1 %vm590_vm15, %v4435_v20 }
 0x649   :  { %4693 = vmatprep.mubr.msk.bf16.mxu1 %vm590_vm15, %v4877_v38 }
 0x71b   :  { %v2190_v8 = vpop.f32.mrb[8].mxu1 }
 0x71c   :  { %v2191_v59 = vadd.f32 %v2190_v8, %v2151_v9  ;;  %v4681_v4 = vpop.f32.mrb[9].mxu1 }
 0x71d   :  { %v2193_v57 = vpop.f32.mrb[10].mxu1 }
 0x71e   :  { %v6341_v52 = vadd.f32 %v2191_v59, %v5761_v25  ;;  %4478 = vst [vmem:[%s7510_s8 + $0x4] sm:$0x7] %v2191_v59  ;;  %v4682_v0 = vpop.f32.mrb[11].mxu1  ;;  %v2227_v25 = vpop.permute.xlu0 %2226 }
 0x720   :  { %v2223_v42 = vpack.c.bf16 %v6341_v52, %v6341_v52 }
 0x722   :  { %v2261_v14 = vand.u32 %v2223_v42, %v5073_v5  ;;  %v2237_v3 = vpop.permute.xlu0 %2236 }
 0x724   :  { %4683 = vmatprep.subr.bf16.mxu0 %v2261_v14 }
 0x725   :  { %4684 = vmatpush3.bf16.msra.mxu0 %v2261_v14 }
 0x726   :  { %4697 = vmatprep.subr.bf16.mxu0 %v5020_v55 }
 0x728   :  { %4686 = vmatmul.mubr.msk.bf16.vlgmr.msra.gmra.mrb[12].mxu0 %vm79_vm2, %v4876_v33 }
 0x729   :  { %4701 = vmatprep.mubr.msk.bf16.mxu0 %vm5021_vm11, %v5020_v55 }
 0x7fb   :  { %v4687_v61 = vpop.f32.mrb[12].mxu0 }
 0x7fc   :  { %v6356_v62 = vadd.f32 %v4687_v61, %v2237_v3  ;;  %v2297_v47 = vpop.f32.mrb[13].mxu0 }
 0x7fd   :  { %v6358_v49 = vadd.f32 %v2297_v47, %v2227_v25  ;;  %v4688_v15 = vpop.f32.mrb[14].mxu0 }
 0x7fe   :  { %v2520_v10 = vand.u32 2147483647, %v6356_v62  ;;  %v2523_v43 = vand.u32 2139095040, %v6356_v62  ;;  %v6362_v12 = vadd.f32 %v4688_v15, %v2242_v54  ;;  %v2300_v44 = vpop.f32.mrb[15].mxu0 }
 0x7ff   :  { %v2312_v21 = vand.u32 2147483647, %v6358_v49  ;;  %v2315_v37 = vand.u32 2139095040, %v6358_v49  ;;  %v6372_v22 = vadd.f32 %v2300_v44, %v2232_v58 }
 0x800   :  { %v2524_v16 = vshrl.u32 %v2523_v43, 23  ;;  %v2527_v29 = vand.u32 8388607, %v2520_v10  ;;  %v2627_v35 = vand.u32 2139095040, %v6362_v12  ;;  %v2624_v27 = vand.u32 2147483647, %v6362_v12 }
 0x801   :  { %v2316_v48 = vshrl.u32 %v2315_v37, 23  ;;  %v2319_v45 = vand.u32 8388607, %v2312_v21  ;;  %v2419_v39 = vand.u32 2139095040, %v6372_v22 }
 0x802   :  { %v4509_v63 = vadd.s32 4294967169, %v2524_v16  ;;  %v2528_v31 = vor.u32 8388608, %v2527_v29  ;;  %v2628_v23 = vshrl.u32 %v2627_v35, 23  ;;  %v6376_v53 = vand.u32 8388607, %v2624_v27 }
 0x803   :  { %v4501_v51 = vadd.s32 4294967169, %v2316_v48  ;;  %v2320_v18 = vor.u32 8388608, %v2319_v45  ;;  %v6394_v9 = vshrl.u32 %v2419_v39, 23 }
 0x804   :  { %v2530_v50 = vadd.s32 1, %v4509_v63  ;;  %v4513_v2 = vadd.s32 4294967169, %v2628_v23  ;;  %v6379_v36 = vshll.u32 %v2528_v31, 8  ;;  %v2632_v17 = vor.u32 8388608, %v6376_v53 }
 0x805   :  { %v2322_v60 = vadd.s32 1, %v4501_v51  ;;  %v6384_v6 = vshll.u32 %v2320_v18, 8 }
 0x806   :  { %vm2531_vm10 = vcmp.gt.s32.totalorder %v2530_v50, 0  ;;  %v6389_v24 = vadd.s32 1, %v4513_v2 }
 0x807   :  { %v2532_v1 = vsel %vm2531_vm10, %v2530_v50, 0  ;;  %vm2323_vm12 = vcmp.gt.s32.totalorder %v2322_v60, 0 }
 0x808   :  { %v2533_v40 = vshrl.u32 %v2532_v1, 5  ;;  %v2534_v46 = vand.u32 31, %v2532_v1  ;;  %v2324_v11 = vsel %vm2323_vm12, %v2322_v60, 0  ;;  %vm2635_vm3 = vcmp.gt.s32.totalorder %v6389_v24, 0 }
 0x809   :  { %v6386_v13 = vshrl.u32 %v2324_v11, 5  ;;  %v2326_v56 = vand.u32 31, %v2324_v11 }
 0x80a   :  { %v2535_v19 = vsub.s32 32, %v2534_v46  ;;  %v2537_v20 = vshll.u32 %v5014_v26, %v2534_v46  ;;  %v2540_v7 = vshll.u32 %v5015_v28, %v2534_v46  ;;  %v2543_v8 = vshll.u32 %v5016_v30, %v2534_v46 }
 0x80b   :  { %v2546_v59 = vshll.u32 %v5017_v32, %v2534_v46  ;;  %v2549_v4 = vshll.u32 %v5018_v34, %v2534_v46  ;;  %vm2552_vm13 = vcmp.lt.s32.totalorder %v2533_v40, 1  ;;  %vm2553_vm14 = vcmp.lt.s32.totalorder %v2533_v40, 2 }
 0x80c   :  { %v2538_v57 = vshrl.u32 %v5015_v28, %v2535_v19  ;;  %v2541_v0 = vshrl.u32 %v5016_v30, %v2535_v19  ;;  %v2544_v42 = vshrl.u32 %v5017_v32, %v2535_v19  ;;  %v2536_v14 = vshrl.u32 %v5014_v26, %v2535_v19 }
 0x80d   :  { %v2547_v33 = vshrl.u32 %v5018_v34, %v2535_v19  ;;  %v2550_v25 = vshrl.u32 %v5019_v41, %v2535_v19  ;;  %vm2554_vm0 = vcmp.lt.s32.totalorder %v2533_v40, 3  ;;  %v2327_v47 = vsub.s32 32, %v2326_v56 }
 0x80e   :  { %v2539_v58 = vor.u32 %v2538_v57, %v2537_v20  ;;  %v2542_v3 = vor.u32 %v2541_v0, %v2540_v7  ;;  %v2545_v61 = vor.u32 %v2544_v42, %v2543_v8  ;;  %vm2555_vm1 = vcmp.lt.s32.totalorder %v2533_v40, 4 }
 0x80f   :  { %v2548_v54 = vor.u32 %v2547_v33, %v2546_v59  ;;  %v2551_v15 = vor.u32 %v2550_v25, %v2549_v4  ;;  %v2329_v43 = vshll.u32 %v5014_v26, %v2326_v56  ;;  %v2332_v63 = vshll.u32 %v5015_v28, %v2326_v56 }
 0x810   :  { %v2556_v44 = vsel %vm2552_vm13, %v2536_v14, %v2539_v58  ;;  %v2557_v37 = vsel %vm2555_vm1, %v2545_v61, 2102212464  ;;  %v2560_v16 = vsel %vm2552_vm13, %v2539_v58, %v2542_v3  ;;  %v2564_v29 = vsel %vm2552_vm13, %v2542_v3, %v2545_v61 }
 0x811   :  { %v2558_v48 = vsel %vm2554_vm0, %v2542_v3, %v2557_v37  ;;  %v2561_v45 = vsel %vm2555_vm1, %v2548_v54, 920167782  ;;  %v2565_v35 = vsel %vm2555_vm1, %v2551_v15, 1326507024  ;;  %v2328_v23 = vshrl.u32 %v5014_v26, %v2327_v47 }
 0x812   :  { %v2562_v31 = vsel %vm2554_vm0, %v2545_v61, %v2561_v45  ;;  %v2566_v51 = vsel %vm2554_vm0, %v2548_v54, %v2565_v35  ;;  %v2330_v50 = vshrl.u32 %v5015_v28, %v2327_v47  ;;  %v2559_v18 = vsel %vm2553_vm14, %v2556_v44, %v2558_v48 }
 0x813   :  { %v2563_v60 = vsel %vm2553_vm14, %v2560_v16, %v2562_v31  ;;  %v2567_v2 = vsel %vm2553_vm14, %v2564_v29, %v2566_v51  ;;  %v2333_v39 = vshrl.u32 %v5016_v30, %v2327_v47  ;;  %v2335_v7 = vshll.u32 %v5016_v30, %v2326_v56 }
 0x814   :  { %v6421_v1 = vmul.u32.u64.low %v6379_v36, %v2567_v2  ;;  %v6422_v38 = vmul.u32.u64.high %v6379_v36, %v2567_v2, %v6421_v1  ;;  %v6425_v46 = vmul.u32.u64.low %v6379_v36, %v2563_v60  ;;  %v6426_v11 = vmul.u32.u64.high %v6379_v36, %v2563_v60, %v6425_v46 }
 0x815   :  { %v2331_v19 = vor.u32 %v2330_v50, %v2329_v43  ;;  %v2334_v20 = vor.u32 %v2333_v39, %v2332_v63  ;;  %v2336_v8 = vshrl.u32 %v5017_v32, %v2327_v47  ;;  %v2575_v40 = vmul.u32 %v6379_v36, %v2559_v18 }
 0x816   :  { %v2338_v59 = vshll.u32 %v5017_v32, %v2326_v56  ;;  %v2339_v4 = vshrl.u32 %v5018_v34, %v2327_v47  ;;  %v2342_v57 = vshrl.u32 %v5019_v41, %v2327_v47  ;;  %v2341_v42 = vshll.u32 %v5018_v34, %v2326_v56 }
 0x817   :  { %v2337_v0 = vor.u32 %v2336_v8, %v2335_v7  ;;  %vm2344_vm4 = vcmp.lt.s32.totalorder %v6386_v13, 1  ;;  %vm2345_vm5 = vcmp.lt.s32.totalorder %v6386_v13, 2  ;;  %vm2577_vm6 = vc.u32 %v6422_v38, %v6425_v46 }
 0x818   :  { %v2578_v14 = vadd.s32 1, %v6426_v11  ;;  %v2340_v33 = vor.u32 %v2339_v4, %v2338_v59  ;;  %vm2346_vm7 = vcmp.lt.s32.totalorder %v6386_v13, 3  ;;  %v2343_v36 = vor.u32 %v2342_v57, %v2341_v42 }
 0x819   :  { %vm2347_vm8 = vcmp.lt.s32.totalorder %v6386_v13, 4  ;;  %v2348_v25 = vsel %vm2344_vm4, %v2328_v23, %v2331_v19  ;;  %v2352_v58 = vsel %vm2344_vm4, %v2331_v19, %v2334_v20  ;;  %v2356_v47 = vsel %vm2344_vm4, %v2334_v20, %v2337_v0 }
 0x81a   :  { %v2579_v3 = vsel %vm2577_vm6, %v2578_v14, %v6426_v11  ;;  %v2349_v56 = vsel %vm2347_vm8, %v2337_v0, 2102212464  ;;  %v2353_v61 = vsel %vm2347_vm8, %v2340_v33, 920167782  ;;  %v2357_v44 = vsel %vm2347_vm8, %v2343_v36, 1326507024 }
 0x81b   :  { %v2580_v54 = vadd.s32 %v2579_v3, %v2575_v40  ;;  %v2350_v15 = vsel %vm2346_vm7, %v2334_v20, %v2349_v56  ;;  %v2354_v43 = vsel %vm2346_vm7, %v2337_v0, %v2353_v61  ;;  %v2358_v29 = vsel %vm2346_vm7, %v2340_v33, %v2357_v44 }
 0x81c   :  { %v2351_v37 = vsel %vm2345_vm5, %v2348_v25, %v2350_v15  ;;  %v2355_v16 = vsel %vm2345_vm5, %v2352_v58, %v2354_v43  ;;  %v2636_v48 = vsel %vm2635_vm3, %v6389_v24, 0  ;;  %v2359_v35 = vsel %vm2345_vm5, %v2356_v47, %v2358_v29 }
 0x81d   :  { %v2581_v45 = vadd.s32 536870912, %v2580_v54  ;;  %v6454_v63 = vmul.u32.u64.low %v6384_v6, %v2355_v16  ;;  %v6455_v31 = vmul.u32.u64.high %v6384_v6, %v2355_v16, %v6454_v63  ;;  %v2637_v50 = vshrl.u32 %v2636_v48, 5 }
 0x81e   :  { %v6459_v51 = vmul.u32.u64.low %v6384_v6, %v2359_v35  ;;  %v6460_v23 = vmul.u32.u64.high %v6384_v6, %v2359_v35, %v6459_v51  ;;  %v2638_v60 = vand.u32 31, %v2636_v48  ;;  %v2367_v2 = vmul.u32 %v6384_v6, %v2351_v37 }
 0x81f   :  { %v6462_v18 = vshrl.u32 %v2581_v45, 30  ;;  %v6467_v24 = vshll.u32 %v2632_v17, 8  ;;  %v2370_v39 = vadd.s32 1, %v6455_v31  ;;  %v4505_v11 = vadd.s32 4294967169, %v6394_v9 }
 0x820   :  { %v2639_v1 = vsub.s32 32, %v2638_v60  ;;  %vm2369_vm9 = vc.u32 %v6460_v23, %v6454_v63  ;;  %v2641_v19 = vshll.u32 %v5014_v26, %v2638_v60  ;;  %v2644_v20 = vshll.u32 %v5015_v28, %v2638_v60 }
 0x821   :  { %v2583_v13 = vshll.u32 %v6462_v18, 30  ;;  %vm2656_vm10 = vcmp.lt.s32.totalorder %v2637_v50, 1  ;;  %v2371_v53 = vsel %vm2369_vm9, %v2370_v39, %v6455_v31  ;;  %v2647_v7 = vshll.u32 %v5016_v30, %v2638_v60 }
 0x822   :  { %v2642_v17 = vshrl.u32 %v5015_v28, %v2639_v1  ;;  %v2372_v8 = vadd.s32 %v2371_v53, %v2367_v2  ;;  %v2645_v40 = vshrl.u32 %v5016_v30, %v2639_v1  ;;  %v2648_v9 = vshrl.u32 %v5017_v32, %v2639_v1 }
 0x823   :  { %v6476_v6 = vsub.s32 %v2580_v54, %v2583_v13  ;;  %v2650_v59 = vshll.u32 %v5017_v32, %v2638_v60  ;;  %v2651_v0 = vshrl.u32 %v5018_v34, %v2639_v1  ;;  %v2653_v42 = vshll.u32 %v5018_v34, %v2638_v60 }
 0x824   :  { %v2643_v57 = vor.u32 %v2642_v17, %v2641_v19  ;;  %v2373_v14 = vadd.s32 536870912, %v2372_v8  ;;  %v2646_v33 = vor.u32 %v2645_v40, %v2644_v20  ;;  %v2649_v36 = vor.u32 %v2648_v9, %v2647_v7 }
 0x825   :  { %v2586_v4 = vsub.s32 0, %v6476_v6  ;;  %v2654_v25 = vshrl.u32 %v5019_v41, %v2639_v1  ;;  %v2652_v58 = vor.u32 %v2651_v0, %v2650_v59  ;;  %vm2657_vm12 = vcmp.lt.s32.totalorder %v2637_v50, 2 }
 0x826   :  { %vm2658_vm13 = vcmp.lt.s32.totalorder %v2637_v50, 3  ;;  %vm2659_vm14 = vcmp.lt.s32.totalorder %v2637_v50, 4  ;;  %v6488_v3 = vshrl.u32 %v2373_v14, 30  ;;  %v2664_v47 = vsel %vm2656_vm10, %v2643_v57, %v2646_v33 }
 0x827   :  { %v2655_v56 = vor.u32 %v2654_v25, %v2653_v42  ;;  %v2661_v61 = vsel %vm2659_vm14, %v2649_v36, 2102212464  ;;  %v2640_v54 = vshrl.u32 %v5014_v26, %v2639_v1  ;;  %v2665_v15 = vsel %vm2659_vm14, %v2652_v58, 920167782 }
 0x828   :  { %v2668_v43 = vsel %vm2656_vm10, %v2646_v33, %v2649_v36  ;;  %v2426_v44 = vadd.s32 1, %v4505_v11  ;;  %v4510_v37 = vmin.u32 %v2586_v4, %v6476_v6  ;;  %v2375_v16 = vshll.u32 %v6488_v3, 30 }
 0x829   :  { %v2666_v29 = vsel %vm2658_vm13, %v2649_v36, %v2665_v15  ;;  %v2669_v48 = vsel %vm2659_vm14, %v2655_v56, 1326507024  ;;  %v2660_v45 = vsel %vm2656_vm10, %v2640_v54, %v2643_v57  ;;  %v2662_v35 = vsel %vm2658_vm13, %v2646_v33, %v2661_v61 }
 0x82a   :  { %v2667_v31 = vsel %vm2657_vm12, %v2664_v47, %v2666_v29  ;;  %v2670_v51 = vsel %vm2658_vm13, %v2652_v58, %v2669_v48  ;;  %v6500_v60 = vsub.s32 %v2372_v8, %v2375_v16  ;;  %vm2427_vm0 = vcmp.gt.s32.totalorder %v2426_v44, 0 }
 0x82b   :  { %v2671_v2 = vsel %vm2657_vm12, %v2668_v43, %v2670_v51  ;;  %v6504_v13 = vmul.u32.u64.low %v6467_v24, %v2667_v31  ;;  %v6505_v39 = vmul.u32.u64.high %v6467_v24, %v2667_v31, %v6504_v13  ;;  %v2663_v20 = vsel %vm2657_vm12, %v2660_v45, %v2662_v35 }
 0x82c   :  { %v6509_v1 = vmul.u32.u64.low %v6467_v24, %v2671_v2  ;;  %v6510_v11 = vmul.u32.u64.high %v6467_v24, %v2671_v2, %v6509_v1  ;;  %v2378_v19 = vsub.s32 0, %v6500_v60  ;;  %v2428_v53 = vsel %vm2427_vm0, %v2426_v44, 0 }
 0x82d   :  { %v2416_v17 = vand.u32 2147483647, %v6372_v22  ;;  %v2588_v7 = vclz %v4510_v37  ;;  %v2682_v40 = vadd.s32 1, %v6505_v39  ;;  %v2430_v9 = vand.u32 31, %v2428_v53 }
 0x82e   :  { %v4502_v8 = vmin.u32 %v2378_v19, %v6500_v60  ;;  %v2679_v59 = vmul.u32 %v6467_v24, %v2663_v20  ;;  %vm2681_vm1 = vc.u32 %v6510_v11, %v6504_v13  ;;  %v2429_v47 = vshrl.u32 %v2428_v53, 5 }
 0x82f   :  { %v2683_v57 = vsel %vm2681_vm1, %v2682_v40, %v6505_v39  ;;  %v2431_v0 = vsub.s32 32, %v2430_v9  ;;  %v4511_v42 = vadd.s32 4294967294, %v2588_v7  ;;  %v2423_v14 = vand.u32 8388607, %v2416_v17 }
 0x830   :  { %v2380_v4 = vclz %v4502_v8  ;;  %v2684_v50 = vadd.s32 %v2683_v57, %v2679_v59  ;;  %v2433_v54 = vshll.u32 %v5014_v26, %v2430_v9  ;;  %v2436_v43 = vshll.u32 %v5015_v28, %v2430_v9 }
 0x831   :  { %v2434_v25 = vshrl.u32 %v5015_v28, %v2431_v0  ;;  %v2437_v24 = vshrl.u32 %v5016_v30, %v2431_v0  ;;  %v2440_v56 = vshrl.u32 %v5017_v32, %v2431_v0  ;;  %vm4512_vm3 = vcmp.lt.s32.totalorder %v4511_v42, 0 }
 0x832   :  { %v2685_v33 = vadd.s32 536870912, %v2684_v50  ;;  %v4503_v36 = vadd.s32 4294967294, %v2380_v4  ;;  %v2424_v61 = vor.u32 8388608, %v2423_v14  ;;  %v2439_v44 = vshll.u32 %v5016_v30, %v2430_v9 }
 0x833   :  { %v2443_v37 = vshrl.u32 %v5018_v34, %v2431_v0  ;;  %v2435_v16 = vor.u32 %v2434_v25, %v2433_v54  ;;  %v2442_v29 = vshll.u32 %v5017_v32, %v2430_v9  ;;  %v2446_v48 = vshrl.u32 %v5019_v41, %v2431_v0 }
 0x834   :  { %v6524_v58 = vshrl.u32 %v2685_v33, 30  ;;  %vm4504_vm4 = vcmp.lt.s32.totalorder %v4503_v36, 0  ;;  %v2438_v35 = vor.u32 %v2437_v24, %v2436_v43  ;;  %v2441_v31 = vor.u32 %v2440_v56, %v2439_v44 }
 0x835   :  { %v2445_v51 = vshll.u32 %v5018_v34, %v2430_v9  ;;  %v2444_v2 = vor.u32 %v2443_v37, %v2442_v29  ;;  %v2383_v39 = vsel %vm4504_vm4, 0, %v4503_v36  ;;  %v6540_v20 = vsel %vm4512_vm3, 0, %v4511_v42 }
 0x836   :  { %v2687_v15 = vshll.u32 %v6524_v58, 30  ;;  %vm2448_vm5 = vcmp.lt.s32.totalorder %v2429_v47, 1  ;;  %vm2451_vm6 = vcmp.lt.s32.totalorder %v2429_v47, 4  ;;  %v2464_v53 = vshll.u32 %v2424_v61, 8 }
 0x837   :  { %v2447_v19 = vor.u32 %v2446_v48, %v2445_v51  ;;  %v2432_v8 = vshrl.u32 %v5014_v26, %v2431_v0  ;;  %v2453_v40 = vsel %vm2451_vm6, %v2441_v31, 2102212464  ;;  %v2456_v59 = vsel %vm2448_vm5, %v2435_v16, %v2438_v35 }
 0x838   :  { %v6535_v45 = vsub.s32 %v2684_v50, %v2687_v15  ;;  %v2388_v4 = vsub.s32 4294967266, %v2383_v39  ;;  %vm2449_vm7 = vcmp.lt.s32.totalorder %v2429_v47, 2  ;;  %vm2450_vm8 = vcmp.lt.s32.totalorder %v2429_v47, 3 }
 0x839   :  { %v2457_v9 = vsel %vm2451_vm6, %v2444_v2, 920167782  ;;  %v2460_v14 = vsel %vm2448_vm5, %v2438_v35, %v2441_v31  ;;  %v2461_v33 = vsel %vm2451_vm6, %v2447_v19, 1326507024  ;;  %v2452_v36 = vsel %vm2448_vm5, %v2432_v8, %v2435_v16 }
 0x83a   :  { %v2690_v1 = vsub.s32 0, %v6535_v45  ;;  %v2458_v50 = vsel %vm2450_vm8, %v2441_v31, %v2457_v9  ;;  %v2454_v42 = vsel %vm2450_vm8, %v2438_v35, %v2453_v40  ;;  %v2462_v24 = vsel %vm2450_vm8, %v2444_v2, %v2461_v33 }
 0x83b   :  { %v2459_v25 = vsel %vm2449_vm7, %v2456_v59, %v2458_v50  ;;  %v2463_v61 = vsel %vm2449_vm7, %v2460_v14, %v2462_v24  ;;  %v2596_v44 = vsub.s32 4294967266, %v6540_v20  ;;  %v2455_v16 = vsel %vm2449_vm7, %v2452_v36, %v2454_v42 }
 0x83c   :  { %v4514_v7 = vmin.u32 %v2690_v1, %v6535_v45  ;;  %v6546_v54 = vmul.u32.u64.low %v2464_v53, %v2459_v25  ;;  %v6547_v0 = vmul.u32.u64.high %v2464_v53, %v2459_v25, %v6546_v54  ;;  %v2389_v29 = vadd.s32 127, %v2388_v4 }
 0x83d   :  { %v6550_v15 = vmul.u32.u64.low %v2464_v53, %v2463_v61  ;;  %v6551_v43 = vmul.u32.u64.high %v2464_v53, %v2463_v61, %v6550_v15  ;;  %v2384_v31 = vsub.s32 32, %v2383_v39  ;;  %v2471_v2 = vmul.u32 %v2464_v53, %v2455_v16 }
 0x83e   :  { %v2692_v57 = vclz %v4514_v7  ;;  %v2474_v35 = vadd.s32 1, %v6547_v0  ;;  %v2597_v1 = vadd.s32 127, %v2596_v44  ;;  %v2368_v7 = vadd.s32 %v6454_v63, %v6460_v23 }
 0x83f   :  { %vm2473_vm10 = vc.u32 %v6551_v43, %v6546_v54  ;;  %v2390_v8 = vshll.u32 %v2389_v29, 23  ;;  %v2592_v59 = vsub.s32 32, %v6540_v20  ;;  %v2680_v9 = vadd.s32 %v6504_v13, %v6510_v11 }
 0x840   :  { %v4515_v56 = vadd.s32 4294967294, %v2692_v57  ;;  %v2475_v19 = vsel %vm2473_vm10, %v2474_v35, %v6547_v0  ;;  %v2386_v4 = vshrl.u32 %v2368_v7, %v2384_v31  ;;  %v2576_v53 = vadd.s32 %v6425_v46, %v6422_v38 }
 0x841   :  { %v2476_v47 = vadd.s32 %v2475_v19, %v2471_v2  ;;  %v2598_v14 = vshll.u32 %v2597_v1, 23  ;;  %v2385_v33 = vshll.u32 %v6500_v60, %v2383_v39  ;;  %v2391_v36 = vor.u32 4788187, %v2390_v8 }
 0x842   :  { %vm4516_vm9 = vcmp.lt.s32.totalorder %v4515_v56, 0  ;;  %v2594_v23 = vshrl.u32 %v2576_v53, %v2592_v59  ;;  %v2593_v13 = vshll.u32 %v6476_v6, %v6540_v20  ;;  %vm2314_vm13 = vcmp.lt.s32.totalorder %v6358_v49, 0 }
 0x843   :  { %v2695_v37 = vsel %vm4516_vm9, 0, %v4515_v56  ;;  %v2477_v50 = vadd.s32 536870912, %v2476_v47  ;;  %v2387_v25 = vor.u32 %v2386_v4, %v2385_v33  ;;  %v2599_v11 = vor.u32 4788187, %v2598_v14 }
 0x844   :  { %v2700_v48 = vsub.s32 4294967266, %v2695_v37  ;;  %v2696_v40 = vsub.s32 32, %v2695_v37  ;;  %v2697_v24 = vshll.u32 %v6535_v45, %v2695_v37  ;;  %v2392_v0 = vand.u32 2147483647, %v2391_v36 }
 0x845   :  { %v6567_v63 = vshrl.u32 %v2477_v50, 30  ;;  %v2595_v15 = vor.u32 %v2594_v23, %v2593_v13  ;;  %v2394_v60 = vcvt.s32.f32 %v2387_v25  ;;  %v2600_v16 = vand.u32 2147483647, %v2599_v11 }
 0x846   :  { %v2701_v51 = vadd.s32 127, %v2700_v48  ;;  %v2698_v42 = vshrl.u32 %v2680_v9, %v2696_v40  ;;  %v2472_v8 = vadd.s32 %v6546_v54, %v6551_v43  ;;  %vm6580_vm14 = vcmp.le.f32.partialorder %v2312_v21, 0.7853982 }
 0x847   :  { %v2479_v61 = vshll.u32 %v6567_v63, 30  ;;  %v2395_v29 = vmul.f32 %v2394_v60, %v2392_v0  ;;  %v2602_v31 = vcvt.s32.f32 %v2595_v15  ;;  %vm2626_vm0 = vcmp.lt.s32.totalorder %v6362_v12, 0 }
 0x848   :  { %v2702_v57 = vshll.u32 %v2701_v51, 23  ;;  %v2699_v38 = vor.u32 %v2698_v42, %v2697_v24  ;;  %vm2522_vm1 = vcmp.lt.s32.totalorder %v6356_v62, 0  ;;  %vm6595_vm3 = vcmp.le.f32.partialorder %v2624_v27, 0.7853982 }
 0x849   :  { %v2480_v46 = vsub.s32 %v2476_v47, %v2479_v61  ;;  %v2603_v51 = vmul.f32 %v2602_v31, %v2600_v16  ;;  %v2396_v2 = vxor.u32 2147483648, %v2395_v29  ;;  %vm6604_vm4 = vcmp.le.f32.partialorder %v2520_v10, 0.7853982 }
 0x84a   :  { %v2703_v56 = vor.u32 4788187, %v2702_v57  ;;  %v2706_v48 = vcvt.s32.f32 %v2699_v38  ;;  %v2398_v23 = vsub.s32 4, %v6488_v3  ;;  %v2606_v25 = vsub.s32 4, %v6462_v18 }
 0x84b   :  { %v2482_v44 = vsub.s32 0, %v2480_v46  ;;  %v2604_v6 = vxor.u32 2147483648, %v2603_v51  ;;  %v2397_v7 = vsel %vm2314_vm13, %v2396_v2, %v2395_v29  ;;  %v2710_v24 = vsub.s32 4, %v6524_v58 }
 0x84c   :  { %v2704_v39 = vand.u32 2147483647, %v2703_v56  ;;  %v2400_v54 = vsel %vm6580_vm14, %v6358_v49, %v2397_v7  ;;  %v2399_v13 = vsel %vm2314_vm13, %v2398_v23, %v6488_v3  ;;  %v2502_v11 = vsub.s32 4, %v6567_v63 }
 0x84d   :  { %v4506_v35 = vmin.u32 %v2482_v44, %v2480_v46  ;;  %v2605_v21 = vsel %vm2522_vm1, %v2604_v6, %v2603_v51  ;;  %4947 = vcosq.f32 %v2400_v54  ;;  %v2607_v0 = vsel %vm2522_vm1, %v2606_v25, %v6462_v18 }
 0x84e   :  { %v2707_v45 = vmul.f32 %v2706_v48, %v2704_v39  ;;  %v2608_v27 = vsel %vm6604_vm4, %v6356_v62, %v2605_v21  ;;  %4949 = vsinq.f32 %v2400_v54  ;;  %v2711_v38 = vsel %vm2626_vm0, %v2710_v24, %v6524_v58 }
 0x84f   :  { %v2484_v37 = vclz %v4506_v35  ;;  %vm6626_vm5 = vcmp.le.f32.partialorder %v2416_v17, 0.7853982  ;;  %vm2418_vm6 = vcmp.lt.s32.totalorder %v6372_v22, 0  ;;  %v2401_v3 = vsel %vm6580_vm14, 0, %v2399_v13 }
 0x850   :  { %v2708_v19 = vxor.u32 2147483648, %v2707_v45  ;;  %v2503_v39 = vsel %vm2418_vm6, %v2502_v11, %v6567_v63  ;;  %v2609_v18 = vsel %vm6604_vm4, 0, %v2607_v0  ;;  %v2713_v58 = vsel %vm6595_vm3, 0, %v2711_v38 }
 0x851   :  { %v4507_v1 = vadd.s32 4294967294, %v2484_v37  ;;  %v2405_v16 = vadd.s32 3, %v2401_v3  ;;  %v2505_v48 = vsel %vm6626_vm5, 0, %v2503_v39  ;;  %v2613_v35 = vadd.s32 3, %v2609_v18 }
 0x852   :  { %v2709_v4 = vsel %vm2626_vm0, %v2708_v19, %v2707_v45  ;;  %v2717_v63 = vadd.s32 3, %v2713_v58  ;;  %v2509_v2 = vadd.s32 3, %v2505_v48  ;;  %vm2404_vm4 = vweird.f32 %v6358_v49  ;;  %v4878_v49 = vld [vmem:[%s7508_s3 + $0x28] sm:$0xff]  }
 0x853   :  { %vm4508_vm12 = vcmp.lt.s32.totalorder %v4507_v1, 0  ;;  %v2712_v33 = vsel %vm6595_vm3, %v6362_v12, %v2709_v4  ;;  %v2406_v51 = vand.u32 3, %v2405_v16  ;;  %v2614_v19 = vand.u32 3, %v2613_v35 }
 0x854   :  { %v2487_v20 = vsel %vm4508_vm12, 0, %v4507_v1  ;;  %4951 = vcosq.f32 %v2712_v33  ;;  %v2718_v6 = vand.u32 3, %v2717_v63  ;;  %v2510_v59 = vand.u32 3, %v2509_v2 }
 0x855   :  { %v2488_v40 = vsub.s32 32, %v2487_v20  ;;  %v2492_v47 = vsub.s32 4294967266, %v2487_v20  ;;  %v2489_v9 = vshll.u32 %v2480_v46, %v2487_v20  ;;  %4953 = vsinq.f32 %v2712_v33 }
 0x856   :  { %4955 = vsinq.f32 %v2608_v27  ;;  %vm2408_vm7 = vcmp.eq.s32.totalorder %v2406_v51, 0  ;;  %vm2411_vm8 = vcmp.eq.s32.totalorder %v2406_v51, 2  ;;  %vm2616_vm9 = vcmp.eq.s32.totalorder %v2614_v19, 0 }
 0x857   :  { %v2490_v57 = vshrl.u32 %v2472_v8, %v2488_v40  ;;  %v2493_v50 = vadd.s32 127, %v2492_v47  ;;  %4957 = vcosq.f32 %v2608_v27  ;;  %v4948_v44 = vpop.eup %4947  ;;  %vm2720_vm10 = vcmp.eq.s32.totalorder %v2718_v6, 0 }
 0x858   :  { %v4950_v29 = vpop.eup %4949  ;;  %v2412_v7 = vxor.u32 2147483648, %v4948_v44  ;;  %vm2723_vm12 = vcmp.eq.s32.totalorder %v2718_v6, 2  ;;  %vm2407_vm13 = vcmp.lt.s32.totalorder %v2406_v51, 2  ;;  %vm2619_vm14 = vcmp.eq.s32.totalorder %v2614_v19, 2 }
 0x859   :  { %v2491_v53 = vor.u32 %v2490_v57, %v2489_v9  ;;  %v2494_v14 = vshll.u32 %v2493_v50, 23  ;;  %v2409_v20 = vxor.u32 2147483648, %v4950_v29  ;;  %vm2515_vm0 = vcmp.eq.s32.totalorder %v2510_v59, 2 }
 0x85a   :  { %v2413_v50 = vsel %vm2411_vm8, %v2412_v7, %v4950_v29  ;;  %vm2719_vm1 = vcmp.lt.s32.totalorder %v2718_v6, 2  ;;  %vm2512_vm3 = vcmp.eq.s32.totalorder %v2510_v59, 0  ;;  %vm2716_vm8 = vweird.f32 %v6362_v12  ;;  %v2738_v12 = vpop.permute.xlu1 %2737 }
 0x85b   :  { %v2495_v42 = vor.u32 4788187, %v2494_v14  ;;  %v2498_v61 = vcvt.s32.f32 %v2491_v53  ;;  %v2410_v57 = vsel %vm2408_vm7, %v4948_v44, %v2409_v20  ;;  %vm2508_vm7 = vweird.f32 %v6372_v22 }
 0x85d   :  { %v2496_v56 = vand.u32 2147483647, %v2495_v42  ;;  %v2414_v42 = vsel %vm2407_vm13, %v2410_v57, %v2413_v50 }
 0x85e   :  { %v4952_v31 = vpop.eup %4951 }
 0x85f   :  { %v2499_v10 = vmul.f32 %v2498_v61, %v2496_v56  ;;  %v4954_v45 = vpop.eup %4953  ;;  %v2724_v40 = vxor.u32 2147483648, %v4952_v31  ;;  %v2415_v61 = vsel %vm2404_vm4, nan, %v2414_v42 }
 0x860   :  { %v4956_v37 = vpop.eup %4955  ;;  %v2721_v8 = vxor.u32 2147483648, %v4954_v45 }
 0x861   :  { %v2500_v46 = vxor.u32 2147483648, %v2499_v10  ;;  %v4958_v1 = vpop.eup %4957  ;;  %v2617_v47 = vxor.u32 2147483648, %v4956_v37  ;;  %v2725_v21 = vsel %vm2723_vm12, %v2724_v40, %v4954_v45 }
 0x862   :  { %v2620_v4 = vxor.u32 2147483648, %v4958_v1  ;;  %v2722_v54 = vsel %vm2720_vm10, %v4952_v31, %v2721_v8 }
 0x863   :  { %v2501_v60 = vsel %vm2418_vm6, %v2500_v46, %v2499_v10  ;;  %v2618_v14 = vsel %vm2616_vm9, %v4958_v1, %v2617_v47  ;;  %v2726_v27 = vsel %vm2719_vm1, %v2722_v54, %v2725_v21  ;;  %vm2615_vm6 = vcmp.lt.s32.totalorder %v2614_v19, 2 }
 0x864   :  { %v2504_v17 = vsel %vm6626_vm5, %v6372_v22, %v2501_v60  ;;  %v2621_v36 = vsel %vm2619_vm14, %v2620_v4, %v4956_v37  ;;  %vm2511_vm5 = vcmp.lt.s32.totalorder %v2510_v59, 2  ;;  %v2727_v13 = vsel %vm2716_vm8, nan, %v2726_v27  ;;  %v2733_v22 = vpop.permute.xlu0 %2732 }
 0x865   :  { %4959 = vcosq.f32 %v2504_v17  ;;  %v2622_v56 = vsel %vm2615_vm6, %v2618_v14, %v2621_v36  ;;  %vm2612_vm9 = vweird.f32 %v6356_v62  ;;  %v2748_v62 = vpop.permute.xlu1 %2747 }
 0x866   :  { %4961 = vsinq.f32 %v2504_v17  ;;  %v2623_v0 = vsel %vm2612_vm9, nan, %v2622_v56 }
 0x867   :  { %v2729_v38 = vpack.c.bf16 %v2727_v13, %v2623_v0 }
 0x868   :  { %v2743_v46 = vpop.permute.xlu0 %2742 }
 0x86f   :  { %v4960_v9 = vpop.eup %4959 }
 0x870   :  { %v4962_v43 = vpop.eup %4961  ;;  %v2516_v53 = vxor.u32 2147483648, %v4960_v9 }
 0x871   :  { %v2513_v33 = vxor.u32 2147483648, %v4962_v43 }
 0x872   :  { %v2517_v23 = vsel %vm2515_vm0, %v2516_v53, %v4962_v43 }
 0x873   :  { %v2514_v25 = vsel %vm2512_vm3, %v4960_v9, %v2513_v33 }
 0x874   :  { %v2518_v24 = vsel %vm2511_vm5, %v2514_v25, %v2517_v23 }
 0x875   :  { %v2519_v10 = vsel %vm2508_vm7, nan, %v2518_v24 }
 0x876   :  { %v2728_v11 = vpack.c.bf16 %v2519_v10, %v2415_v61 }
 0x878   :  { %4689 = vmatprep.subr.bf16.mxu1 %v2728_v11 }
 0x879   :  { %4690 = vmatpush3.bf16.msra.mxu1 %v2728_v11 }
 0x87a   :  { %4691 = vmatprep.subr.bf16.mxu1 %v2729_v38 }
 0x87d   :  { %4692 = vmatpush3.bf16.msra.mxu1 %v2729_v38 }
 0x880   :  { %4694 = vmatmul.mubr.msk.bf16.vlgmr.msra.gmra.mrb[12].mxu1 %vm590_vm15, %v4878_v49 }
 0x953   :  { %v4695_v15 = vpop.f32.mrb[12].mxu1 }
 0x954   :  { %v6651_v3 = vadd.f32 %v4695_v15, %v2743_v46  ;;  %v2800_v60 = vpop.f32.mrb[13].mxu1 }
 0x955   :  { %v6653_v39 = vadd.f32 %v2800_v60, %v2733_v22  ;;  %v4696_v18 = vpop.f32.mrb[14].mxu1 }
 0x956   :  { %v3023_v58 = vand.u32 2147483647, %v6651_v3  ;;  %v3026_v17 = vand.u32 2139095040, %v6651_v3  ;;  %v6657_v44 = vadd.f32 %v4696_v18, %v2748_v62  ;;  %v2803_v16 = vpop.f32.mrb[15].mxu1 }
 0x957   :  { %v2815_v29 = vand.u32 2147483647, %v6653_v39  ;;  %v2818_v48 = vand.u32 2139095040, %v6653_v39  ;;  %v6672_v54 = vadd.f32 %v2803_v16, %v2738_v12 }
 0x958   :  { %v3027_v35 = vshrl.u32 %v3026_v17, 23  ;;  %v3030_v63 = vand.u32 8388607, %v3023_v58  ;;  %v3130_v37 = vand.u32 2139095040, %v6657_v44 }
 0x959   :  { %v2819_v31 = vshrl.u32 %v2818_v48, 23  ;;  %v2822_v45 = vand.u32 8388607, %v2815_v29 }
 0x95a   :  { %v4529_v51 = vadd.s32 4294967169, %v3027_v35  ;;  %v3131_v1 = vshrl.u32 %v3130_v37, 23  ;;  %v3031_v6 = vor.u32 8388608, %v3030_v63 }
 0x95b   :  { %v4521_v2 = vadd.s32 4294967169, %v2819_v31  ;;  %v2823_v20 = vor.u32 8388608, %v2822_v45 }
 0x95c   :  { %v3033_v19 = vadd.s32 1, %v4529_v51  ;;  %v4533_v8 = vadd.s32 4294967169, %v3131_v1  ;;  %v6666_v9 = vshll.u32 %v3031_v6, 8 }
 0x95d   :  { %v2825_v7 = vadd.s32 1, %v4521_v2  ;;  %v6668_v57 = vshll.u32 %v2823_v20, 8 }
 0x95e   :  { %vm3034_vm10 = vcmp.gt.s32.totalorder %v3033_v19, 0  ;;  %v6670_v50 = vadd.s32 1, %v4533_v8 }
 0x95f   :  { %v3035_v40 = vsel %vm3034_vm10, %v3033_v19, 0  ;;  %vm2826_vm12 = vcmp.gt.s32.totalorder %v2825_v7, 0 }
 0x960   :  { %v3036_v47 = vshrl.u32 %v3035_v40, 5  ;;  %v3037_v59 = vand.u32 31, %v3035_v40  ;;  %v2827_v4 = vsel %vm2826_vm12, %v2825_v7, 0  ;;  %vm3138_vm3 = vcmp.gt.s32.totalorder %v6670_v50, 0 }
 0x961   :  { %v6675_v53 = vshrl.u32 %v2827_v4, 5  ;;  %v2829_v14 = vand.u32 31, %v2827_v4 }
 0x962   :  { %v3038_v21 = vsub.s32 32, %v3037_v59  ;;  %v3040_v43 = vshll.u32 %v5014_v26, %v3037_v59  ;;  %v3043_v33 = vshll.u32 %v5015_v28, %v3037_v59  ;;  %v3046_v36 = vshll.u32 %v5016_v30, %v3037_v59 }
 0x963   :  { %v3049_v42 = vshll.u32 %v5017_v32, %v3037_v59  ;;  %v3052_v23 = vshll.u32 %v5018_v34, %v3037_v59  ;;  %vm3055_vm13 = vcmp.lt.s32.totalorder %v3036_v47, 1  ;;  %vm3056_vm14 = vcmp.lt.s32.totalorder %v3036_v47, 2 }
 0x964   :  { %v3041_v27 = vshrl.u32 %v5015_v28, %v3038_v21  ;;  %v3044_v25 = vshrl.u32 %v5016_v30, %v3038_v21  ;;  %v3047_v24 = vshrl.u32 %v5017_v32, %v3038_v21  ;;  %v3039_v56 = vshrl.u32 %v5014_v26, %v3038_v21 }
 0x965   :  { %v3050_v61 = vshrl.u32 %v5018_v34, %v3038_v21  ;;  %v3053_v10 = vshrl.u32 %v5019_v41, %v3038_v21  ;;  %v2830_v38 = vsub.s32 32, %v2829_v14  ;;  %vm3057_vm0 = vcmp.lt.s32.totalorder %v3036_v47, 3 }
 0x966   :  { %v3042_v13 = vor.u32 %v3041_v27, %v3040_v43  ;;  %v3045_v11 = vor.u32 %v3044_v25, %v3043_v33  ;;  %v3048_v0 = vor.u32 %v3047_v24, %v3046_v36  ;;  %vm3058_vm1 = vcmp.lt.s32.totalorder %v3036_v47, 4 }
 0x967   :  { %v3051_v49 = vor.u32 %v3050_v61, %v3049_v42  ;;  %v3054_v22 = vor.u32 %v3053_v10, %v3052_v23  ;;  %v2832_v16 = vshll.u32 %v5014_v26, %v2829_v14  ;;  %v2833_v63 = vshrl.u32 %v5015_v28, %v2830_v38 }
 0x968   :  { %v3059_v12 = vsel %vm3055_vm13, %v3039_v56, %v3042_v13  ;;  %v3060_v46 = vsel %vm3058_vm1, %v3048_v0, 2102212464  ;;  %v3063_v15 = vsel %vm3055_vm13, %v3042_v13, %v3045_v11  ;;  %v3067_v60 = vsel %vm3055_vm13, %v3045_v11, %v3048_v0 }
 0x969   :  { %v3061_v62 = vsel %vm3057_vm0, %v3045_v11, %v3060_v46  ;;  %v3064_v18 = vsel %vm3058_vm1, %v3051_v49, 920167782  ;;  %v3068_v17 = vsel %vm3058_vm1, %v3054_v22, 1326507024  ;;  %v2835_v31 = vshll.u32 %v5015_v28, %v2829_v14 }
 0x96a   :  { %v3065_v48 = vsel %vm3057_vm0, %v3048_v0, %v3064_v18  ;;  %v3069_v35 = vsel %vm3057_vm0, %v3051_v49, %v3068_v17  ;;  %v3062_v45 = vsel %vm3056_vm14, %v3059_v12, %v3061_v62  ;;  %v2836_v2 = vshrl.u32 %v5016_v30, %v2830_v38 }
 0x96b   :  { %v3066_v37 = vsel %vm3056_vm14, %v3063_v15, %v3065_v48  ;;  %v3070_v51 = vsel %vm3056_vm14, %v3067_v60, %v3069_v35  ;;  %v2834_v7 = vor.u32 %v2833_v63, %v2832_v16  ;;  %v2838_v40 = vshll.u32 %v5016_v30, %v2829_v14 }
 0x96c   :  { %v6699_v1 = vmul.u32.u64.low %v6666_v9, %v3070_v51  ;;  %v6700_v19 = vmul.u32.u64.high %v6666_v9, %v3070_v51, %v6699_v1  ;;  %v6703_v6 = vmul.u32.u64.low %v6666_v9, %v3066_v37  ;;  %v6704_v20 = vmul.u32.u64.high %v6666_v9, %v3066_v37, %v6703_v6 }
 0x96d   :  { %v2837_v8 = vor.u32 %v2836_v2, %v2835_v31  ;;  %v2839_v59 = vshrl.u32 %v5017_v32, %v2830_v38  ;;  %v2831_v47 = vshrl.u32 %v5014_v26, %v2830_v38  ;;  %v2841_v4 = vshll.u32 %v5017_v32, %v2829_v14 }
 0x96e   :  { %v2842_v21 = vshrl.u32 %v5018_v34, %v2830_v38  ;;  %v2845_v43 = vshrl.u32 %v5019_v41, %v2830_v38  ;;  %v3078_v33 = vmul.u32 %v6666_v9, %v3062_v45  ;;  %v2844_v42 = vshll.u32 %v5018_v34, %v2829_v14 }
 0x96f   :  { %v2840_v36 = vor.u32 %v2839_v59, %v2838_v40  ;;  %vm2847_vm4 = vcmp.lt.s32.totalorder %v6675_v53, 1  ;;  %vm3080_vm5 = vc.u32 %v6700_v19, %v6703_v6  ;;  %v3081_v23 = vadd.s32 1, %v6704_v20 }
 0x970   :  { %v2843_v27 = vor.u32 %v2842_v21, %v2841_v4  ;;  %vm2848_vm6 = vcmp.lt.s32.totalorder %v6675_v53, 2  ;;  %v2846_v25 = vor.u32 %v2845_v43, %v2844_v42  ;;  %vm2849_vm7 = vcmp.lt.s32.totalorder %v6675_v53, 3 }
 0x971   :  { %vm2850_vm8 = vcmp.lt.s32.totalorder %v6675_v53, 4  ;;  %v2855_v24 = vsel %vm2847_vm4, %v2834_v7, %v2837_v8  ;;  %v3082_v9 = vsel %vm3080_vm5, %v3081_v23, %v6704_v20  ;;  %v2859_v61 = vsel %vm2847_vm4, %v2837_v8, %v2840_v36 }
 0x972   :  { %v2852_v56 = vsel %vm2850_vm8, %v2840_v36, 2102212464  ;;  %v2856_v14 = vsel %vm2850_vm8, %v2843_v27, 920167782  ;;  %v3083_v10 = vadd.s32 %v3082_v9, %v3078_v33  ;;  %v2851_v13 = vsel %vm2847_vm4, %v2831_v47, %v2834_v7 }
 0x973   :  { %v2857_v11 = vsel %vm2849_vm7, %v2840_v36, %v2856_v14  ;;  %v2860_v0 = vsel %vm2850_vm8, %v2846_v25, 1326507024  ;;  %v2853_v38 = vsel %vm2849_vm7, %v2837_v8, %v2852_v56  ;;  %v3139_v12 = vsel %vm3138_vm3, %v6670_v50, 0 }
 0x974   :  { %v2858_v49 = vsel %vm2848_vm6, %v2855_v24, %v2857_v11  ;;  %v2861_v22 = vsel %vm2849_vm7, %v2843_v27, %v2860_v0  ;;  %v3084_v62 = vadd.s32 536870912, %v3083_v10  ;;  %v2854_v16 = vsel %vm2848_vm6, %v2851_v13, %v2853_v38 }
 0x975   :  { %v2862_v46 = vsel %vm2848_vm6, %v2859_v61, %v2861_v22  ;;  %v6731_v15 = vmul.u32.u64.low %v6668_v57, %v2858_v49  ;;  %v6732_v60 = vmul.u32.u64.high %v6668_v57, %v2858_v49, %v6731_v15  ;;  %v3127_v48 = vand.u32 2147483647, %v6657_v44 }
 0x976   :  { %v6736_v18 = vmul.u32.u64.low %v6668_v57, %v2862_v46  ;;  %v6737_v17 = vmul.u32.u64.high %v6668_v57, %v2862_v46, %v6736_v18  ;;  %v3141_v35 = vand.u32 31, %v3139_v12  ;;  %v2922_v50 = vand.u32 2139095040, %v6672_v54 }
 0x977   :  { %v2873_v63 = vadd.s32 1, %v6732_v60  ;;  %v6744_v45 = vshrl.u32 %v3084_v62, 30  ;;  %v2870_v37 = vmul.u32 %v6668_v57, %v2854_v16  ;;  %v3134_v53 = vand.u32 8388607, %v3127_v48 }
 0x978   :  { %v3142_v31 = vsub.s32 32, %v3141_v35  ;;  %vm2872_vm9 = vc.u32 %v6737_v17, %v6731_v15  ;;  %v2923_v2 = vshrl.u32 %v2922_v50, 23  ;;  %v3144_v20 = vshll.u32 %v5014_v26, %v3141_v35 }
 0x979   :  { %v2874_v51 = vsel %vm2872_vm9, %v2873_v63, %v6732_v60  ;;  %v3140_v40 = vshrl.u32 %v3139_v12, 5  ;;  %v3147_v59 = vshll.u32 %v5015_v28, %v3141_v35  ;;  %v3150_v57 = vshll.u32 %v5016_v30, %v3141_v35 }
 0x97a   :  { %v2875_v1 = vadd.s32 %v2874_v51, %v2870_v37  ;;  %v3145_v7 = vshrl.u32 %v5015_v28, %v3142_v31  ;;  %v3148_v8 = vshrl.u32 %v5016_v30, %v3142_v31  ;;  %v3151_v47 = vshrl.u32 %v5017_v32, %v3142_v31 }
 0x97b   :  { %v3086_v4 = vshll.u32 %v6744_v45, 30  ;;  %v3153_v42 = vshll.u32 %v5017_v32, %v3141_v35  ;;  %v3154_v23 = vshrl.u32 %v5018_v34, %v3142_v31  ;;  %v3156_v25 = vshll.u32 %v5018_v34, %v3141_v35 }
 0x97c   :  { %v2876_v21 = vadd.s32 536870912, %v2875_v1  ;;  %v3146_v43 = vor.u32 %v3145_v7, %v3144_v20  ;;  %v3149_v33 = vor.u32 %v3148_v8, %v3147_v59  ;;  %v3152_v36 = vor.u32 %v3151_v47, %v3150_v57 }
 0x97d   :  { %v3157_v24 = vshrl.u32 %v5019_v41, %v3142_v31  ;;  %v4525_v9 = vadd.s32 4294967169, %v2923_v2  ;;  %v3135_v56 = vor.u32 8388608, %v3134_v53  ;;  %v3155_v14 = vor.u32 %v3154_v23, %v3153_v42 }
 0x97e   :  { %v6761_v27 = vshrl.u32 %v2876_v21, 30  ;;  %vm3159_vm10 = vcmp.lt.s32.totalorder %v3140_v40, 1  ;;  %vm3161_vm12 = vcmp.lt.s32.totalorder %v3140_v40, 3  ;;  %vm3162_vm13 = vcmp.lt.s32.totalorder %v3140_v40, 4 }
 0x97f   :  { %v3158_v13 = vor.u32 %v3157_v24, %v3156_v25  ;;  %v6766_v11 = vsub.s32 %v3083_v10, %v3086_v4  ;;  %v3167_v0 = vsel %vm3159_vm10, %v3146_v43, %v3149_v33  ;;  %v3168_v38 = vsel %vm3162_vm13, %v3155_v14, 920167782 }
 0x980   :  { %v2878_v61 = vshll.u32 %v6761_v27, 30  ;;  %v3171_v49 = vsel %vm3159_vm10, %v3149_v33, %v3152_v36  ;;  %v3169_v22 = vsel %vm3161_vm12, %v3152_v36, %v3168_v38  ;;  %v2929_v46 = vadd.s32 1, %v4525_v9 }
 0x981   :  { %v3172_v12 = vsel %vm3162_vm13, %v3158_v13, 1326507024  ;;  %v3143_v60 = vshrl.u32 %v5014_v26, %v3142_v31  ;;  %vm3160_vm14 = vcmp.lt.s32.totalorder %v3140_v40, 2  ;;  %v3164_v62 = vsel %vm3162_vm13, %v3152_v36, 2102212464 }
 0x982   :  { %v3173_v18 = vsel %vm3161_vm12, %v3155_v14, %v3172_v12  ;;  %v6773_v16 = vsub.s32 %v2875_v1, %v2878_v61  ;;  %v3170_v10 = vsel %vm3160_vm14, %v3167_v0, %v3169_v22  ;;  %v3175_v50 = vshll.u32 %v3135_v56, 8 }
 0x983   :  { %v3174_v35 = vsel %vm3160_vm14, %v3171_v49, %v3173_v18  ;;  %v3089_v63 = vsub.s32 0, %v6766_v11  ;;  %v3163_v37 = vsel %vm3159_vm10, %v3143_v60, %v3146_v43  ;;  %v3165_v51 = vsel %vm3161_vm12, %v3149_v33, %v3164_v62 }
 0x984   :  { %v6780_v53 = vmul.u32.u64.low %v3175_v50, %v3174_v35  ;;  %v6781_v2 = vmul.u32.u64.high %v3175_v50, %v3174_v35, %v6780_v53  ;;  %vm2930_vm0 = vcmp.gt.s32.totalorder %v2929_v46, 0  ;;  %v2881_v1 = vsub.s32 0, %v6773_v16 }
 0x985   :  { %v6783_v31 = vmul.u32.u64.low %v3175_v50, %v3170_v10  ;;  %v6784_v20 = vmul.u32.u64.high %v3175_v50, %v3170_v10, %v6783_v31  ;;  %v2931_v7 = vsel %vm2930_vm0, %v2929_v46, 0  ;;  %v3166_v8 = vsel %vm3160_vm14, %v3163_v37, %v3165_v51 }
 0x986   :  { %v2933_v59 = vand.u32 31, %v2931_v7  ;;  %v4530_v57 = vmin.u32 %v3089_v63, %v6766_v11  ;;  %v4522_v4 = vmin.u32 %v2881_v1, %v6773_v16  ;;  %v3182_v21 = vmul.u32 %v3175_v50, %v3166_v8 }
 0x987   :  { %vm3184_vm1 = vc.u32 %v6781_v2, %v6783_v31  ;;  %v3185_v47 = vadd.s32 1, %v6784_v20  ;;  %v2919_v33 = vand.u32 2147483647, %v6672_v54  ;;  %v2932_v62 = vshrl.u32 %v2931_v7, 5 }
 0x988   :  { %v2934_v36 = vsub.s32 32, %v2933_v59  ;;  %v3091_v42 = vclz %v4530_v57  ;;  %v2883_v40 = vclz %v4522_v4  ;;  %v2936_v38 = vshll.u32 %v5014_v26, %v2933_v59 }
 0x989   :  { %v3186_v43 = vsel %vm3184_vm1, %v3185_v47, %v6784_v20  ;;  %v2926_v24 = vand.u32 8388607, %v2919_v33  ;;  %v2939_v49 = vshll.u32 %v5015_v28, %v2933_v59  ;;  %v2945_v22 = vshll.u32 %v5017_v32, %v2933_v59 }
 0x98a   :  { %v3187_v23 = vadd.s32 %v3186_v43, %v3182_v21  ;;  %v2937_v9 = vshrl.u32 %v5015_v28, %v2934_v36  ;;  %v2940_v56 = vshrl.u32 %v5016_v30, %v2934_v36  ;;  %v4531_v14 = vadd.s32 4294967294, %v3091_v42 }
 0x98b   :  { %v2943_v13 = vshrl.u32 %v5017_v32, %v2934_v36  ;;  %v2946_v0 = vshrl.u32 %v5018_v34, %v2934_v36  ;;  %v2949_v12 = vshrl.u32 %v5019_v41, %v2934_v36  ;;  %v4523_v46 = vadd.s32 4294967294, %v2883_v40 }
 0x98c   :  { %v3188_v25 = vadd.s32 536870912, %v3187_v23  ;;  %v2942_v18 = vshll.u32 %v5016_v30, %v2933_v59  ;;  %v2938_v10 = vor.u32 %v2937_v9, %v2936_v38  ;;  %v2941_v35 = vor.u32 %v2940_v56, %v2939_v49 }
 0x98d   :  { %v2947_v50 = vor.u32 %v2946_v0, %v2945_v22  ;;  %v2948_v63 = vshll.u32 %v5018_v34, %v2933_v59  ;;  %vm4532_vm3 = vcmp.lt.s32.totalorder %v4531_v14, 0  ;;  %v2927_v53 = vor.u32 8388608, %v2926_v24 }
 0x98e   :  { %v6800_v61 = vshrl.u32 %v3188_v25, 30  ;;  %v2944_v51 = vor.u32 %v2943_v13, %v2942_v18  ;;  %vm4524_vm4 = vcmp.lt.s32.totalorder %v4523_v46, 0  ;;  %vm2951_vm5 = vcmp.lt.s32.totalorder %v2932_v62, 1 }
 0x98f   :  { %v2950_v20 = vor.u32 %v2949_v12, %v2948_v63  ;;  %vm2954_vm6 = vcmp.lt.s32.totalorder %v2932_v62, 4  ;;  %v2935_v7 = vshrl.u32 %v5014_v26, %v2934_v36  ;;  %vm2953_vm7 = vcmp.lt.s32.totalorder %v2932_v62, 3 }
 0x990   :  { %v3190_v60 = vshll.u32 %v6800_v61, 30  ;;  %v2959_v8 = vsel %vm2951_vm5, %v2938_v10, %v2941_v35  ;;  %v2960_v57 = vsel %vm2954_vm6, %v2947_v50, 920167782  ;;  %vm2952_vm8 = vcmp.lt.s32.totalorder %v2932_v62, 2 }
 0x991   :  { %v2956_v59 = vsel %vm2954_vm6, %v2944_v51, 2102212464  ;;  %v2961_v4 = vsel %vm2953_vm7, %v2944_v51, %v2960_v57  ;;  %v2963_v43 = vsel %vm2951_vm5, %v2941_v35, %v2944_v51  ;;  %v2964_v42 = vsel %vm2954_vm6, %v2950_v20, 1326507024 }
 0x992   :  { %v6811_v37 = vsub.s32 %v3187_v23, %v3190_v60  ;;  %v2962_v21 = vsel %vm2952_vm8, %v2959_v8, %v2961_v4  ;;  %v2967_v23 = vshll.u32 %v2927_v53, 8  ;;  %v2886_v40 = vsel %vm4524_vm4, 0, %v4523_v46 }
 0x993   :  { %v2955_v36 = vsel %vm2951_vm5, %v2935_v7, %v2938_v10  ;;  %v2965_v24 = vsel %vm2953_vm7, %v2947_v50, %v2964_v42  ;;  %v2957_v9 = vsel %vm2953_vm7, %v2941_v35, %v2956_v59  ;;  %v3094_v12 = vsel %vm4532_vm3, 0, %v4531_v14 }
 0x994   :  { %v3193_v1 = vsub.s32 0, %v6811_v37  ;;  %v2966_v56 = vsel %vm2952_vm8, %v2963_v43, %v2965_v24  ;;  %v6822_v13 = vmul.u32.u64.low %v2967_v23, %v2962_v21  ;;  %v6823_v0 = vmul.u32.u64.high %v2967_v23, %v2962_v21, %v6822_v13 }
 0x995   :  { %v6825_v49 = vmul.u32.u64.low %v2967_v23, %v2966_v56  ;;  %v6826_v22 = vmul.u32.u64.high %v2967_v23, %v2966_v56, %v6825_v49  ;;  %v2891_v60 = vsub.s32 4294967266, %v2886_v40  ;;  %v2958_v46 = vsel %vm2952_vm8, %v2955_v36, %v2957_v9 }
 0x996   :  { %v4534_v47 = vmin.u32 %v3193_v1, %v6811_v37  ;;  %v2977_v10 = vadd.s32 1, %v6823_v0  ;;  %v3099_v50 = vsub.s32 4294967266, %v3094_v12  ;;  %v2974_v51 = vmul.u32 %v2967_v23, %v2958_v46 }
 0x997   :  { %v2892_v63 = vadd.s32 127, %v2891_v60  ;;  %vm2976_vm10 = vc.u32 %v6826_v22, %v6822_v13  ;;  %v2887_v20 = vsub.s32 32, %v2886_v40  ;;  %v2871_v14 = vadd.s32 %v6731_v15, %v6737_v17 }
 0x998   :  { %v3195_v25 = vclz %v4534_v47  ;;  %v2978_v53 = vsel %vm2976_vm10, %v2977_v10, %v6823_v0  ;;  %v3100_v8 = vadd.s32 127, %v3099_v50  ;;  %v3095_v59 = vsub.s32 32, %v3094_v12 }
 0x999   :  { %v2979_v7 = vadd.s32 %v2978_v53, %v2974_v51  ;;  %v2893_v62 = vshll.u32 %v2892_v63, 23  ;;  %v2889_v4 = vshrl.u32 %v2871_v14, %v2887_v20  ;;  %v3183_v21 = vadd.s32 %v6783_v31, %v6781_v2 }
 0x99a   :  { %v4535_v38 = vadd.s32 4294967294, %v3195_v25  ;;  %v3079_v23 = vadd.s32 %v6703_v6, %v6700_v19  ;;  %v3101_v25 = vshll.u32 %v3100_v8, 23  ;;  %v2888_v36 = vshll.u32 %v6773_v16, %v2886_v40 }
 0x99b   :  { %v2980_v47 = vadd.s32 536870912, %v2979_v7  ;;  %v2894_v24 = vor.u32 4788187, %v2893_v62  ;;  %v3096_v2 = vshll.u32 %v6766_v11, %v3094_v12  ;;  %v2975_v12 = vadd.s32 %v6822_v13, %v6826_v22 }
 0x99c   :  { %vm4536_vm9 = vcmp.lt.s32.totalorder %v4535_v38, 0  ;;  %v3097_v17 = vshrl.u32 %v3079_v23, %v3095_v59  ;;  %v2890_v56 = vor.u32 %v2889_v4, %v2888_v36  ;;  %v3102_v31 = vor.u32 4788187, %v3101_v25 }
 0x99d   :  { %v3198_v18 = vsel %vm4536_vm9, 0, %v4535_v38  ;;  %v6837_v42 = vshrl.u32 %v2980_v47, 30  ;;  %v2895_v60 = vand.u32 2147483647, %v2894_v24  ;;  %vm2817_vm13 = vcmp.lt.s32.totalorder %v6653_v39, 0 }
 0x99e   :  { %v3203_v35 = vsub.s32 4294967266, %v3198_v18  ;;  %v3199_v57 = vsub.s32 32, %v3198_v18  ;;  %v3200_v0 = vshll.u32 %v6811_v37, %v3198_v18  ;;  %v3098_v19 = vor.u32 %v3097_v17, %v3096_v2 }
 0x99f   :  { %v2982_v15 = vshll.u32 %v6837_v42, 30  ;;  %v2897_v6 = vcvt.s32.f32 %v2890_v56  ;;  %v3103_v40 = vand.u32 2147483647, %v3102_v31  ;;  %vm3129_vm14 = vcmp.lt.s32.totalorder %v6657_v44, 0 }
 0x9a0   :  { %v3204_v1 = vadd.s32 127, %v3203_v35  ;;  %v3201_v9 = vshrl.u32 %v3183_v21, %v3199_v57  ;;  %v3105_v53 = vcvt.s32.f32 %v3098_v19  ;;  %vm6852_vm0 = vcmp.le.f32.partialorder %v2815_v29, 0.7853982 }
 0x9a1   :  { %v2983_v49 = vsub.s32 %v2979_v7, %v2982_v15  ;;  %v2898_v35 = vmul.f32 %v2897_v6, %v2895_v60  ;;  %vm3025_vm1 = vcmp.lt.s32.totalorder %v6651_v3, 0  ;;  %vm6866_vm3 = vcmp.le.f32.partialorder %v3127_v48, 0.7853982 }
 0x9a2   :  { %v3205_v43 = vshll.u32 %v3204_v1, 23  ;;  %v3202_v46 = vor.u32 %v3201_v9, %v3200_v0  ;;  %v3106_v37 = vmul.f32 %v3105_v53, %v3103_v40  ;;  %vm6872_vm4 = vcmp.le.f32.partialorder %v3023_v58, 0.7853982 }
 0x9a3   :  { %v2985_v10 = vsub.s32 0, %v2983_v49  ;;  %v2899_v18 = vxor.u32 2147483648, %v2898_v35  ;;  %v2901_v9 = vsub.s32 4, %v6761_v27  ;;  %v3109_v17 = vsub.s32 4, %v6744_v45 }
 0x9a4   :  { %v3206_v38 = vor.u32 4788187, %v3205_v43  ;;  %v3209_v63 = vcvt.s32.f32 %v3202_v46  ;;  %v3107_v62 = vxor.u32 2147483648, %v3106_v37  ;;  %v3213_v58 = vsub.s32 4, %v6800_v61 }
 0x9a5   :  { %v4526_v16 = vmin.u32 %v2985_v10, %v2983_v49  ;;  %v2900_v57 = vsel %vm2817_vm13, %v2899_v18, %v2898_v35  ;;  %v2902_v2 = vsel %vm2817_vm13, %v2901_v9, %v6761_v27  ;;  %v3110_v31 = vsel %vm3025_vm1, %v3109_v17, %v6744_v45 }
 0x9a6   :  { %v3207_v50 = vand.u32 2147483647, %v3206_v38  ;;  %v2903_v23 = vsel %vm6852_vm0, %v6653_v39, %v2900_v57  ;;  %v3108_v25 = vsel %vm3025_vm1, %v3107_v62, %v3106_v37  ;;  %v3214_v46 = vsel %vm3129_vm14, %v3213_v58, %v6800_v61 }
 0x9a7   :  { %v2987_v51 = vclz %v4526_v16  ;;  %4963 = vcosq.f32 %v2903_v23  ;;  %v3111_v0 = vsel %vm6872_vm4, %v6651_v3, %v3108_v25  ;;  %vm2921_vm5 = vcmp.lt.s32.totalorder %v6672_v54, 0 }
 0x9a8   :  { %v3210_v20 = vmul.f32 %v3209_v63, %v3207_v50  ;;  %4965 = vsinq.f32 %v2903_v23  ;;  %v2904_v10 = vsel %vm6852_vm0, 0, %v2902_v2  ;;  %vm2920_vm6 = vcmp.le.f32.partialorder %v2919_v33, 0.7853982 }
 0x9a9   :  { %v4527_v1 = vadd.s32 4294967294, %v2987_v51  ;;  %v3112_v45 = vsel %vm6872_vm4, 0, %v3110_v31  ;;  %v3216_v50 = vsel %vm6866_vm3, 0, %v3214_v46  ;;  %v2908_v61 = vadd.s32 3, %v2904_v10 }
 0x9aa   :  { %v3211_v11 = vxor.u32 2147483648, %v3210_v20  ;;  %v3116_v35 = vadd.s32 3, %v3112_v45  ;;  %v3220_v51 = vadd.s32 3, %v3216_v50  ;;  %v4880_v50 = vld [vmem:[%s7504_s1 + $0x38] sm:$0xff]  }
 0x9ab   :  { %vm4528_vm12 = vcmp.lt.s32.totalorder %v4527_v1, 0 }
 0x9ac   :  { %v2990_v7 = vsel %vm4528_vm12, 0, %v4527_v1  ;;  %v3212_v13 = vsel %vm3129_vm14, %v3211_v11, %v3210_v20 }
 0x9ad   :  { %v2991_v8 = vsub.s32 32, %v2990_v7  ;;  %v2995_v14 = vsub.s32 4294967266, %v2990_v7  ;;  %v2992_v47 = vshll.u32 %v2983_v49, %v2990_v7  ;;  %v3215_v15 = vsel %vm6866_vm3, %v6657_v44, %v3212_v13 }
 0x9ae   :  { %4967 = vcosq.f32 %v3215_v15  ;;  %v3005_v49 = vsub.s32 4, %v6837_v42  ;;  %v3117_v7 = vand.u32 3, %v3116_v35 }
 0x9af   :  { %v2993_v59 = vshrl.u32 %v2975_v12, %v2991_v8  ;;  %v2996_v4 = vadd.s32 127, %v2995_v14  ;;  %4969 = vsinq.f32 %v3215_v15  ;;  %v3221_v12 = vand.u32 3, %v3220_v51 }
 0x9b0   :  { %4971 = vsinq.f32 %v3111_v0  ;;  %v3006_v19 = vsel %vm2921_vm5, %v3005_v49, %v6837_v42  ;;  %v2909_v42 = vand.u32 3, %v2908_v61  ;;  %vm3119_vm10 = vcmp.eq.s32.totalorder %v3117_v7, 0 }
 0x9b1   :  { %v2994_v22 = vor.u32 %v2993_v59, %v2992_v47  ;;  %v2997_v43 = vshll.u32 %v2996_v4, 23  ;;  %4973 = vcosq.f32 %v3111_v0  ;;  %v3008_v16 = vsel %vm2920_vm6, 0, %v3006_v19  ;;  %v4964_v40 = vpop.eup %4963 }
 0x9b2   :  { %v4966_v63 = vpop.eup %4965  ;;  %v3012_v53 = vadd.s32 3, %v3008_v16  ;;  %v2915_v18 = vxor.u32 2147483648, %v4964_v40  ;;  %vm2910_vm7 = vcmp.lt.s32.totalorder %v2909_v42, 2  ;;  %vm2911_vm8 = vcmp.eq.s32.totalorder %v2909_v42, 0 }
 0x9b3   :  { %v2998_v36 = vor.u32 4788187, %v2997_v43  ;;  %v3001_v56 = vcvt.s32.f32 %v2994_v22  ;;  %v2912_v37 = vxor.u32 2147483648, %v4966_v63  ;;  %vm2914_vm9 = vcmp.eq.s32.totalorder %v2909_v42, 2 }
 0x9b4   :  { %v3013_v8 = vand.u32 3, %v3012_v53  ;;  %v2916_v4 = vsel %vm2914_vm9, %v2915_v18, %v4966_v63  ;;  %vm3122_vm12 = vcmp.eq.s32.totalorder %v3117_v7, 2  ;;  %vm3223_vm13 = vcmp.eq.s32.totalorder %v3221_v12, 0 }
 0x9b5   :  { %v2999_v48 = vand.u32 2147483647, %v2998_v36  ;;  %v2913_v59 = vsel %vm2911_vm8, %v4964_v40, %v2912_v37  ;;  %vm3226_vm14 = vcmp.eq.s32.totalorder %v3221_v12, 2  ;;  %vm3222_vm4 = vcmp.lt.s32.totalorder %v3221_v12, 2 }
 0x9b6   :  { %vm3018_vm0 = vcmp.eq.s32.totalorder %v3013_v8, 2  ;;  %v2917_v29 = vsel %vm2910_vm7, %v2913_v59, %v2916_v4  ;;  %vm3015_vm1 = vcmp.eq.s32.totalorder %v3013_v8, 0  ;;  %vm3014_vm3 = vcmp.lt.s32.totalorder %v3013_v8, 2 }
 0x9b7   :  { %v3002_v38 = vmul.f32 %v3001_v56, %v2999_v48  ;;  %vm3118_vm8 = vcmp.lt.s32.totalorder %v3117_v7, 2  ;;  %vm3219_vm7 = vweird.f32 %v6657_v44  ;;  %vm3115_vm9 = vweird.f32 %v6651_v3  ;;  %v3236_v44 = vpop.permute.xlu0 %3235 }
 0x9b8   :  { %v4968_v33 = vpop.eup %4967 }
 0x9b9   :  { %v3003_v60 = vxor.u32 2147483648, %v3002_v38  ;;  %v4970_v20 = vpop.eup %4969  ;;  %v3227_v62 = vxor.u32 2147483648, %v4968_v33 }
 0x9ba   :  { %v4972_v1 = vpop.eup %4971  ;;  %v3224_v14 = vxor.u32 2147483648, %v4970_v20 }
 0x9bb   :  { %v3004_v27 = vsel %vm2921_vm5, %v3003_v60, %v3002_v38  ;;  %v4974_v11 = vpop.eup %4973  ;;  %v3120_v57 = vxor.u32 2147483648, %v4972_v1  ;;  %v3228_v25 = vsel %vm3226_vm14, %v3227_v62, %v4970_v20  ;;  %vm2907_vm5 = vweird.f32 %v6653_v39  ;;  %v4495_v39 = vld [vmem:[%s7509_s5 + $0x4] sm:$0x3]  ;;  %v3317_v61 = vpop.permute.xlu0 %3316 }
 0x9bc   :  { %v3007_v6 = vsel %vm2920_vm6, %v6672_v54, %v3004_v27  ;;  %v3123_v21 = vxor.u32 2147483648, %v4974_v11  ;;  %v3225_v23 = vsel %vm3223_vm13, %v4968_v33, %v3224_v14  ;;  %vm3011_vm6 = vweird.f32 %v6672_v54  ;;  %v4879_v54 = vld [vmem:[%s7504_s1 + $0x30] sm:$0xff]  }
 0x9bd   :  { %4975 = vcosq.f32 %v3007_v6  ;;  %v3121_v24 = vsel %vm3119_vm10, %v4974_v11, %v3120_v57  ;;  %v3229_v48 = vsel %vm3222_vm4, %v3225_v23, %v3228_v25  ;;  %v2918_v56 = vsel %vm2907_vm5, nan, %v2917_v29  ;;  %4707 = vmatprep.mubr.msk.bf16.mxu1 %vm79_vm2, %v4879_v54 }
 0x9be   :  { %4977 = vsinq.f32 %v3007_v6  ;;  %v3124_v15 = vsel %vm3122_vm12, %v3123_v21, %v4972_v1  ;;  %v3230_v49 = vsel %vm3219_vm7, nan, %v3229_v48 }
 0x9bf   :  { %v3125_v38 = vsel %vm3118_vm8, %v3121_v24, %v3124_v15  ;;  %v3327_v63 = vpop.permute.xlu0 %3326 }
 0x9c0   :  { %v3126_v2 = vsel %vm3115_vm9, nan, %v3125_v38 }
 0x9c1   :  { %v3232_v31 = vpack.c.bf16 %v3230_v49, %v3126_v2 }
 0x9c7   :  { %v4976_v47 = vpop.eup %4975 }
 0x9c8   :  { %v4978_v13 = vpop.eup %4977  ;;  %v3019_v22 = vxor.u32 2147483648, %v4976_v47 }
 0x9c9   :  { %v3016_v43 = vxor.u32 2147483648, %v4978_v13 }
 0x9ca   :  { %v3020_v36 = vsel %vm3018_vm0, %v3019_v22, %v4978_v13 }
 0x9cb   :  { %v3017_v9 = vsel %vm3015_vm1, %v4976_v47, %v3016_v43 }
 0x9cc   :  { %v3021_v17 = vsel %vm3014_vm3, %v3017_v9, %v3020_v36  ;;  %v4881_v9 = vld [vmem:[%s7508_s3 + $0x30] sm:$0xff]  }
 0x9cd   :  { %v3022_v0 = vsel %vm3011_vm6, nan, %v3021_v17 }
 0x9ce   :  { %v3231_v58 = vpack.c.bf16 %v3022_v0, %v2918_v56 }
 0x9d0   :  { %4698 = vmatpush3.bf16.msra.mxu0 %v3231_v58 }
 0x9d1   :  { %4699 = vmatprep.subr.bf16.mxu0 %v5020_v55 }
 0x9d4   :  { %4700 = vmatpush3.bf16.msra.mxu0 %v3232_v31 }
 0x9d7   :  { %4702 = vmatmul.mubr.msk.bf16.vlgmr.msra.gmra.mrb[16].mxu0 %vm590_vm15, %v4495_v39 }
 0x9d8   :  { %4715 = vmatprep.mubr.msk.bf16.mxu0 %vm590_vm15, %v4881_v9 }
 0xaaa   :  { %v3275_v60 = vpop.f32.mrb[16].mxu0 }
 0xaab   :  { %v3276_v3 = vadd.f32 %v3275_v60, %v3236_v44  ;;  %v4703_v46 = vpop.f32.mrb[17].mxu0 }
 0xaac   :  { %v3278_v10 = vpop.f32.mrb[18].mxu0 }
 0xaad   :  { %v6921_v27 = vadd.f32 %v3276_v3, %v6341_v52  ;;  %4538 = vst [vmem:[%s7510_s8 + $0x8] sm:$0x7] %v3276_v3  ;;  %v4704_v19 = vpop.f32.mrb[19].mxu0  ;;  %v3312_v52 = vpop.permute.xlu1 %3311 }
 0xaaf   :  { %v3308_v45 = vpack.c.bf16 %v6921_v27, %v6921_v27 }
 0xab1   :  { %v3346_v6 = vand.u32 %v3308_v45, %v5073_v5  ;;  %v3322_v16 = vpop.permute.xlu1 %3321 }
 0xab3   :  { %4705 = vmatprep.subr.bf16.mxu1 %v3346_v6 }
 0xab4   :  { %4706 = vmatpush3.bf16.msra.mxu1 %v3346_v6 }
 0xab5   :  { %4719 = vmatprep.subr.bf16.mxu1 %v5020_v55 }
 0xab7   :  { %4708 = vmatmul.mubr.msk.bf16.vlgmr.msra.gmra.mrb[16].mxu1 %vm79_vm2, %v4880_v50 }
 0xab8   :  { %4723 = vmatprep.mubr.msk.bf16.mxu1 %vm5021_vm11, %v5020_v55 }
 0xb8a   :  { %v4709_v40 = vpop.f32.mrb[16].mxu1 }
 0xb8b   :  { %v6936_v35 = vadd.f32 %v4709_v40, %v3322_v16  ;;  %v3382_v5 = vpop.f32.mrb[17].mxu1 }
 0xb8c   :  { %v6938_v51 = vadd.f32 %v3382_v5, %v3312_v52  ;;  %v4710_v33 = vpop.f32.mrb[18].mxu1 }
 0xb8d   :  { %v3605_v53 = vand.u32 2147483647, %v6936_v35  ;;  %v3608_v20 = vand.u32 2139095040, %v6936_v35  ;;  %v6942_v42 = vadd.f32 %v4710_v33, %v3327_v63  ;;  %v3385_v1 = vpop.f32.mrb[19].mxu1 }
 0xb8e   :  { %v3397_v37 = vand.u32 2147483647, %v6938_v51  ;;  %v3400_v18 = vand.u32 2139095040, %v6938_v51  ;;  %v6952_v47 = vadd.f32 %v3385_v1, %v3317_v61 }
 0xb8f   :  { %v3609_v7 = vshrl.u32 %v3608_v20, 23  ;;  %v3612_v11 = vand.u32 8388607, %v3605_v53  ;;  %v3712_v14 = vand.u32 2139095040, %v6942_v42  ;;  %v3709_v57 = vand.u32 2147483647, %v6942_v42 }
 0xb90   :  { %v3401_v12 = vshrl.u32 %v3400_v18, 23  ;;  %v3404_v8 = vand.u32 8388607, %v3397_v37  ;;  %v3504_v29 = vand.u32 2139095040, %v6952_v47 }
 0xb91   :  { %v4569_v62 = vadd.s32 4294967169, %v3609_v7  ;;  %v3613_v59 = vor.u32 8388608, %v3612_v11  ;;  %v3713_v21 = vshrl.u32 %v3712_v14, 23  ;;  %v6956_v25 = vand.u32 8388607, %v3709_v57 }
 0xb92   :  { %v4561_v4 = vadd.s32 4294967169, %v3401_v12  ;;  %v3405_v22 = vor.u32 8388608, %v3404_v8  ;;  %v6974_v54 = vshrl.u32 %v3504_v29, 23 }
 0xb93   :  { %v3615_v13 = vadd.s32 1, %v4569_v62  ;;  %v4573_v23 = vadd.s32 4294967169, %v3713_v21  ;;  %v6959_v24 = vshll.u32 %v3613_v59, 8  ;;  %v3717_v38 = vor.u32 8388608, %v6956_v25 }
 0xb94   :  { %v3407_v43 = vadd.s32 1, %v4561_v4  ;;  %v6964_v56 = vshll.u32 %v3405_v22, 8 }
 0xb95   :  { %vm3616_vm2 = vcmp.gt.s32.totalorder %v3615_v13, 0  ;;  %v6969_v49 = vadd.s32 1, %v4573_v23 }
 0xb96   :  { %v3617_v36 = vsel %vm3616_vm2, %v3615_v13, 0  ;;  %vm3408_vm11 = vcmp.gt.s32.totalorder %v3407_v43, 0 }
 0xb97   :  { %v3618_v15 = vshrl.u32 %v3617_v36, 5  ;;  %v3619_v17 = vand.u32 31, %v3617_v36  ;;  %v3409_v48 = vsel %vm3408_vm11, %v3407_v43, 0  ;;  %vm3720_vm0 = vcmp.gt.s32.totalorder %v6969_v49, 0 }
 0xb98   :  { %v6966_v0 = vshrl.u32 %v3409_v48, 5  ;;  %v3411_v58 = vand.u32 31, %v3409_v48 }
 0xb99   :  { %v3620_v2 = vsub.s32 32, %v3619_v17  ;;  %v3622_v31 = vshll.u32 %v5014_v26, %v3619_v17  ;;  %v3625_v39 = vshll.u32 %v5015_v28, %v3619_v17  ;;  %v3628_v44 = vshll.u32 %v5016_v30, %v3619_v17 }
 0xb9a   :  { %v3631_v60 = vshll.u32 %v5017_v32, %v3619_v17  ;;  %v3634_v3 = vshll.u32 %v5018_v34, %v3619_v17  ;;  %vm3637_vm10 = vcmp.lt.s32.totalorder %v3618_v15, 1  ;;  %vm3638_vm12 = vcmp.lt.s32.totalorder %v3618_v15, 2 }
 0xb9b   :  { %v3623_v46 = vshrl.u32 %v5015_v28, %v3620_v2  ;;  %v3626_v10 = vshrl.u32 %v5016_v30, %v3620_v2  ;;  %v3629_v19 = vshrl.u32 %v5017_v32, %v3620_v2  ;;  %v3621_v45 = vshrl.u32 %v5014_v26, %v3620_v2 }
 0xb9c   :  { %v3632_v6 = vshrl.u32 %v5018_v34, %v3620_v2  ;;  %v3635_v50 = vshrl.u32 %v5019_v41, %v3620_v2  ;;  %vm3639_vm13 = vcmp.lt.s32.totalorder %v3618_v15, 3  ;;  %v3412_v40 = vsub.s32 32, %v3411_v58 }
 0xb9d   :  { %v3624_v52 = vor.u32 %v3623_v46, %v3622_v31  ;;  %v3627_v61 = vor.u32 %v3626_v10, %v3625_v39  ;;  %v3630_v16 = vor.u32 %v3629_v19, %v3628_v44  ;;  %vm3640_vm14 = vcmp.lt.s32.totalorder %v3618_v15, 4 }
 0xb9e   :  { %v3633_v5 = vor.u32 %v3632_v6, %v3631_v60  ;;  %v3636_v63 = vor.u32 %v3635_v50, %v3634_v3  ;;  %v3414_v33 = vshll.u32 %v5014_v26, %v3411_v58  ;;  %v3417_v14 = vshll.u32 %v5015_v28, %v3411_v58 }
 0xb9f   :  { %v3641_v20 = vsel %vm3637_vm10, %v3621_v45, %v3624_v52  ;;  %v3642_v1 = vsel %vm3640_vm14, %v3630_v16, 2102212464  ;;  %v3645_v18 = vsel %vm3637_vm10, %v3624_v52, %v3627_v61  ;;  %v3649_v7 = vsel %vm3637_vm10, %v3627_v61, %v3630_v16 }
 0xba0   :  { %v3643_v11 = vsel %vm3639_vm13, %v3627_v61, %v3642_v1  ;;  %v3646_v12 = vsel %vm3640_vm14, %v3633_v5, 920167782  ;;  %v3650_v8 = vsel %vm3640_vm14, %v3636_v63, 1326507024  ;;  %v3413_v4 = vshrl.u32 %v5014_v26, %v3412_v40 }
 0xba1   :  { %v3647_v62 = vsel %vm3639_vm13, %v3630_v16, %v3646_v12  ;;  %v3651_v59 = vsel %vm3639_vm13, %v3633_v5, %v3650_v8  ;;  %v3415_v21 = vshrl.u32 %v5015_v28, %v3412_v40  ;;  %v3644_v13 = vsel %vm3638_vm12, %v3641_v20, %v3643_v11 }
 0xba2   :  { %v3648_v22 = vsel %vm3638_vm12, %v3645_v18, %v3647_v62  ;;  %v3652_v43 = vsel %vm3638_vm12, %v3649_v7, %v3651_v59  ;;  %v3418_v23 = vshrl.u32 %v5016_v30, %v3412_v40  ;;  %v3420_v31 = vshll.u32 %v5016_v30, %v3411_v58 }
 0xba3   :  { %v7001_v29 = vmul.u32.u64.low %v6959_v24, %v3652_v43  ;;  %v7002_v36 = vmul.u32.u64.high %v6959_v24, %v3652_v43, %v7001_v29  ;;  %v7005_v9 = vmul.u32.u64.low %v6959_v24, %v3648_v22  ;;  %v7006_v17 = vmul.u32.u64.high %v6959_v24, %v3648_v22, %v7005_v9 }
 0xba4   :  { %v3416_v48 = vor.u32 %v3415_v21, %v3414_v33  ;;  %v3419_v2 = vor.u32 %v3418_v23, %v3417_v14  ;;  %v3421_v39 = vshrl.u32 %v5017_v32, %v3412_v40  ;;  %v3660_v15 = vmul.u32 %v6959_v24, %v3644_v13 }
 0xba5   :  { %v3423_v44 = vshll.u32 %v5017_v32, %v3411_v58  ;;  %v3424_v60 = vshrl.u32 %v5018_v34, %v3412_v40  ;;  %v3427_v3 = vshrl.u32 %v5019_v41, %v3412_v40  ;;  %v3426_v10 = vshll.u32 %v5018_v34, %v3411_v58 }
 0xba6   :  { %v3422_v46 = vor.u32 %v3421_v39, %v3420_v31  ;;  %vm3429_vm1 = vcmp.lt.s32.totalorder %v6966_v0, 1  ;;  %vm3430_vm3 = vcmp.lt.s32.totalorder %v6966_v0, 2  ;;  %vm3662_vm4 = vc.u32 %v7002_v36, %v7005_v9 }
 0xba7   :  { %v3663_v19 = vadd.s32 1, %v7006_v17  ;;  %v3425_v45 = vor.u32 %v3424_v60, %v3423_v44  ;;  %vm3431_vm5 = vcmp.lt.s32.totalorder %v6966_v0, 3  ;;  %v3428_v24 = vor.u32 %v3427_v3, %v3426_v10 }
 0xba8   :  { %vm3432_vm6 = vcmp.lt.s32.totalorder %v6966_v0, 4  ;;  %v3433_v6 = vsel %vm3429_vm1, %v3413_v4, %v3416_v48  ;;  %v3437_v50 = vsel %vm3429_vm1, %v3416_v48, %v3419_v2  ;;  %v3441_v16 = vsel %vm3429_vm1, %v3419_v2, %v3422_v46 }
 0xba9   :  { %v3664_v52 = vsel %vm3662_vm4, %v3663_v19, %v7006_v17  ;;  %v3434_v58 = vsel %vm3432_vm6, %v3422_v46, 2102212464  ;;  %v3438_v61 = vsel %vm3432_vm6, %v3425_v45, 920167782  ;;  %v3442_v33 = vsel %vm3432_vm6, %v3428_v24, 1326507024 }
 0xbaa   :  { %v3665_v40 = vadd.s32 %v3664_v52, %v3660_v15  ;;  %v3435_v5 = vsel %vm3431_vm5, %v3419_v2, %v3434_v58  ;;  %v3439_v63 = vsel %vm3431_vm5, %v3422_v46, %v3438_v61  ;;  %v3443_v18 = vsel %vm3431_vm5, %v3425_v45, %v3442_v33 }
 0xbab   :  { %v3436_v20 = vsel %vm3430_vm3, %v3433_v6, %v3435_v5  ;;  %v3440_v1 = vsel %vm3430_vm3, %v3437_v50, %v3439_v63  ;;  %v3721_v7 = vsel %vm3720_vm0, %v6969_v49, 0  ;;  %v3444_v12 = vsel %vm3430_vm3, %v3441_v16, %v3443_v18 }
 0xbac   :  { %v3666_v11 = vadd.s32 536870912, %v3665_v40  ;;  %v7034_v8 = vmul.u32.u64.low %v6964_v56, %v3440_v1  ;;  %v7035_v14 = vmul.u32.u64.high %v6964_v56, %v3440_v1, %v7034_v8  ;;  %v3722_v4 = vshrl.u32 %v3721_v7, 5 }
 0xbad   :  { %v7039_v62 = vmul.u32.u64.low %v6964_v56, %v3444_v12  ;;  %v7040_v59 = vmul.u32.u64.high %v6964_v56, %v3444_v12, %v7039_v62  ;;  %v3723_v13 = vand.u32 31, %v3721_v7  ;;  %v3452_v22 = vmul.u32 %v6964_v56, %v3436_v20 }
 0xbae   :  { %v7042_v21 = vshrl.u32 %v3666_v11, 30  ;;  %v7047_v49 = vshll.u32 %v3717_v38, 8  ;;  %v3455_v43 = vadd.s32 1, %v7035_v14  ;;  %v4565_v29 = vadd.s32 4294967169, %v6974_v54 }
 0xbaf   :  { %v3724_v23 = vsub.s32 32, %v3723_v13  ;;  %vm3454_vm8 = vc.u32 %v7040_v59, %v7034_v8  ;;  %v3726_v17 = vshll.u32 %v5014_v26, %v3723_v13  ;;  %v3729_v48 = vshll.u32 %v5015_v28, %v3723_v13 }
 0xbb0   :  { %v3668_v0 = vshll.u32 %v7042_v21, 30  ;;  %vm3741_vm7 = vcmp.lt.s32.totalorder %v3722_v4, 1  ;;  %v3456_v25 = vsel %vm3454_vm8, %v3455_v43, %v7035_v14  ;;  %v3732_v2 = vshll.u32 %v5016_v30, %v3723_v13 }
 0xbb1   :  { %v3727_v38 = vshrl.u32 %v5015_v28, %v3724_v23  ;;  %v3457_v31 = vadd.s32 %v3456_v25, %v3452_v22  ;;  %v3730_v39 = vshrl.u32 %v5016_v30, %v3724_v23  ;;  %v3733_v54 = vshrl.u32 %v5017_v32, %v3724_v23 }
 0xbb2   :  { %v7056_v56 = vsub.s32 %v3665_v40, %v3668_v0  ;;  %v3735_v15 = vshll.u32 %v5017_v32, %v3723_v13  ;;  %v3736_v3 = vshrl.u32 %v5018_v34, %v3724_v23  ;;  %v3738_v46 = vshll.u32 %v5018_v34, %v3723_v13 }
 0xbb3   :  { %v3728_v60 = vor.u32 %v3727_v38, %v3726_v17  ;;  %v3458_v10 = vadd.s32 536870912, %v3457_v31  ;;  %v3731_v19 = vor.u32 %v3730_v39, %v3729_v48  ;;  %v3734_v45 = vor.u32 %v3733_v54, %v3732_v2 }
 0xbb4   :  { %v3671_v44 = vsub.s32 0, %v7056_v56  ;;  %v3739_v24 = vshrl.u32 %v5019_v41, %v3724_v23  ;;  %v3737_v6 = vor.u32 %v3736_v3, %v3735_v15  ;;  %vm3742_vm9 = vcmp.lt.s32.totalorder %v3722_v4, 2 }
 0xbb5   :  { %vm3743_vm2 = vcmp.lt.s32.totalorder %v3722_v4, 3  ;;  %vm3744_vm11 = vcmp.lt.s32.totalorder %v3722_v4, 4  ;;  %v7068_v50 = vshrl.u32 %v3458_v10, 30  ;;  %v3749_v61 = vsel %vm3741_vm7, %v3728_v60, %v3731_v19 }
 0xbb6   :  { %v3740_v52 = vor.u32 %v3739_v24, %v3738_v46  ;;  %v3746_v58 = vsel %vm3744_vm11, %v3734_v45, 2102212464  ;;  %v3725_v16 = vshrl.u32 %v5014_v26, %v3724_v23  ;;  %v3750_v40 = vsel %vm3744_vm11, %v3737_v6, 920167782 }
 0xbb7   :  { %v3753_v5 = vsel %vm3741_vm7, %v3731_v19, %v3734_v45  ;;  %v3511_v63 = vadd.s32 1, %v4565_v29  ;;  %v4570_v33 = vmin.u32 %v3671_v44, %v7056_v56  ;;  %v3460_v20 = vshll.u32 %v7068_v50, 30 }
 0xbb8   :  { %v3751_v1 = vsel %vm3743_vm2, %v3734_v45, %v3750_v40  ;;  %v3754_v18 = vsel %vm3744_vm11, %v3740_v52, 1326507024  ;;  %v3745_v7 = vsel %vm3741_vm7, %v3725_v16, %v3728_v60  ;;  %v3747_v11 = vsel %vm3743_vm2, %v3731_v19, %v3746_v58 }
 0xbb9   :  { %v3752_v12 = vsel %vm3742_vm9, %v3749_v61, %v3751_v1  ;;  %v3755_v14 = vsel %vm3743_vm2, %v3737_v6, %v3754_v18  ;;  %v7080_v62 = vsub.s32 %v3457_v31, %v3460_v20  ;;  %vm3512_vm10 = vcmp.gt.s32.totalorder %v3511_v63, 0 }
 0xbba   :  { %v3756_v13 = vsel %vm3742_vm9, %v3753_v5, %v3755_v14  ;;  %v7084_v22 = vmul.u32.u64.low %v7047_v49, %v3752_v12  ;;  %v7085_v0 = vmul.u32.u64.high %v7047_v49, %v3752_v12, %v7084_v22  ;;  %v3748_v17 = vsel %vm3742_vm9, %v3745_v7, %v3747_v11 }
 0xbbb   :  { %v7089_v43 = vmul.u32.u64.low %v7047_v49, %v3756_v13  ;;  %v7090_v23 = vmul.u32.u64.high %v7047_v49, %v3756_v13, %v7089_v43  ;;  %v3463_v29 = vsub.s32 0, %v7080_v62  ;;  %v3513_v48 = vsel %vm3512_vm10, %v3511_v63, 0 }
 0xbbc   :  { %v3501_v25 = vand.u32 2147483647, %v6952_v47  ;;  %v3673_v38 = vclz %v4570_v33  ;;  %v3767_v31 = vadd.s32 1, %v7085_v0  ;;  %v3515_v39 = vand.u32 31, %v3513_v48 }
 0xbbd   :  { %v4562_v2 = vmin.u32 %v3463_v29, %v7080_v62  ;;  %v3764_v54 = vmul.u32 %v7047_v49, %v3748_v17  ;;  %vm3766_vm12 = vc.u32 %v7090_v23, %v7084_v22  ;;  %v3514_v58 = vshrl.u32 %v3513_v48, 5 }
 0xbbe   :  { %v3768_v44 = vsel %vm3766_vm12, %v3767_v31, %v7085_v0  ;;  %v3516_v60 = vsub.s32 32, %v3515_v39  ;;  %v4571_v3 = vadd.s32 4294967294, %v3673_v38  ;;  %v3508_v46 = vand.u32 8388607, %v3501_v25 }
 0xbbf   :  { %v3465_v15 = vclz %v4562_v2  ;;  %v3769_v4 = vadd.s32 %v3768_v44, %v3764_v54  ;;  %v3518_v61 = vshll.u32 %v5014_v26, %v3515_v39  ;;  %v3521_v40 = vshll.u32 %v5015_v28, %v3515_v39 }
 0xbc0   :  { %v3519_v45 = vshrl.u32 %v5015_v28, %v3516_v60  ;;  %v3522_v49 = vshrl.u32 %v5016_v30, %v3516_v60  ;;  %v3525_v6 = vshrl.u32 %v5017_v32, %v3516_v60  ;;  %vm4572_vm13 = vcmp.lt.s32.totalorder %v4571_v3, 0 }
 0xbc1   :  { %v3770_v10 = vadd.s32 536870912, %v3769_v4  ;;  %v4563_v19 = vadd.s32 4294967294, %v3465_v15  ;;  %v3509_v52 = vor.u32 8388608, %v3508_v46  ;;  %v3524_v5 = vshll.u32 %v5016_v30, %v3515_v39 }
 0xbc2   :  { %v3528_v63 = vshrl.u32 %v5018_v34, %v3516_v60  ;;  %v3520_v33 = vor.u32 %v3519_v45, %v3518_v61  ;;  %v3527_v20 = vshll.u32 %v5017_v32, %v3515_v39  ;;  %v3531_v1 = vshrl.u32 %v5019_v41, %v3516_v60 }
 0xbc3   :  { %v7104_v24 = vshrl.u32 %v3770_v10, 30  ;;  %vm4564_vm14 = vcmp.lt.s32.totalorder %v4563_v19, 0  ;;  %v3523_v7 = vor.u32 %v3522_v49, %v3521_v40  ;;  %v3526_v11 = vor.u32 %v3525_v6, %v3524_v5 }
 0xbc4   :  { %v3530_v12 = vshll.u32 %v5018_v34, %v3515_v39  ;;  %v3529_v14 = vor.u32 %v3528_v63, %v3527_v20  ;;  %v3468_v13 = vsel %vm4564_vm14, 0, %v4563_v19  ;;  %v7120_v29 = vsel %vm4572_vm13, 0, %v4571_v3 }
 0xbc5   :  { %v3772_v16 = vshll.u32 %v7104_v24, 30  ;;  %vm3533_vm0 = vcmp.lt.s32.totalorder %v3514_v58, 1  ;;  %vm3536_vm1 = vcmp.lt.s32.totalorder %v3514_v58, 4  ;;  %v3549_v17 = vshll.u32 %v3509_v52, 8 }
 0xbc6   :  { %v3532_v43 = vor.u32 %v3531_v1, %v3530_v12  ;;  %v3517_v38 = vshrl.u32 %v5014_v26, %v3516_v60  ;;  %v3538_v2 = vsel %vm3536_vm1, %v3526_v11, 2102212464  ;;  %v3541_v31 = vsel %vm3533_vm0, %v3520_v33, %v3523_v7 }
 0xbc7   :  { %v7115_v18 = vsub.s32 %v3769_v4, %v3772_v16  ;;  %v3473_v54 = vsub.s32 4294967266, %v3468_v13  ;;  %vm3534_vm3 = vcmp.lt.s32.totalorder %v3514_v58, 2  ;;  %vm3535_vm4 = vcmp.lt.s32.totalorder %v3514_v58, 3 }
 0xbc8   :  { %v3542_v39 = vsel %vm3536_vm1, %v3529_v14, 920167782  ;;  %v3545_v4 = vsel %vm3533_vm0, %v3523_v7, %v3526_v11  ;;  %v3546_v46 = vsel %vm3536_vm1, %v3532_v43, 1326507024  ;;  %v3537_v10 = vsel %vm3533_vm0, %v3517_v38, %v3520_v33 }
 0xbc9   :  { %v3775_v0 = vsub.s32 0, %v7115_v18  ;;  %v3543_v44 = vsel %vm3535_vm4, %v3526_v11, %v3542_v39  ;;  %v3539_v3 = vsel %vm3535_vm4, %v3523_v7, %v3538_v2  ;;  %v3547_v45 = vsel %vm3535_vm4, %v3529_v14, %v3546_v46 }
 0xbca   :  { %v3544_v19 = vsel %vm3534_vm3, %v3541_v31, %v3543_v44  ;;  %v3548_v6 = vsel %vm3534_vm3, %v3545_v4, %v3547_v45  ;;  %v3681_v40 = vsub.s32 4294967266, %v7120_v29  ;;  %v3540_v63 = vsel %vm3534_vm3, %v3537_v10, %v3539_v3 }
 0xbcb   :  { %v4574_v48 = vmin.u32 %v3775_v0, %v7115_v18  ;;  %v7126_v52 = vmul.u32.u64.low %v3549_v17, %v3544_v19  ;;  %v7127_v60 = vmul.u32.u64.high %v3549_v17, %v3544_v19, %v7126_v52  ;;  %v3474_v33 = vadd.s32 127, %v3473_v54 }
 0xbcc   :  { %v7130_v61 = vmul.u32.u64.low %v3549_v17, %v3548_v6  ;;  %v7131_v16 = vmul.u32.u64.high %v3549_v17, %v3548_v6, %v7130_v61  ;;  %v3469_v7 = vsub.s32 32, %v3468_v13  ;;  %v3556_v12 = vmul.u32 %v3549_v17, %v3540_v63 }
 0xbcd   :  { %v3777_v15 = vclz %v4574_v48  ;;  %v3559_v1 = vadd.s32 1, %v7127_v60  ;;  %v3682_v14 = vadd.s32 127, %v3681_v40  ;;  %v3453_v43 = vadd.s32 %v7034_v8, %v7040_v59 }
 0xbce   :  { %vm3558_vm6 = vc.u32 %v7131_v16, %v7126_v52  ;;  %v3475_v48 = vshll.u32 %v3474_v33, 23  ;;  %v3677_v2 = vsub.s32 32, %v7120_v29  ;;  %v3765_v54 = vadd.s32 %v7084_v22, %v7090_v23 }
 0xbcf   :  { %v4575_v49 = vadd.s32 4294967294, %v3777_v15  ;;  %v3560_v0 = vsel %vm3558_vm6, %v3559_v1, %v7127_v60  ;;  %v3471_v31 = vshrl.u32 %v3453_v43, %v3469_v7  ;;  %v3661_v17 = vadd.s32 %v7005_v9, %v7002_v36 }
 0xbd0   :  { %v3561_v58 = vadd.s32 %v3560_v0, %v3556_v12  ;;  %v3683_v44 = vshll.u32 %v3682_v14, 23  ;;  %v3470_v4 = vshll.u32 %v7080_v62, %v3468_v13  ;;  %v3476_v46 = vor.u32 4788187, %v3475_v48 }
 0xbd1   :  { %vm4576_vm5 = vcmp.lt.s32.totalorder %v4575_v49, 0  ;;  %v3679_v59 = vshrl.u32 %v3661_v17, %v3677_v2  ;;  %v3678_v22 = vshll.u32 %v7056_v56, %v7120_v29  ;;  %vm3399_vm7 = vcmp.lt.s32.totalorder %v6938_v51, 0 }
 0xbd2   :  { %v3780_v5 = vsel %vm4576_vm5, 0, %v4575_v49  ;;  %v3562_v15 = vadd.s32 536870912, %v3561_v58  ;;  %v3472_v3 = vor.u32 %v3471_v31, %v3470_v4  ;;  %v3684_v23 = vor.u32 4788187, %v3683_v44 }
 0xbd3   :  { %v3785_v20 = vsub.s32 4294967266, %v3780_v5  ;;  %v3781_v38 = vsub.s32 32, %v3780_v5  ;;  %v3782_v19 = vshll.u32 %v7115_v18, %v3780_v5  ;;  %v3477_v6 = vand.u32 2147483647, %v3476_v46 }
 0xbd4   :  { %v7147_v8 = vshrl.u32 %v3562_v15, 30  ;;  %v3680_v60 = vor.u32 %v3679_v59, %v3678_v22  ;;  %v3479_v62 = vcvt.s32.f32 %v3472_v3  ;;  %v3685_v40 = vand.u32 2147483647, %v3684_v23 }
 0xbd5   :  { %v3786_v11 = vadd.s32 127, %v3785_v20  ;;  %v3783_v10 = vshrl.u32 %v3765_v54, %v3781_v38  ;;  %v3557_v43 = vadd.s32 %v7126_v52, %v7131_v16  ;;  %vm7160_vm9 = vcmp.le.f32.partialorder %v3397_v37, 0.7853982 }
 0xbd6   :  { %v3564_v49 = vshll.u32 %v7147_v8, 30  ;;  %v3480_v63 = vmul.f32 %v3479_v62, %v3477_v6  ;;  %v3687_v1 = vcvt.s32.f32 %v3680_v60  ;;  %vm3711_vm2 = vcmp.lt.s32.totalorder %v6942_v42, 0 }
 0xbd7   :  { %v3787_v39 = vshll.u32 %v3786_v11, 23  ;;  %v3784_v36 = vor.u32 %v3783_v10, %v3782_v19  ;;  %vm3607_vm11 = vcmp.lt.s32.totalorder %v6936_v35, 0  ;;  %vm7175_vm10 = vcmp.le.f32.partialorder %v3709_v57, 0.7853982 }
 0xbd8   :  { %v3565_v9 = vsub.s32 %v3561_v58, %v3564_v49  ;;  %v3688_v7 = vmul.f32 %v3687_v1, %v3685_v40  ;;  %v3481_v11 = vxor.u32 2147483648, %v3480_v63  ;;  %vm7184_vm12 = vcmp.le.f32.partialorder %v3605_v53, 0.7853982 }
 0xbd9   :  { %v3788_v45 = vor.u32 4788187, %v3787_v39  ;;  %v3791_v33 = vcvt.s32.f32 %v3784_v36  ;;  %v3483_v10 = vsub.s32 4, %v7068_v50  ;;  %v3691_v59 = vsub.s32 4, %v7042_v21 }
 0xbda   :  { %v3567_v61 = vsub.s32 0, %v3565_v9  ;;  %v3689_v56 = vxor.u32 2147483648, %v3688_v7  ;;  %v3482_v0 = vsel %vm3399_vm7, %v3481_v11, %v3480_v63  ;;  %v3795_v3 = vsub.s32 4, %v7104_v24 }
 0xbdb   :  { %v3789_v13 = vand.u32 2147483647, %v3788_v45  ;;  %v3485_v52 = vsel %vm7160_vm9, %v6938_v51, %v3482_v0  ;;  %v3484_v49 = vsel %vm3399_vm7, %v3483_v10, %v7068_v50  ;;  %v3587_v22 = vsub.s32 4, %v7147_v8 }
 0xbdc   :  { %v4566_v20 = vmin.u32 %v3567_v61, %v3565_v9  ;;  %v3690_v37 = vsel %vm3607_vm11, %v3689_v56, %v3688_v7  ;;  %4979 = vcosq.f32 %v3485_v52  ;;  %v3692_v23 = vsel %vm3607_vm11, %v3691_v59, %v7042_v21 }
 0xbdd   :  { %v3792_v18 = vmul.f32 %v3791_v33, %v3789_v13  ;;  %v3693_v57 = vsel %vm7184_vm12, %v6936_v35, %v3690_v37  ;;  %4981 = vsinq.f32 %v3485_v52  ;;  %v3796_v6 = vsel %vm3711_vm2, %v3795_v3, %v7104_v24 }
 0xbde   :  { %v3569_v5 = vclz %v4566_v20  ;;  %vm7206_vm13 = vcmp.le.f32.partialorder %v3501_v25, 0.7853982  ;;  %vm3503_vm14 = vcmp.lt.s32.totalorder %v6952_v47, 0  ;;  %v3486_v50 = vsel %vm7160_vm9, 0, %v3484_v49 }
 0xbdf   :  { %v3793_v14 = vxor.u32 2147483648, %v3792_v18  ;;  %v3588_v62 = vsel %vm3503_vm14, %v3587_v22, %v7147_v8  ;;  %v3694_v21 = vsel %vm7184_vm12, 0, %v3692_v23  ;;  %v3798_v24 = vsel %vm7175_vm10, 0, %v3796_v6 }
 0xbe0   :  { %v4567_v12 = vadd.s32 4294967294, %v3569_v5  ;;  %v3490_v61 = vadd.s32 3, %v3486_v50  ;;  %v3590_v63 = vsel %vm7206_vm13, 0, %v3588_v62  ;;  %v3698_v33 = vadd.s32 3, %v3694_v21 }
 0xbe1   :  { %v3794_v2 = vsel %vm3711_vm2, %v3793_v14, %v3792_v18  ;;  %v3802_v8 = vadd.s32 3, %v3798_v24  ;;  %v3594_v7 = vadd.s32 3, %v3590_v63  ;;  %vm3489_vm11 = vweird.f32 %v6938_v51  ;;  %v4882_v51 = vld [vmem:[%s7508_s3 + $0x38] sm:$0xff]  }
 0xbe2   :  { %vm4568_vm8 = vcmp.lt.s32.totalorder %v4567_v12, 0  ;;  %v3797_v44 = vsel %vm7175_vm10, %v6942_v42, %v3794_v2  ;;  %v3491_v5 = vand.u32 3, %v3490_v61 }
 0xbe3   :  { %v3572_v29 = vsel %vm4568_vm8, 0, %v4567_v12  ;;  %4983 = vcosq.f32 %v3797_v44  ;;  %v3699_v12 = vand.u32 3, %v3698_v33  ;;  %v3803_v14 = vand.u32 3, %v3802_v8 }
 0xbe4   :  { %v3573_v48 = vsub.s32 32, %v3572_v29  ;;  %v3577_v38 = vsub.s32 4294967266, %v3572_v29  ;;  %v3574_v31 = vshll.u32 %v3565_v9, %v3572_v29  ;;  %4985 = vsinq.f32 %v3797_v44 }
 0xbe5   :  { %4987 = vsinq.f32 %v3693_v57  ;;  %vm3493_vm0 = vcmp.eq.s32.totalorder %v3491_v5, 0  ;;  %vm3496_vm1 = vcmp.eq.s32.totalorder %v3491_v5, 2  ;;  %vm3701_vm3 = vcmp.eq.s32.totalorder %v3699_v12, 0 }
 0xbe6   :  { %v3575_v54 = vshrl.u32 %v3557_v43, %v3573_v48  ;;  %v3578_v39 = vadd.s32 127, %v3577_v38  ;;  %4989 = vcosq.f32 %v3693_v57  ;;  %v4980_v13 = vpop.eup %4979  ;;  %v3595_v38 = vand.u32 3, %v3594_v7 }
 0xbe7   :  { %v4982_v40 = vpop.eup %4981  ;;  %v3497_v29 = vxor.u32 2147483648, %v4980_v13  ;;  %vm3805_vm4 = vcmp.eq.s32.totalorder %v3803_v14, 0  ;;  %vm3808_vm5 = vcmp.eq.s32.totalorder %v3803_v14, 2  ;;  %vm3492_vm6 = vcmp.lt.s32.totalorder %v3491_v5, 2 }
 0xbe8   :  { %v3576_v15 = vor.u32 %v3575_v54, %v3574_v31  ;;  %v3579_v17 = vshll.u32 %v3578_v39, 23  ;;  %v3494_v56 = vxor.u32 2147483648, %v4982_v40  ;;  %vm3704_vm8 = vcmp.eq.s32.totalorder %v3699_v12, 2 }
 0xbe9   :  { %v3498_v54 = vsel %vm3496_vm1, %v3497_v29, %v4982_v40  ;;  %vm3600_vm7 = vcmp.eq.s32.totalorder %v3595_v38, 2  ;;  %vm3804_vm9 = vcmp.lt.s32.totalorder %v3803_v14, 2  ;;  %vm3597_vm2 = vcmp.eq.s32.totalorder %v3595_v38, 0 }
 0xbea   :  { %v3580_v46 = vor.u32 4788187, %v3579_v17  ;;  %v3583_v45 = vcvt.s32.f32 %v3576_v15  ;;  %v3495_v31 = vsel %vm3493_vm0, %v4980_v13, %v3494_v56  ;;  %vm3596_vm10 = vcmp.lt.s32.totalorder %v3595_v38, 2 }
 0xbeb   :  { %v3499_v4 = vsel %vm3492_vm6, %v3495_v31, %v3498_v54  ;;  %vm3700_vm12 = vcmp.lt.s32.totalorder %v3699_v12, 2  ;;  %vm3697_vm0 = vweird.f32 %v6936_v35 }
 0xbec   :  { %v3581_v19 = vand.u32 2147483647, %v3580_v46 }
 0xbed   :  { %v4984_v20 = vpop.eup %4983 }
 0xbee   :  { %v3584_v53 = vmul.f32 %v3583_v45, %v3581_v19  ;;  %v4986_v1 = vpop.eup %4985  ;;  %v3809_v43 = vxor.u32 2147483648, %v4984_v20  ;;  %v3500_v19 = vsel %vm3489_vm11, nan, %v3499_v4 }
 0xbef   :  { %v4988_v18 = vpop.eup %4987  ;;  %v3806_v0 = vxor.u32 2147483648, %v4986_v1 }
 0xbf0   :  { %v3585_v36 = vxor.u32 2147483648, %v3584_v53  ;;  %v4990_v11 = vpop.eup %4989  ;;  %v3702_v48 = vxor.u32 2147483648, %v4988_v18  ;;  %v3810_v52 = vsel %vm3808_vm5, %v3809_v43, %v4986_v1 }
 0xbf1   :  { %v3705_v58 = vxor.u32 2147483648, %v4990_v11  ;;  %v3807_v39 = vsel %vm3805_vm4, %v4984_v20, %v3806_v0 }
 0xbf2   :  { %v3586_v60 = vsel %vm3503_vm14, %v3585_v36, %v3584_v53  ;;  %v3703_v15 = vsel %vm3701_vm3, %v4990_v11, %v3702_v48  ;;  %v3811_v10 = vsel %vm3804_vm9, %v3807_v39, %v3810_v52  ;;  %vm3801_vm14 = vweird.f32 %v6942_v42  ;;  %v3823_v42 = vpop.permute.xlu0 %3822 }
 0xbf3   :  { %v3589_v25 = vsel %vm7206_vm13, %v6952_v47, %v3586_v60  ;;  %v3706_v44 = vsel %vm3704_vm8, %v3705_v58, %v4988_v18  ;;  %vm3593_vm13 = vweird.f32 %v6952_v47  ;;  %v3812_v53 = vsel %vm3801_vm14, nan, %v3811_v10  ;;  %v3818_v47 = vpop.permute.xlu1 %3817 }
 0xbf4   :  { %4991 = vcosq.f32 %v3589_v25  ;;  %v3707_v3 = vsel %vm3700_vm12, %v3703_v15, %v3706_v44 }
 0xbf5   :  { %4993 = vsinq.f32 %v3589_v25  ;;  %v3708_v22 = vsel %vm3697_vm0, nan, %v3707_v3 }
 0xbf6   :  { %v3814_v23 = vpack.c.bf16 %v3812_v53, %v3708_v22  ;;  %v3833_v35 = vpop.permute.xlu0 %3832 }
 0xbf7   :  { %v3828_v6 = vpop.permute.xlu1 %3827 }
 0xbfe   :  { %v4992_v2 = vpop.eup %4991 }
 0xbff   :  { %v4994_v37 = vpop.eup %4993  ;;  %v3601_v16 = vxor.u32 2147483648, %v4992_v2 }
 0xc00   :  { %v3598_v17 = vxor.u32 2147483648, %v4994_v37 }
 0xc01   :  { %v3602_v46 = vsel %vm3600_vm7, %v3601_v16, %v4994_v37 }
 0xc02   :  { %v3599_v57 = vsel %vm3597_vm2, %v4992_v2, %v3598_v17 }
 0xc03   :  { %v3603_v59 = vsel %vm3596_vm10, %v3599_v57, %v3602_v46 }
 0xc04   :  { %v3604_v45 = vsel %vm3593_vm13, nan, %v3603_v59 }
 0xc05   :  { %v3813_v49 = vpack.c.bf16 %v3604_v45, %v3500_v19 }
 0xc07   :  { %4711 = vmatprep.subr.bf16.mxu0 %v3813_v49 }
 0xc08   :  { %4712 = vmatpush3.bf16.msra.mxu0 %v3813_v49 }
 0xc09   :  { %4713 = vmatprep.subr.bf16.mxu0 %v3814_v23 }
 0xc0c   :  { %4714 = vmatpush3.bf16.msra.mxu0 %v3814_v23 }
 0xc0f   :  { %4716 = vmatmul.mubr.msk.bf16.vlgmr.msra.gmra.mrb[20].mxu0 %vm590_vm15, %v4882_v51 }
 0xce2   :  { %v4717_v36 = vpop.f32.mrb[20].mxu0 }
 0xce3   :  { %v7231_v9 = vadd.f32 %v4717_v36, %v3828_v6  ;;  %v3885_v50 = vpop.f32.mrb[21].mxu0 }
 0xce4   :  { %v7233_v60 = vadd.f32 %v3885_v50, %v3818_v47  ;;  %v4718_v62 = vpop.f32.mrb[22].mxu0 }
 0xce5   :  { %v4108_v21 = vand.u32 2147483647, %v7231_v9  ;;  %v4111_v24 = vand.u32 2139095040, %v7231_v9  ;;  %v7237_v25 = vadd.f32 %v4718_v62, %v3833_v35  ;;  %v3888_v13 = vpop.f32.mrb[23].mxu0 }
 0xce6   :  { %v3900_v61 = vand.u32 2147483647, %v7233_v60  ;;  %v3903_v40 = vand.u32 2139095040, %v7233_v60  ;;  %v7252_v54 = vadd.f32 %v3888_v13, %v3823_v42 }
 0xce7   :  { %v4112_v63 = vshrl.u32 %v4111_v24, 23  ;;  %v4115_v33 = vand.u32 8388607, %v4108_v21  ;;  %v4215_v1 = vand.u32 2139095040, %v7237_v25 }
 0xce8   :  { %v3904_v8 = vshrl.u32 %v3903_v40, 23  ;;  %v3907_v20 = vand.u32 8388607, %v3900_v61 }
 0xce9   :  { %v4589_v18 = vadd.s32 4294967169, %v4112_v63  ;;  %v4216_v7 = vshrl.u32 %v4215_v1, 23  ;;  %v4116_v12 = vor.u32 8388608, %v4115_v33 }
 0xcea   :  { %v4581_v5 = vadd.s32 4294967169, %v3904_v8  ;;  %v3908_v14 = vor.u32 8388608, %v3907_v20 }
 0xceb   :  { %v4118_v11 = vadd.s32 1, %v4589_v18  ;;  %v4593_v29 = vadd.s32 4294967169, %v4216_v7  ;;  %v7246_v58 = vshll.u32 %v4116_v12, 8 }
 0xcec   :  { %v3910_v56 = vadd.s32 1, %v4581_v5  ;;  %v7248_v2 = vshll.u32 %v3908_v14, 8 }
 0xced   :  { %vm4119_vm1 = vcmp.gt.s32.totalorder %v4118_v11, 0  ;;  %v7250_v31 = vadd.s32 1, %v4593_v29 }
 0xcee   :  { %v4120_v0 = vsel %vm4119_vm1, %v4118_v11, 0  ;;  %vm3911_vm3 = vcmp.gt.s32.totalorder %v3910_v56, 0 }
 0xcef   :  { %v4121_v43 = vshrl.u32 %v4120_v0, 5  ;;  %v4122_v48 = vand.u32 31, %v4120_v0  ;;  %v3912_v38 = vsel %vm3911_vm3, %v3910_v56, 0  ;;  %vm4223_vm7 = vcmp.gt.s32.totalorder %v7250_v31, 0 }
 0xcf0   :  { %v7255_v37 = vshrl.u32 %v3912_v38, 5  ;;  %v3914_v16 = vand.u32 31, %v3912_v38 }
 0xcf1   :  { %v4123_v39 = vsub.s32 32, %v4122_v48  ;;  %v4125_v52 = vshll.u32 %v5014_v26, %v4122_v48  ;;  %v4128_v15 = vshll.u32 %v5015_v28, %v4122_v48  ;;  %v4131_v17 = vshll.u32 %v5016_v30, %v4122_v48 }
 0xcf2   :  { %v4134_v44 = vshll.u32 %v5017_v32, %v4122_v48  ;;  %v4137_v4 = vshll.u32 %v5018_v34, %v4122_v48  ;;  %vm4140_vm4 = vcmp.lt.s32.totalorder %v4121_v43, 1  ;;  %vm4141_vm5 = vcmp.lt.s32.totalorder %v4121_v43, 2 }
 0xcf3   :  { %v4126_v46 = vshrl.u32 %v5015_v28, %v4123_v39  ;;  %v4129_v10 = vshrl.u32 %v5016_v30, %v4123_v39  ;;  %v4132_v57 = vshrl.u32 %v5017_v32, %v4123_v39  ;;  %v4124_v59 = vshrl.u32 %v5014_v26, %v4123_v39 }
 0xcf4   :  { %v4135_v3 = vshrl.u32 %v5018_v34, %v4123_v39  ;;  %v4138_v19 = vshrl.u32 %v5019_v41, %v4123_v39  ;;  %v3915_v22 = vsub.s32 32, %v3914_v16  ;;  %vm4142_vm6 = vcmp.lt.s32.totalorder %v4121_v43, 3 }
 0xcf5   :  { %v4127_v45 = vor.u32 %v4126_v46, %v4125_v52  ;;  %v4130_v53 = vor.u32 %v4129_v10, %v4128_v15  ;;  %v4133_v49 = vor.u32 %v4132_v57, %v4131_v17  ;;  %vm4143_vm8 = vcmp.lt.s32.totalorder %v4121_v43, 4 }
 0xcf6   :  { %v4136_v23 = vor.u32 %v4135_v3, %v4134_v44  ;;  %v4139_v51 = vor.u32 %v4138_v19, %v4137_v4  ;;  %v3917_v24 = vshll.u32 %v5014_v26, %v3914_v16  ;;  %v3918_v63 = vshrl.u32 %v5015_v28, %v3915_v22 }
 0xcf7   :  { %v4144_v47 = vsel %vm4140_vm4, %v4124_v59, %v4127_v45  ;;  %v4145_v42 = vsel %vm4143_vm8, %v4133_v49, 2102212464  ;;  %v4148_v6 = vsel %vm4140_vm4, %v4127_v45, %v4130_v53  ;;  %v4152_v36 = vsel %vm4140_vm4, %v4130_v53, %v4133_v49 }
 0xcf8   :  { %v4146_v50 = vsel %vm4142_vm6, %v4130_v53, %v4145_v42  ;;  %v4149_v35 = vsel %vm4143_vm8, %v4136_v23, 920167782  ;;  %v4153_v62 = vsel %vm4143_vm8, %v4139_v51, 1326507024  ;;  %v3920_v33 = vshll.u32 %v5015_v28, %v3914_v16 }
 0xcf9   :  { %v4150_v13 = vsel %vm4142_vm6, %v4133_v49, %v4149_v35  ;;  %v4154_v40 = vsel %vm4142_vm6, %v4136_v23, %v4153_v62  ;;  %v4147_v8 = vsel %vm4141_vm5, %v4144_v47, %v4146_v50  ;;  %v3921_v18 = vshrl.u32 %v5016_v30, %v3915_v22 }
 0xcfa   :  { %v4151_v20 = vsel %vm4141_vm5, %v4148_v6, %v4150_v13  ;;  %v4155_v1 = vsel %vm4141_vm5, %v4152_v36, %v4154_v40  ;;  %v3919_v14 = vor.u32 %v3918_v63, %v3917_v24  ;;  %v3923_v29 = vshll.u32 %v5016_v30, %v3914_v16 }
 0xcfb   :  { %v7279_v5 = vmul.u32.u64.low %v7246_v58, %v4155_v1  ;;  %v7280_v7 = vmul.u32.u64.high %v7246_v58, %v4155_v1, %v7279_v5  ;;  %v7283_v11 = vmul.u32.u64.low %v7246_v58, %v4151_v20  ;;  %v7284_v12 = vmul.u32.u64.high %v7246_v58, %v4151_v20, %v7283_v11 }
 0xcfc   :  { %v3922_v56 = vor.u32 %v3921_v18, %v3920_v33  ;;  %v3924_v0 = vshrl.u32 %v5017_v32, %v3915_v22  ;;  %v3916_v43 = vshrl.u32 %v5014_v26, %v3915_v22  ;;  %v3926_v48 = vshll.u32 %v5017_v32, %v3914_v16 }
 0xcfd   :  { %v3927_v38 = vshrl.u32 %v5018_v34, %v3915_v22  ;;  %v3930_v39 = vshrl.u32 %v5019_v41, %v3915_v22  ;;  %v4163_v52 = vmul.u32 %v7246_v58, %v4147_v8  ;;  %v3929_v17 = vshll.u32 %v5018_v34, %v3914_v16 }
 0xcfe   :  { %v3925_v15 = vor.u32 %v3924_v0, %v3923_v29  ;;  %vm3932_vm9 = vcmp.lt.s32.totalorder %v7255_v37, 1  ;;  %vm4165_vm2 = vc.u32 %v7280_v7, %v7283_v11  ;;  %v4166_v44 = vadd.s32 1, %v7284_v12 }
 0xcff   :  { %v3928_v4 = vor.u32 %v3927_v38, %v3926_v48  ;;  %vm3933_vm11 = vcmp.lt.s32.totalorder %v7255_v37, 2  ;;  %v3931_v46 = vor.u32 %v3930_v39, %v3929_v17  ;;  %vm3934_vm10 = vcmp.lt.s32.totalorder %v7255_v37, 3 }
 0xd00   :  { %vm3935_vm12 = vcmp.lt.s32.totalorder %v7255_v37, 4  ;;  %v3940_v10 = vsel %vm3932_vm9, %v3919_v14, %v3922_v56  ;;  %v4167_v58 = vsel %vm4165_vm2, %v4166_v44, %v7284_v12  ;;  %v3944_v59 = vsel %vm3932_vm9, %v3922_v56, %v3925_v15 }
 0xd01   :  { %v3937_v57 = vsel %vm3935_vm12, %v3925_v15, 2102212464  ;;  %v3941_v16 = vsel %vm3935_vm12, %v3928_v4, 920167782  ;;  %v4168_v3 = vadd.s32 %v4167_v58, %v4163_v52  ;;  %v3936_v19 = vsel %vm3932_vm9, %v3916_v43, %v3919_v14 }
 0xd02   :  { %v3942_v45 = vsel %vm3934_vm10, %v3925_v15, %v3941_v16  ;;  %v3945_v53 = vsel %vm3935_vm12, %v3931_v46, 1326507024  ;;  %v3938_v49 = vsel %vm3934_vm10, %v3922_v56, %v3937_v57  ;;  %v4224_v51 = vsel %vm4223_vm7, %v7250_v31, 0 }
 0xd03   :  { %v3943_v22 = vsel %vm3933_vm11, %v3940_v10, %v3942_v45  ;;  %v3946_v23 = vsel %vm3934_vm10, %v3928_v4, %v3945_v53  ;;  %v4169_v36 = vadd.s32 536870912, %v4168_v3  ;;  %v3939_v62 = vsel %vm3933_vm11, %v3936_v19, %v3938_v49 }
 0xd04   :  { %v3947_v47 = vsel %vm3933_vm11, %v3944_v59, %v3946_v23  ;;  %v7311_v42 = vmul.u32.u64.low %v7248_v2, %v3943_v22  ;;  %v7312_v6 = vmul.u32.u64.high %v7248_v2, %v3943_v22, %v7311_v42  ;;  %v4212_v24 = vand.u32 2147483647, %v7237_v25 }
 0xd05   :  { %v7316_v50 = vmul.u32.u64.low %v7248_v2, %v3947_v47  ;;  %v7317_v35 = vmul.u32.u64.high %v7248_v2, %v3947_v47, %v7316_v50  ;;  %v4226_v13 = vand.u32 31, %v4224_v51  ;;  %v4007_v31 = vand.u32 2139095040, %v7252_v54 }
 0xd06   :  { %v3958_v40 = vadd.s32 1, %v7312_v6  ;;  %v7324_v33 = vshrl.u32 %v4169_v36, 30  ;;  %v3955_v8 = vmul.u32 %v7248_v2, %v3939_v62  ;;  %v4219_v37 = vand.u32 8388607, %v4212_v24 }
 0xd07   :  { %v4227_v63 = vsub.s32 32, %v4226_v13  ;;  %vm3957_vm13 = vc.u32 %v7317_v35, %v7311_v42  ;;  %v4008_v1 = vshrl.u32 %v4007_v31, 23  ;;  %v4229_v5 = vshll.u32 %v5014_v26, %v4226_v13 }
 0xd08   :  { %v3959_v20 = vsel %vm3957_vm13, %v3958_v40, %v7312_v6  ;;  %v4225_v56 = vshrl.u32 %v4224_v51, 5  ;;  %v4232_v29 = vshll.u32 %v5015_v28, %v4226_v13  ;;  %v4235_v2 = vshll.u32 %v5016_v30, %v4226_v13 }
 0xd09   :  { %v3960_v18 = vadd.s32 %v3959_v20, %v3955_v8  ;;  %v4230_v12 = vshrl.u32 %v5015_v28, %v4227_v63  ;;  %v4233_v14 = vshrl.u32 %v5016_v30, %v4227_v63  ;;  %v4236_v0 = vshrl.u32 %v5017_v32, %v4227_v63 }
 0xd0a   :  { %v4171_v43 = vshll.u32 %v7324_v33, 30  ;;  %v4238_v15 = vshll.u32 %v5017_v32, %v4226_v13  ;;  %v4239_v17 = vshrl.u32 %v5018_v34, %v4227_v63  ;;  %v4241_v4 = vshll.u32 %v5018_v34, %v4226_v13 }
 0xd0b   :  { %v3961_v48 = vadd.s32 536870912, %v3960_v18  ;;  %v4231_v38 = vor.u32 %v4230_v12, %v4229_v5  ;;  %v4234_v39 = vor.u32 %v4233_v14, %v4232_v29  ;;  %v4237_v52 = vor.u32 %v4236_v0, %v4235_v2 }
 0xd0c   :  { %v4242_v46 = vshrl.u32 %v5019_v41, %v4227_v63  ;;  %v4585_v10 = vadd.s32 4294967169, %v4008_v1  ;;  %v4220_v58 = vor.u32 8388608, %v4219_v37  ;;  %v4240_v57 = vor.u32 %v4239_v17, %v4238_v15 }
 0xd0d   :  { %v7341_v44 = vshrl.u32 %v3961_v48, 30  ;;  %vm4244_vm14 = vcmp.lt.s32.totalorder %v4225_v56, 1  ;;  %vm4246_vm0 = vcmp.lt.s32.totalorder %v4225_v56, 3  ;;  %vm4247_vm1 = vcmp.lt.s32.totalorder %v4225_v56, 4 }
 0xd0e   :  { %v4243_v59 = vor.u32 %v4242_v46, %v4241_v4  ;;  %v7346_v19 = vsub.s32 %v4168_v3, %v4171_v43  ;;  %v4252_v45 = vsel %vm4244_vm14, %v4231_v38, %v4234_v39  ;;  %v4253_v53 = vsel %vm4247_vm1, %v4240_v57, 920167782 }
 0xd0f   :  { %v3963_v16 = vshll.u32 %v7341_v44, 30  ;;  %v4256_v49 = vsel %vm4244_vm14, %v4234_v39, %v4237_v52  ;;  %v4254_v22 = vsel %vm4246_vm0, %v4237_v52, %v4253_v53  ;;  %v4014_v51 = vadd.s32 1, %v4585_v10 }
 0xd10   :  { %v4257_v23 = vsel %vm4247_vm1, %v4243_v59, 1326507024  ;;  %v4228_v47 = vshrl.u32 %v5014_v26, %v4227_v63  ;;  %vm4245_vm3 = vcmp.lt.s32.totalorder %v4225_v56, 2  ;;  %v4249_v6 = vsel %vm4247_vm1, %v4237_v52, 2102212464 }
 0xd11   :  { %v4258_v36 = vsel %vm4246_vm0, %v4240_v57, %v4257_v23  ;;  %v7353_v50 = vsub.s32 %v3960_v18, %v3963_v16  ;;  %v4255_v3 = vsel %vm4245_vm3, %v4252_v45, %v4254_v22  ;;  %v4260_v13 = vshll.u32 %v4220_v58, 8 }
 0xd12   :  { %v4259_v62 = vsel %vm4245_vm3, %v4256_v49, %v4258_v36  ;;  %v4174_v31 = vsub.s32 0, %v7346_v19  ;;  %v4248_v40 = vsel %vm4244_vm14, %v4228_v47, %v4231_v38  ;;  %v4250_v8 = vsel %vm4246_vm0, %v4234_v39, %v4249_v6 }
 0xd13   :  { %v7360_v20 = vmul.u32.u64.low %v4260_v13, %v4259_v62  ;;  %v7361_v37 = vmul.u32.u64.high %v4260_v13, %v4259_v62, %v7360_v20  ;;  %vm4015_vm4 = vcmp.gt.s32.totalorder %v4014_v51, 0  ;;  %v3966_v18 = vsub.s32 0, %v7353_v50 }
 0xd14   :  { %v7363_v63 = vmul.u32.u64.low %v4260_v13, %v4255_v3  ;;  %v7364_v1 = vmul.u32.u64.high %v4260_v13, %v4255_v3, %v7363_v63  ;;  %v4016_v5 = vsel %vm4015_vm4, %v4014_v51, 0  ;;  %v4251_v12 = vsel %vm4245_vm3, %v4248_v40, %v4250_v8 }
 0xd15   :  { %v4018_v14 = vand.u32 31, %v4016_v5  ;;  %v4590_v29 = vmin.u32 %v4174_v31, %v7346_v19  ;;  %v4582_v0 = vmin.u32 %v3966_v18, %v7353_v50  ;;  %v4267_v43 = vmul.u32 %v4260_v13, %v4251_v12 }
 0xd16   :  { %vm4269_vm5 = vc.u32 %v7361_v37, %v7363_v63  ;;  %v4270_v2 = vadd.s32 1, %v7364_v1  ;;  %v4004_v38 = vand.u32 2147483647, %v7252_v54  ;;  %v4017_v47 = vshrl.u32 %v4016_v5, 5 }
 0xd17   :  { %v4019_v39 = vsub.s32 32, %v4018_v14  ;;  %v4176_v52 = vclz %v4590_v29  ;;  %v3968_v56 = vclz %v4582_v0  ;;  %v4021_v45 = vshll.u32 %v5014_v26, %v4018_v14 }
 0xd18   :  { %v4271_v48 = vsel %vm4269_vm5, %v4270_v2, %v7364_v1  ;;  %v4011_v4 = vand.u32 8388607, %v4004_v38  ;;  %v4024_v53 = vshll.u32 %v5015_v28, %v4018_v14  ;;  %v4030_v49 = vshll.u32 %v5017_v32, %v4018_v14 }
 0xd19   :  { %v4272_v15 = vadd.s32 %v4271_v48, %v4267_v43  ;;  %v4022_v46 = vshrl.u32 %v5015_v28, %v4019_v39  ;;  %v4025_v10 = vshrl.u32 %v5016_v30, %v4019_v39  ;;  %v4591_v58 = vadd.s32 4294967294, %v4176_v52 }
 0xd1a   :  { %v4028_v16 = vshrl.u32 %v5017_v32, %v4019_v39  ;;  %v4031_v59 = vshrl.u32 %v5018_v34, %v4019_v39  ;;  %v4034_v22 = vshrl.u32 %v5019_v41, %v4019_v39  ;;  %v4583_v23 = vadd.s32 4294967294, %v3968_v56 }
 0xd1b   :  { %v4273_v17 = vadd.s32 536870912, %v4272_v15  ;;  %v4027_v6 = vshll.u32 %v5016_v30, %v4018_v14  ;;  %v4023_v36 = vor.u32 %v4022_v46, %v4021_v45  ;;  %v4026_v3 = vor.u32 %v4025_v10, %v4024_v53 }
 0xd1c   :  { %v4032_v62 = vor.u32 %v4031_v59, %v4030_v49  ;;  %v4033_v13 = vshll.u32 %v5018_v34, %v4018_v14  ;;  %vm4592_vm6 = vcmp.lt.s32.totalorder %v4591_v58, 0  ;;  %v4012_v28 = vor.u32 8388608, %v4011_v4 }
 0xd1d   :  { %v7380_v57 = vshrl.u32 %v4273_v17, 30  ;;  %v4029_v40 = vor.u32 %v4028_v16, %v4027_v6  ;;  %vm4584_vm8 = vcmp.lt.s32.totalorder %v4583_v23, 0  ;;  %vm4036_vm7 = vcmp.lt.s32.totalorder %v4017_v47, 1 }
 0xd1e   :  { %v4035_v8 = vor.u32 %v4034_v22, %v4033_v13  ;;  %vm4039_vm9 = vcmp.lt.s32.totalorder %v4017_v47, 4  ;;  %v4020_v41 = vshrl.u32 %v5014_v26, %v4019_v39  ;;  %vm4038_vm2 = vcmp.lt.s32.totalorder %v4017_v47, 3 }
 0xd1f   :  { %v4275_v51 = vshll.u32 %v7380_v57, 30  ;;  %v4044_v30 = vsel %vm4036_vm7, %v4023_v36, %v4026_v3  ;;  %v4045_v20 = vsel %vm4039_vm9, %v4032_v62, 920167782  ;;  %vm4037_vm11 = vcmp.lt.s32.totalorder %v4017_v47, 2 }
 0xd20   :  { %v4041_v34 = vsel %vm4039_vm9, %v4029_v40, 2102212464  ;;  %v4046_v18 = vsel %vm4038_vm2, %v4029_v40, %v4045_v20  ;;  %v4048_v12 = vsel %vm4036_vm7, %v4026_v3, %v4029_v40  ;;  %v4049_v14 = vsel %vm4039_vm9, %v4035_v8, 1326507024 }
 0xd21   :  { %v7391_v31 = vsub.s32 %v4272_v15, %v4275_v51  ;;  %v4047_v5 = vsel %vm4037_vm11, %v4044_v30, %v4046_v18  ;;  %v4052_v29 = vshll.u32 %v4012_v28, 8  ;;  %v3971_v2 = vsel %vm4584_vm8, 0, %v4583_v23 }
 0xd22   :  { %v4040_v26 = vsel %vm4036_vm7, %v4020_v41, %v4023_v36  ;;  %v4050_v43 = vsel %vm4038_vm2, %v4032_v62, %v4049_v14  ;;  %v4042_v48 = vsel %vm4038_vm2, %v4026_v3, %v4041_v34  ;;  %v4179_v46 = vsel %vm4592_vm6, 0, %v4591_v58 }
 0xd23   :  { %v4278_v32 = vsub.s32 0, %v7391_v31  ;;  %v4051_v39 = vsel %vm4037_vm11, %v4048_v12, %v4050_v43  ;;  %v7402_v52 = vmul.u32.u64.low %v4052_v29, %v4047_v5  ;;  %v7403_v15 = vmul.u32.u64.high %v4052_v29, %v4047_v5, %v7402_v52 }
 0xd24   :  { %v7405_v17 = vmul.u32.u64.low %v4052_v29, %v4051_v39  ;;  %v7406_v4 = vmul.u32.u64.high %v4052_v29, %v4051_v39, %v7405_v17  ;;  %v3976_v10 = vsub.s32 4294967266, %v3971_v2  ;;  %v4043_v16 = vsel %vm4037_vm11, %v4040_v26, %v4042_v48 }
 0xd25   :  { %v4594_v1 = vmin.u32 %v4278_v32, %v7391_v31  ;;  %v4062_v45 = vadd.s32 1, %v7403_v15  ;;  %v4184_v53 = vsub.s32 4294967266, %v4179_v46  ;;  %v4059_v23 = vmul.u32 %v4052_v29, %v4043_v16 }
 0xd26   :  { %v3977_v22 = vadd.s32 127, %v3976_v10  ;;  %vm4061_vm12 = vc.u32 %v7406_v4, %v7402_v52  ;;  %v3972_v6 = vsub.s32 32, %v3971_v2  ;;  %v3956_v58 = vadd.s32 %v7311_v42, %v7317_v35 }
 0xd27   :  { %v4280_v0 = vclz %v4594_v1  ;;  %v4063_v51 = vsel %vm4061_vm12, %v4062_v45, %v7403_v15  ;;  %v4185_v62 = vadd.s32 127, %v4184_v53  ;;  %v4180_v28 = vsub.s32 32, %v4179_v46 }
 0xd28   :  { %v4064_v3 = vadd.s32 %v4063_v51, %v4059_v23  ;;  %v3978_v47 = vshll.u32 %v3977_v22, 23  ;;  %v3974_v8 = vshrl.u32 %v3956_v58, %v3972_v6  ;;  %v4268_v32 = vadd.s32 %v7363_v63, %v7361_v37 }
 0xd29   :  { %v4595_v56 = vadd.s32 4294967294, %v4280_v0  ;;  %v4164_v20 = vadd.s32 %v7283_v11, %v7280_v7  ;;  %v4186_v1 = vshll.u32 %v4185_v62, 23  ;;  %v3973_v34 = vshll.u32 %v7353_v50, %v3971_v2 }
 0xd2a   :  { %v4065_v40 = vadd.s32 536870912, %v4064_v3  ;;  %v3979_v18 = vor.u32 4788187, %v3978_v47  ;;  %v4181_v37 = vshll.u32 %v7346_v19, %v4179_v46  ;;  %v4060_v46 = vadd.s32 %v7402_v52, %v7406_v4 }
 0xd2b   :  { %vm4596_vm10 = vcmp.lt.s32.totalorder %v4595_v56, 0  ;;  %v4182_v35 = vshrl.u32 %v4164_v20, %v4180_v28  ;;  %v3975_v12 = vor.u32 %v3974_v8, %v3973_v34  ;;  %v4187_v63 = vor.u32 4788187, %v4186_v1 }
 0xd2c   :  { %v4283_v59 = vsel %vm4596_vm10, 0, %v4595_v56  ;;  %v7417_v30 = vshrl.u32 %v4065_v40, 30  ;;  %v3980_v26 = vand.u32 2147483647, %v3979_v18  ;;  %vm3902_vm14 = vcmp.lt.s32.totalorder %v7233_v60, 0 }
 0xd2d   :  { %v4288_v49 = vsub.s32 4294967266, %v4283_v59  ;;  %v4284_v13 = vsub.s32 32, %v4283_v59  ;;  %v4285_v14 = vshll.u32 %v7391_v31, %v4283_v59  ;;  %v4183_v7 = vor.u32 %v4182_v35, %v4181_v37 }
 0xd2e   :  { %v4067_v42 = vshll.u32 %v7417_v30, 30  ;;  %v3982_v11 = vcvt.s32.f32 %v3975_v12  ;;  %v4188_v2 = vand.u32 2147483647, %v4187_v63  ;;  %vm4214_vm0 = vcmp.lt.s32.totalorder %v7237_v25, 0 }
 0xd2f   :  { %v4289_v36 = vadd.s32 127, %v4288_v49  ;;  %v4286_v5 = vshrl.u32 %v4268_v32, %v4284_v13  ;;  %v4190_v10 = vcvt.s32.f32 %v4183_v7  ;;  %vm7432_vm1 = vcmp.le.f32.partialorder %v3900_v61, 0.7853982 }
 0xd30   :  { %v4068_v0 = vsub.s32 %v4064_v3, %v4067_v42  ;;  %v3983_v15 = vmul.f32 %v3982_v11, %v3980_v26  ;;  %vm4110_vm3 = vcmp.lt.s32.totalorder %v7231_v9, 0  ;;  %vm7446_vm4 = vcmp.le.f32.partialorder %v4212_v24, 0.7853982 }
 0xd31   :  { %v4290_v41 = vshll.u32 %v4289_v36, 23  ;;  %v4287_v43 = vor.u32 %v4286_v5, %v4285_v14  ;;  %v4191_v31 = vmul.f32 %v4190_v10, %v4188_v2  ;;  %vm7452_vm5 = vcmp.le.f32.partialorder %v4108_v21, 0.7853982 }
 0xd32   :  { %v4070_v48 = vsub.s32 0, %v4068_v0  ;;  %v3984_v59 = vxor.u32 2147483648, %v3983_v15  ;;  %v3986_v8 = vsub.s32 4, %v7341_v44  ;;  %v4298_v21 = vsub.s32 4, %v7380_v57 }
 0xd33   :  { %v4291_v29 = vor.u32 4788187, %v4290_v41  ;;  %v4294_v56 = vcvt.s32.f32 %v4287_v43  ;;  %v4192_v23 = vxor.u32 2147483648, %v4191_v31  ;;  %v4194_v41 = vsub.s32 4, %v7324_v33 }
 0xd34   :  { %v4586_v50 = vmin.u32 %v4070_v48, %v4068_v0  ;;  %v3985_v51 = vsel %vm3902_vm14, %v3984_v59, %v3983_v15  ;;  %v4090_v18 = vsub.s32 4, %v7417_v30  ;;  %v3987_v5 = vsel %vm3902_vm14, %v3986_v8, %v7341_v44 }
 0xd35   :  { %v4292_v39 = vand.u32 2147483647, %v4291_v29  ;;  %v3988_v47 = vsel %vm7432_vm1, %v7233_v60, %v3985_v51  ;;  %v4193_v13 = vsel %vm4110_vm3, %v4192_v23, %v4191_v31  ;;  %v4195_v42 = vsel %vm4110_vm3, %v4194_v41, %v7324_v33 }
 0xd36   :  { %v4072_v17 = vclz %v4586_v50  ;;  %4995 = vcosq.f32 %v3988_v47  ;;  %v4196_v1 = vsel %vm7452_vm5, %v7231_v9, %v4193_v13  ;;  %v4299_v12 = vsel %vm4214_vm0, %v4298_v21, %v7380_v57 }
 0xd37   :  { %v4295_v16 = vmul.f32 %v4294_v56, %v4292_v39  ;;  %4997 = vsinq.f32 %v3988_v47  ;;  %vm4006_vm6 = vcmp.lt.s32.totalorder %v7252_v54, 0  ;;  %v3989_v14 = vsel %vm7432_vm1, 0, %v3987_v5 }
 0xd38   :  { %v4587_v45 = vadd.s32 4294967294, %v4072_v17  ;;  %vm4005_vm8 = vcmp.le.f32.partialorder %v4004_v38, 0.7853982  ;;  %v4091_v29 = vsel %vm4006_vm6, %v4090_v18, %v7417_v30  ;;  %v4197_v33 = vsel %vm7452_vm5, 0, %v4195_v42 }
 0xd39   :  { %v4296_v19 = vxor.u32 2147483648, %v4295_v16  ;;  %v4301_v37 = vsel %vm7446_vm4, 0, %v4299_v12  ;;  %v3993_v57 = vadd.s32 3, %v3989_v14  ;;  %v4093_v63 = vsel %vm4005_vm8, 0, %v4091_v29 }
 0xd3a   :  { %vm4588_vm13 = vcmp.lt.s32.totalorder %v4587_v45, 0  ;;  %v4201_v43 = vadd.s32 3, %v4197_v33  ;;  %v4305_v7 = vadd.s32 3, %v4301_v37  ;;  %v4097_v11 = vadd.s32 3, %v4093_v63 }
 0xd3b   :  { %v4075_v53 = vsel %vm4588_vm13, 0, %v4587_v45  ;;  %v4297_v52 = vsel %vm4214_vm0, %v4296_v19, %v4295_v16  ;;  %v3994_v30 = vand.u32 3, %v3993_v57  ;;  %vm4096_vm5 = vweird.f32 %v7252_v54 }
 0xd3c   :  { %v4076_v49 = vsub.s32 32, %v4075_v53  ;;  %v4080_v22 = vsub.s32 4294967266, %v4075_v53  ;;  %v4077_v6 = vshll.u32 %v4068_v0, %v4075_v53  ;;  %v4300_v32 = vsel %vm7446_vm4, %v7237_v25, %v4297_v52 }
 0xd3d   :  { %4999 = vcosq.f32 %v4300_v32  ;;  %v4202_v56 = vand.u32 3, %v4201_v43  ;;  %v4306_v10 = vand.u32 3, %v4305_v7  ;;  %v4098_v16 = vand.u32 3, %v4097_v11 }
 0xd3e   :  { %v4078_v36 = vshrl.u32 %v4060_v46, %v4076_v49  ;;  %v4081_v3 = vadd.s32 127, %v4080_v22  ;;  %5001 = vsinq.f32 %v4300_v32  ;;  %vm3995_vm7 = vcmp.lt.s32.totalorder %v3994_v30, 2 }
 0xd3f   :  { %5003 = vsinq.f32 %v4196_v1  ;;  %vm3996_vm9 = vcmp.eq.s32.totalorder %v3994_v30, 0  ;;  %vm3999_vm2 = vcmp.eq.s32.totalorder %v3994_v30, 2  ;;  %vm4204_vm11 = vcmp.eq.s32.totalorder %v4202_v56, 0 }
 0xd40   :  { %v4079_v4 = vor.u32 %v4078_v36, %v4077_v6  ;;  %v4082_v58 = vshll.u32 %v4081_v3, 23  ;;  %5005 = vcosq.f32 %v4196_v1  ;;  %v4996_v26 = vpop.eup %4995  ;;  %vm4207_vm10 = vcmp.eq.s32.totalorder %v4202_v56, 2 }
 0xd41   :  { %v4998_v48 = vpop.eup %4997  ;;  %v4000_v15 = vxor.u32 2147483648, %v4996_v26  ;;  %vm4308_vm12 = vcmp.eq.s32.totalorder %v4306_v10, 0  ;;  %vm4311_vm13 = vcmp.eq.s32.totalorder %v4306_v10, 2  ;;  %vm4103_vm14 = vcmp.eq.s32.totalorder %v4098_v16, 2 }
 0xd42   :  { %v4083_v40 = vor.u32 4788187, %v4082_v58  ;;  %v4086_v20 = vcvt.s32.f32 %v4079_v4  ;;  %v3997_v2 = vxor.u32 2147483648, %v4998_v48  ;;  %vm4100_vm0 = vcmp.eq.s32.totalorder %v4098_v16, 0 }
 0xd43   :  { %v4001_v46 = vsel %vm3999_vm2, %v4000_v15, %v4998_v48  ;;  %vm4099_vm1 = vcmp.lt.s32.totalorder %v4098_v16, 2  ;;  %vm4307_vm3 = vcmp.lt.s32.totalorder %v4306_v10, 2  ;;  %vm3992_vm4 = vweird.f32 %v7233_v60  ;;  %v4555_v60 = vld [vmem:[%s7509_s5 + $0x6] sm:$0x3] }
 0xd44   :  { %v4084_v24 = vand.u32 2147483647, %v4083_v40  ;;  %v3998_v19 = vsel %vm3996_vm9, %v4996_v26, %v3997_v2 }
 0xd45   :  { %v4002_v3 = vsel %vm3995_vm7, %v3998_v19, %v4001_v46  ;;  %vm4200_vm7 = vweird.f32 %v7231_v9 }
 0xd46   :  { %v4087_v34 = vmul.f32 %v4086_v20, %v4084_v24  ;;  %v4003_v61 = vsel %vm3992_vm4, nan, %v4002_v3 }
 0xd47   :  { %v5000_v38 = vpop.eup %4999 }
 0xd48   :  { %v4088_v35 = vxor.u32 2147483648, %v4087_v34  ;;  %v5002_v39 = vpop.eup %5001  ;;  %v4312_v31 = vxor.u32 2147483648, %v5000_v38 }
 0xd49   :  { %v5004_v50 = vpop.eup %5003  ;;  %v4309_v45 = vxor.u32 2147483648, %v5002_v39 }
 0xd4a   :  { %v4089_v44 = vsel %vm4006_vm6, %v4088_v35, %v4087_v34  ;;  %v5006_v17 = vpop.eup %5005  ;;  %v4205_v59 = vxor.u32 2147483648, %v5004_v50  ;;  %v4313_v36 = vsel %vm4311_vm13, %v4312_v31, %v5002_v39  ;;  %vm4203_vm6 = vcmp.lt.s32.totalorder %v4202_v56, 2 }
 0xd4b   :  { %v4092_v0 = vsel %vm4005_vm8, %v7252_v54, %v4089_v44  ;;  %v4208_v49 = vxor.u32 2147483648, %v5006_v17  ;;  %v4310_v6 = vsel %vm4308_vm12, %v5000_v38, %v4309_v45  ;;  %vm4304_vm8 = vweird.f32 %v7237_v25  ;;  %v4321_v54 = vpop.permute.xlu1 %4320 }
 0xd4c   :  { %5007 = vcosq.f32 %v4092_v0  ;;  %v4206_v52 = vsel %vm4204_vm11, %v5006_v17, %v4205_v59  ;;  %v4314_v13 = vsel %vm4307_vm3, %v4310_v6, %v4313_v36 }
 0xd4d   :  { %5009 = vsinq.f32 %v4092_v0  ;;  %v4209_v58 = vsel %vm4207_vm10, %v4208_v49, %v5004_v50  ;;  %v4315_v32 = vsel %vm4304_vm8, nan, %v4314_v13 }
 0xd4e   :  { %v4210_v8 = vsel %vm4203_vm6, %v4206_v52, %v4209_v58 }
 0xd4f   :  { %v4211_v41 = vsel %vm4200_vm7, nan, %v4210_v8 }
 0xd50   :  { %v4317_v24 = vpack.c.bf16 %v4315_v32, %v4211_v41 }
 0xd56   :  { %v5008_v53 = vpop.eup %5007 }
 0xd57   :  { %v5010_v22 = vpop.eup %5009  ;;  %v4104_v23 = vxor.u32 2147483648, %v5008_v53 }
 0xd58   :  { %v4101_v51 = vxor.u32 2147483648, %v5010_v22 }
 0xd59   :  { %v4105_v62 = vsel %vm4103_vm14, %v4104_v23, %v5010_v22 }
 0xd5a   :  { %v4102_v4 = vsel %vm4100_vm0, %v5008_v53, %v4101_v51 }
 0xd5b   :  { %v4106_v47 = vsel %vm4099_vm1, %v4102_v4, %v4105_v62 }
 0xd5c   :  { %v4107_v40 = vsel %vm4096_vm5, nan, %v4106_v47 }
 0xd5d   :  { %v4316_v28 = vpack.c.bf16 %v4107_v40, %v4003_v61 }
 0xd5f   :  { %4720 = vmatpush3.bf16.msra.mxu1 %v4316_v28 }
 0xd60   :  { %4721 = vmatprep.subr.bf16.mxu1 %v5020_v55 }
 0xd63   :  { %4722 = vmatpush3.bf16.msra.mxu1 %v4317_v24 }
 0xd66   :  { %4724 = vmatmul.mubr.msk.bf16.vlgmr.msra.gmra.mrb[20].mxu1 %vm590_vm15, %v4555_v60 }
 0xe39   :  { %v4360_v20 = vpop.f32.mrb[20].mxu1 }
 0xe3a   :  { %v4361_v1 = vadd.f32 %v4360_v20, %v4321_v54  ;;  %v4725_v21 = vpop.f32.mrb[21].mxu1 }
 0xe3b   :  { %v4363_v25 = vpop.f32.mrb[22].mxu1 }
 0xe3c   :  { %v4366_v34 = vadd.f32 %v4361_v1, %v6921_v27  ;;  %4598 = vst [vmem:[%s7510_s8 + $0xc] sm:$0x7] %v4361_v1  ;;  %v4726_v55 = vpop.f32.mrb[23].mxu1 }
 0xe3e   :  { %4369 = vst [vmem:[%s7511_s7] sm:$0x7] %v4366_v34 }

</bundles_post_ra>
